<compile_context>
chip_gen: v5e
topology: v5e:2x2
jax: 0.10.0
libtpu: 0.0.40
codegen_flags: <defaults>
</compile_context>

<pallas_src>
import jax
import jax.numpy as jnp
from jax import lax
from jax.experimental import pallas as pl
from jax.experimental.pallas import tpu as pltpu


def _round_up(a, b):
    return (a + b - 1) // b * b


def _cdiv(a, b):
    return -(-a // b)


def _modified_fc_block_kernel(x_ref, head_w_ref, head_b_ref, mid_ref, fin_ref, o_ref):
    # Shapes (all f32):
    #   x_ref      : (TB, in_features)          natural layout, contiguous DMA
    #   head_w_ref : (3*Hp, in_features)        [Wt1; Wt2; W0] transposed, rows padded
    #   head_b_ref : (3*Hp, 1)                  matching biases (pad rows zero)
    #   mid_ref    : (L, Hp+1, Hp+1)            middle layers, bias in last column,
    #                                           last row all-zero (ones-row machinery)
    #   fin_ref    : (out_features, Hp+1)       final layer, bias in last column
    #   o_ref      : (out_features, TB)         lane-dense output
    hp = head_b_ref.shape[0] // 3
    tb = x_ref.shape[0]

    x = x_ref[...]                                                 # (TB, in)

    # Fused head: one MXU push computes trans_1, trans_2 and the first layer's
    # pre-activation.  Contract on x's minor dim (transposed-rhs matmul).
    head = lax.dot_general(
        head_w_ref[...], x,
        dimension_numbers=(((1,), (1,)), ((), ())),
        preferred_element_type=jnp.float32,
    )                                                              # (3*Hp, TB)
    head = head + head_b_ref[...]                                  # single bias add

    trans_1 = head[0:hp]                                           # (Hp, TB)
    trans_2 = head[hp:2 * hp]
    h0 = jnp.sin(head[2 * hp:3 * hp])

    ones = jnp.ones((1, tb), jnp.float32)
    zeros = jnp.zeros((1, tb), jnp.float32)

    # Augmented (Hp+1, TB) tiles: the extra row carries the "ones" used to fold
    # biases into the dots; t1_aug row = 1 and diff_aug row = 0 so the lerp
    # reproduces the ones row every iteration for free.
    t1a = jnp.concatenate([trans_1, ones], axis=0)                 # (Hp+1, TB)
    diffa = jnp.concatenate([trans_2 - trans_1, zeros], axis=0)    # hoisted out of loop
    h = jnp.concatenate([h0, ones], axis=0)                        # (Hp+1, TB)

    for l in range(mid_ref.shape[0]):
        # Bias included in the dot via the ones row of h (extra contraction row
        # is free on the under-filled MXU).
        pre = jnp.dot(mid_ref[l], h, preferred_element_type=jnp.float32)
        h = t1a + jnp.sin(pre) * diffa                             # single-expression lerp

    y = jnp.dot(fin_ref[...], h, preferred_element_type=jnp.float32)  # (out, TB)
    o_ref[...] = y.astype(o_ref.dtype)                             # lane-dense store


def _pack_params(params, in_features, hidden, out_features):
    """Pack the 14 tiny weight/bias arrays into 4 transposed, padded slabs."""
    hp = _round_up(hidden, 8)
    hpa = hp + 1

    # Head slabs: rows [Wt1 ; Wt2 ; W0] transposed (each padded to hp rows) and
    # the matching (3*hp, 1) bias column.  Pad rows are zero.
    w_segs, b_segs = [], []
    for wk, bk in (("wt1", "bt1"), ("wt2", "bt2"), ("w0", "b0")):
        w_t = params[wk].T.astype(jnp.float32)                     # (hidden, in)
        b_t = params[bk].reshape(hidden, 1).astype(jnp.float32)    # (hidden, 1)
        w_segs.append(jnp.pad(w_t, ((0, hp - hidden), (0, 0))))
        b_segs.append(jnp.pad(b_t, ((0, hp - hidden), (0, 0))))
    head_w = jnp.concatenate(w_segs, axis=0)                       # (3*hp, in)
    head_b = jnp.concatenate(b_segs, axis=0)                       # (3*hp, 1)

    # Middle slab: (L, hpa, hpa).  For each layer: [:hidden, :hidden] = W.T,
    # [:hidden, hp] = bias, everything else zero.  The all-zero last row keeps
    # the ones row of h intact (sin(0)=0, t1a row=1, diffa row=0), and the
    # zero pad rows/cols keep pad activations exactly 0 through sin/lerp.
    mids = []
    for wk, bk in (("w1", "b1"), ("w2", "b2"), ("w3", "b3")):
        blk = jnp.zeros((hpa, hpa), jnp.float32)
        blk = blk.at[:hidden, :hidden].set(params[wk].T.astype(jnp.float32))
        blk = blk.at[:hidden, hp].set(params[bk].reshape(hidden).astype(jnp.float32))
        mids.append(blk[None])
    mid = jnp.concatenate(mids, axis=0)                            # (3, hpa, hpa)

    # Final slab: (out, hpa), bias in last column.
    fin = jnp.zeros((out_features, hpa), jnp.float32)
    fin = fin.at[:, :hidden].set(params["wf"].T.astype(jnp.float32))
    fin = fin.at[:, hp].set(params["bf"].reshape(out_features).astype(jnp.float32))

    return head_w, head_b, mid, fin


def _choose_batch_tile(n, batch_tile, min_grid_steps):
    """Padding-aware, lane-aligned batch tile with >= min_grid_steps (even) steps."""
    num_steps = max(1, _cdiv(n, batch_tile))
    # Force >=2 steps when n allows a >=128-lane tile per step (keeps both v7x
    # TensorCores busy); costs ~0.35us on single-core chips -> negligible.
    num_steps = max(num_steps, min(min_grid_steps, _cdiv(n, 128)))
    if num_steps > 1 and num_steps % 2 == 1:
        num_steps += 1                                             # even split for 2 TCs
    tb = max(128, _round_up(_cdiv(n, num_steps), 128))
    n_pad = _round_up(n, tb)
    return tb, n_pad


def modified_fc_block(x, params, *, batch_tile=4096, min_grid_steps=2):
    """x: (N, in_features) f32. params: dict of weights/biases (see init_params)."""
    n, in_features = x.shape
    hidden = params["w0"].shape[1]
    out_features = params["wf"].shape[1]

    head_w, head_b, mid, fin = _pack_params(params, in_features, hidden, out_features)

    x = x.astype(jnp.float32)

    tb, n_pad = _choose_batch_tile(n, batch_tile, min_grid_steps)
    if n_pad != n:
        # Row-only pad in x's natural layout (no transpose, no ones column).
        x = jnp.pad(x, ((0, n_pad - n), (0, 0)))

    grid = (n_pad // tb,)
    in_specs = [
        pl.BlockSpec((tb, in_features), lambda i: (i, 0)),
        pl.BlockSpec(head_w.shape, lambda i: (0, 0)),
        pl.BlockSpec(head_b.shape, lambda i: (0, 0)),
        pl.BlockSpec(mid.shape, lambda i: (0, 0, 0)),
        pl.BlockSpec(fin.shape, lambda i: (0, 0)),
    ]
    out_spec = pl.BlockSpec((out_features, tb), lambda i: (0, i))

    y_t = pl.pallas_call(
        _modified_fc_block_kernel,
        out_shape=jax.ShapeDtypeStruct((out_features, n_pad), jnp.float32),
        grid_spec=pltpu.PrefetchScalarGridSpec(
            num_scalar_prefetch=0,
            grid=grid,
            in_specs=in_specs,
            out_specs=out_spec,
        ),
        compiler_params=pltpu.CompilerParams(
            dimension_semantics=("parallel",),
            vmem_limit_bytes=32 * 1024 * 1024,   # safe on v7x's 64 MiB VMEM
        ),
    )(x, head_w, head_b, mid, fin)

    return y_t.T[:n]                                               # (n, out_features)


def _xavier_normal(key, fan_in, fan_out):
    std = (2.0 / (fan_in + fan_out)) ** 0.5
    # weight stored as (in, out) so the reference computes x @ W
    return std * jax.random.normal(key, (fan_in, fan_out), dtype=jnp.float32)


def _linear_bias(key, fan_in, fan_out):
    # PyTorch nn.Linear default bias init: U(-1/sqrt(fan_in), 1/sqrt(fan_in))
    bound = 1.0 / (fan_in ** 0.5)
    return jax.random.uniform(
        key, (1, fan_out), dtype=jnp.float32, minval=-bound, maxval=bound
    )


def init_params(key, in_features=3, hidden_features=20, out_features=1):
    keys = jax.random.split(key, 14)
    p = {}
    p["wt1"] = _xavier_normal(keys[0], in_features, hidden_features)
    p["bt1"] = _linear_bias(keys[1], in_features, hidden_features)
    p["wt2"] = _xavier_normal(keys[2], in_features, hidden_features)
    p["bt2"] = _linear_bias(keys[3], in_features, hidden_features)
    p["w0"] = _xavier_normal(keys[4], in_features, hidden_features)
    p["b0"] = _linear_bias(keys[5], in_features, hidden_features)
    p["w1"] = _xavier_normal(keys[6], hidden_features, hidden_features)
    p["b1"] = _linear_bias(keys[7], hidden_features, hidden_features)
    p["w2"] = _xavier_normal(keys[8], hidden_features, hidden_features)
    p["b2"] = _linear_bias(keys[9], hidden_features, hidden_features)
    p["w3"] = _xavier_normal(keys[10], hidden_features, hidden_features)
    p["b3"] = _linear_bias(keys[11], hidden_features, hidden_features)
    p["wf"] = _xavier_normal(keys[12], hidden_features, out_features)
    p["bf"] = _linear_bias(keys[13], hidden_features, out_features)
    return p


def reference_forward(x, p):
    """Plain-JAX reference matching the PyTorch module semantics."""
    t1 = x @ p["wt1"] + p["bt1"]
    t2 = x @ p["wt2"] + p["bt2"]
    h = jnp.sin(x @ p["w0"] + p["b0"])
    for w, b in (("w1", "b1"), ("w2", "b2"), ("w3", "b3")):
        o = jnp.sin(h @ p[w] + p[b])
        h = (1.0 - o) * t1 + o * t2
    return h @ p["wf"] + p["bf"]


if __name__ == "__main__":
    key = jax.random.PRNGKey(0)
    pkey, xkey1, xkey2 = jax.random.split(key, 3)

    in_features, hidden_features, out_features = 3, 20, 1
    params = init_params(pkey, in_features, hidden_features, out_features)

    ok = True

    # Case 1: n=256 with the default (derived) tile -> 2 grid steps of 128
    # lanes each (keeps both v7x TensorCores busy).
    x1 = jax.random.normal(xkey1, (256, in_features), dtype=jnp.float32)
    y1 = jax.block_until_ready(modified_fc_block(x1, params))
    y1_ref = reference_forward(x1, params)
    ok &= y1.shape == (256, out_features)
    ok &= bool(jnp.allclose(y1, y1_ref, atol=1e-4, rtol=1e-4))

    # Case 2: ragged n=300 -> exercises the pad-to-n_pad and [:n] slice path.
    x2 = jax.random.normal(xkey2, (300, in_features), dtype=jnp.float32)
    y2 = jax.block_until_ready(modified_fc_block(x2, params))
    y2_ref = reference_forward(x2, params)
    ok &= y2.shape == (300, out_features)
    ok &= bool(jnp.allclose(y2, y2_ref, atol=1e-4, rtol=1e-4))

    assert ok, "mismatch vs reference"
    print("KERNEL_OK")
</pallas_src>

<mosaic_0001>
module attributes {stable_mosaic.version = 11 : i64} {
  func.func @_modified_fc_block_kernel(%arg0: i32, %arg1: memref<128x3xf32, #tpu.memory_space<vmem>>, %arg2: memref<72x3xf32, #tpu.memory_space<vmem>>, %arg3: memref<72x1xf32, #tpu.memory_space<vmem>>, %arg4: memref<3x25x25xf32, #tpu.memory_space<vmem>>, %arg5: memref<1x25xf32, #tpu.memory_space<vmem>>, %arg6: memref<1x128xf32, #tpu.memory_space<vmem>>) attributes {dimension_semantics = [#tpu.dimension_semantics<parallel>], iteration_bounds = array<i64: 2>, scalar_prefetch = 0 : i64, scratch_operands = 0 : i64, tpu.core_type = #tpu.core_type<tc>, window_params = [{transform_indices = @transform_0, window_bounds = array<i64: 128, 3>}, {pipeline_mode = #tpu.pipeline_mode<synchronous>, transform_indices = @transform_1, window_bounds = array<i64: 72, 3>}, {pipeline_mode = #tpu.pipeline_mode<synchronous>, transform_indices = @transform_2, window_bounds = array<i64: 72, 1>}, {pipeline_mode = #tpu.pipeline_mode<synchronous>, transform_indices = @transform_3, window_bounds = array<i64: 3, 25, 25>}, {pipeline_mode = #tpu.pipeline_mode<synchronous>, transform_indices = @transform_4, window_bounds = array<i64: 1, 25>}, {transform_indices = @transform_5, window_bounds = array<i64: 1, 128>}]} {
    %c0 = arith.constant 0 : index
    %c0_0 = arith.constant 0 : index
    %0 = vector.load %arg1[%c0, %c0_0] : memref<128x3xf32, #tpu.memory_space<vmem>>, vector<128x3xf32>
    %c0_1 = arith.constant 0 : index
    %c0_2 = arith.constant 0 : index
    %1 = vector.load %arg2[%c0_1, %c0_2] : memref<72x3xf32, #tpu.memory_space<vmem>>, vector<72x3xf32>
    %cst = arith.constant dense<0.000000e+00> : vector<72x128xf32>
    %2 = tpu.matmul %1, %0, %cst {dimension_numbers = #tpu.dot_dimension_numbers<[1], [1], [0], [0], [0, 0, 1, 0], [], []>} : vector<72x3xf32>, vector<128x3xf32>, vector<72x128xf32> -> vector<72x128xf32>
    %c0_3 = arith.constant 0 : index
    %c0_4 = arith.constant 0 : index
    %3 = vector.load %arg3[%c0_3, %c0_4] : memref<72x1xf32, #tpu.memory_space<vmem>>, vector<72x1xf32>
    %4 = vector.broadcast %3 : vector<72x1xf32> to vector<72x128xf32>
    %5 = arith.addf %2, %4 : vector<72x128xf32>
    %6 = vector.extract_strided_slice %5 {offsets = [0, 0], sizes = [24, 128], strides = [1, 1]} : vector<72x128xf32> to vector<24x128xf32>
    %7 = vector.extract_strided_slice %5 {offsets = [24, 0], sizes = [24, 128], strides = [1, 1]} : vector<72x128xf32> to vector<24x128xf32>
    %8 = vector.extract_strided_slice %5 {offsets = [48, 0], sizes = [24, 128], strides = [1, 1]} : vector<72x128xf32> to vector<24x128xf32>
    %9 = math.sin %8 : vector<24x128xf32>
    %cst_5 = arith.constant 1.000000e+00 : f32
    %10 = vector.broadcast %cst_5 : f32 to vector<1x128xf32>
    %cst_6 = arith.constant 0.000000e+00 : f32
    %11 = vector.broadcast %cst_6 : f32 to vector<1x128xf32>
    %12 = tpu.concatenate %6, %10 in 0 : vector<24x128xf32>, vector<1x128xf32> -> vector<25x128xf32>
    %13 = arith.subf %7, %6 : vector<24x128xf32>
    %14 = tpu.concatenate %13, %11 in 0 : vector<24x128xf32>, vector<1x128xf32> -> vector<25x128xf32>
    %15 = tpu.concatenate %9, %10 in 0 : vector<24x128xf32>, vector<1x128xf32> -> vector<25x128xf32>
    %c0_7 = arith.constant 0 : index
    %c0_8 = arith.constant 0 : index
    %c0_9 = arith.constant 0 : index
    %16 = vector.load %arg4[%c0_7, %c0_8, %c0_9] : memref<3x25x25xf32, #tpu.memory_space<vmem>>, vector<1x25x25xf32>
    %17 = vector.shape_cast %16 : vector<1x25x25xf32> to vector<25x25xf32>
    %cst_10 = arith.constant dense<0.000000e+00> : vector<25x128xf32>
    %18 = tpu.matmul %17, %15, %cst_10 {dimension_numbers = #tpu.dot_dimension_numbers<[1], [0], [0], [1], [0, 0, 1, 1], [], []>} : vector<25x25xf32>, vector<25x128xf32>, vector<25x128xf32> -> vector<25x128xf32>
    %19 = math.sin %18 : vector<25x128xf32>
    %20 = arith.mulf %19, %14 : vector<25x128xf32>
    %21 = arith.addf %12, %20 : vector<25x128xf32>
    %c1 = arith.constant 1 : index
    %c0_11 = arith.constant 0 : index
    %c0_12 = arith.constant 0 : index
    %22 = vector.load %arg4[%c1, %c0_11, %c0_12] : memref<3x25x25xf32, #tpu.memory_space<vmem>>, vector<1x25x25xf32>
    %23 = vector.shape_cast %22 : vector<1x25x25xf32> to vector<25x25xf32>
    %cst_13 = arith.constant dense<0.000000e+00> : vector<25x128xf32>
    %24 = tpu.matmul %23, %21, %cst_13 {dimension_numbers = #tpu.dot_dimension_numbers<[1], [0], [0], [1], [0, 0, 1, 1], [], []>} : vector<25x25xf32>, vector<25x128xf32>, vector<25x128xf32> -> vector<25x128xf32>
    %25 = math.sin %24 : vector<25x128xf32>
    %26 = arith.mulf %25, %14 : vector<25x128xf32>
    %27 = arith.addf %12, %26 : vector<25x128xf32>
    %c2 = arith.constant 2 : index
    %c0_14 = arith.constant 0 : index
    %c0_15 = arith.constant 0 : index
    %28 = vector.load %arg4[%c2, %c0_14, %c0_15] : memref<3x25x25xf32, #tpu.memory_space<vmem>>, vector<1x25x25xf32>
    %29 = vector.shape_cast %28 : vector<1x25x25xf32> to vector<25x25xf32>
    %cst_16 = arith.constant dense<0.000000e+00> : vector<25x128xf32>
    %30 = tpu.matmul %29, %27, %cst_16 {dimension_numbers = #tpu.dot_dimension_numbers<[1], [0], [0], [1], [0, 0, 1, 1], [], []>} : vector<25x25xf32>, vector<25x128xf32>, vector<25x128xf32> -> vector<25x128xf32>
    %31 = math.sin %30 : vector<25x128xf32>
    %32 = arith.mulf %31, %14 : vector<25x128xf32>
    %33 = arith.addf %12, %32 : vector<25x128xf32>
    %c0_17 = arith.constant 0 : index
    %c0_18 = arith.constant 0 : index
    %34 = vector.load %arg5[%c0_17, %c0_18] : memref<1x25xf32, #tpu.memory_space<vmem>>, vector<1x25xf32>
    %cst_19 = arith.constant dense<0.000000e+00> : vector<1x128xf32>
    %35 = tpu.matmul %34, %33, %cst_19 {dimension_numbers = #tpu.dot_dimension_numbers<[1], [0], [0], [1], [0, 0, 1, 1], [], []>} : vector<1x25xf32>, vector<25x128xf32>, vector<1x128xf32> -> vector<1x128xf32>
    %c0_20 = arith.constant 0 : index
    %c0_21 = arith.constant 0 : index
    %36 = vector.load %arg6[%c0_20, %c0_21] : memref<1x128xf32, #tpu.memory_space<vmem>>, vector<1x128xf32>
    tpu.vector_store %arg6[%c0_20, %c0_21], %35 {strides = array<i32>} : memref<1x128xf32, #tpu.memory_space<vmem>>, vector<1x128xf32>,
    return
  }
  func.func @transform_0(%arg0: i32) -> (i32, i32) {
    %c0_i32 = arith.constant 0 : i32
    %c0_i32_0 = arith.constant 0 : i32
    return %arg0, %c0_i32 : i32, i32
  }
  func.func @transform_1(%arg0: i32) -> (i32, i32) {
    %c0_i32 = arith.constant 0 : i32
    %c0_i32_0 = arith.constant 0 : i32
    %c0_i32_1 = arith.constant 0 : i32
    return %c0_i32, %c0_i32_0 : i32, i32
  }
  func.func @transform_2(%arg0: i32) -> (i32, i32) {
    %c0_i32 = arith.constant 0 : i32
    %c0_i32_0 = arith.constant 0 : i32
    %c0_i32_1 = arith.constant 0 : i32
    return %c0_i32, %c0_i32_0 : i32, i32
  }
  func.func @transform_3(%arg0: i32) -> (i32, i32, i32) {
    %c0_i32 = arith.constant 0 : i32
    %c0_i32_0 = arith.constant 0 : i32
    %c0_i32_1 = arith.constant 0 : i32
    %c0_i32_2 = arith.constant 0 : i32
    return %c0_i32, %c0_i32_0, %c0_i32_1 : i32, i32, i32
  }
  func.func @transform_4(%arg0: i32) -> (i32, i32) {
    %c0_i32 = arith.constant 0 : i32
    %c0_i32_0 = arith.constant 0 : i32
    %c0_i32_1 = arith.constant 0 : i32
    return %c0_i32, %c0_i32_0 : i32, i32
  }
  func.func @transform_5(%arg0: i32) -> (i32, i32) {
    %c0_i32 = arith.constant 0 : i32
    %c0_i32_0 = arith.constant 0 : i32
    return %c0_i32, %arg0 : i32, i32
  }
}

</mosaic_0001>

<bundles_post_ra>
// kernel: tpu_custom_call.1
= control target key start
LH: loop header
LB: loop body
LE: loop exit
PB: predicated region body
PF: predicated region fallthrough
CT: control target
= control target key end

     0   :  { %10 = vsyncpa [#allocation3], 0  ;;  %s5351_s0 = inlined_call_operand.vmem [shape: f32[256,3], index: 0, kind: input, shape index: {}]   ;;  %s5352_s1 = inlined_call_operand.vmem [shape: f32[72,3], index: 1, kind: input, shape index: {}]   ;;  %s5353_s2 = inlined_call_operand.vmem [shape: f32[72,1], index: 2, kind: input, shape index: {}]   ;;  %s5354_s3 = inlined_call_operand.vmem [shape: f32[3,25,25], index: 3, kind: input, shape index: {}]   ;;  %s5355_s4 = inlined_call_operand.vmem [shape: f32[1,25], index: 4, kind: input, shape index: {}]   ;;  %s5356_s5 = inlined_call_operand.hbm [shape: f32[1,256], index: 5, kind: output, shape index: {}]  }
   0x1   :  { %12 = vsyncpa [#allocation3 + $0x1], 0  ;;  %s3274_s18 = smov 0   ;;  %s3276_s19 = smov 0  }
   0x2   :  { %s3278_s20 = smov 0   ;;  %s3280_s21 = smov 0  }
   0x3 LB: > { %s3295_s22 = sadd.s32 4294967295, %s3234_s21   ;;  %s3019_s23 = sadd.s32 4294967294, %s3234_s21   ;;  %s3234_s21 = sphi %s3280_s21, %s5410_s21   ;;  %s3230_s20 = sphi %s3278_s20, %s5409_s20   ;;  %s3226_s19 = sphi %s3276_s19, %s5408_s19   ;;  %s3222_s18 = sphi %s3274_s18, %s5407_s18  }
   0x4   : > { %s3299_s24 = sadd.s32 1, %s3234_s21   ;;  %s135_s25 = sadd.s32 1, %s3230_s20 }
   0x5   : > { %s132_s26 = ssub.s32 %s3234_s21, %s3299_s24  ;;  %p145_p0 = scmp.ne.s32.totalorder %s3230_s20, %s3226_s19 }
   0x6   : > { %p133_p1 = scmp.eq.s32.totalorder %s132_s26, 0  ;;  %p146_p2 = scmp.eq.s32.totalorder %s3295_s22, 1 }
   0x7   : > { %p151_p3 = scmp.ne.s32.totalorder %s3226_s19, %s3222_s18  ;;  %p152_p4 = scmp.eq.s32.totalorder %s3019_s23, 1 }
   0x8   : > { %s3310_s27 = scalar_select %p133_p1, %s3230_s20, %s135_s25  }
   0x9   : > { %p3312_p5 = por %p146_p2, %p145_p0  ;;  %p3316_p6 = por %p152_p4, %p151_p3 }
   0xa   : > { %p3022_p7 = scmp.ge.s32.totalorder %s3234_s21, 1  ;;  %p191_p8 = scmp.lt.s32.totalorder %s3234_s21, 3 }
   0xc   : > { %p192_p9 = pnand %p3022_p7, %p191_p8 }
   0xd   : > { %s3023_s30 = sshll.u32 (!%p192_p9), %s3295_s22, 4  ;;  %s216_s8 = sand.u32 (!%p192_p9), 1, %s3226_s19  }
   0xe   : > { %195 = sbr.rel (%p192_p9) target bundleno = 1489 (0x5d1), region = 40  ;;  %p219_p10 = scmp.lt.s32.totalorder (!%p192_p9), %s3023_s30, 31 }
   0xf   : > { %s2960_s11 = scalar_lea.hbm (!%p192_p9), %s5356_s5, %s3295_s22  ;;  %s217_s12 = scalar_lea.vmem (!%p192_p9), [#allocation2], %s216_s8 }
  0x10   : > { %s2962_s13 = sshll.u32 (!%p192_p9), %s217_s12, 4  ;;  %s2964_s14 = sshll.u32 (!%p192_p9), %s2960_s11, 4  ;;  %s2963_s13 = int_to_ptr.vmem [resolvable:$true] %s2962_s13  ;;  %s2965_s14 = int_to_ptr.hbm [resolvable:$true] %s2964_s14 }
  0x11   : > { %s2952_s15 = scalar_lea.sflag (!%p192_p9), [#allocation3], %s216_s8  ;;  %s3186_s16 = sshra.s32 (!%p192_p9), %s2965_s14, 4  ;;  %s3187_s16 = int_to_ptr.hbm [resolvable:$true] %s3186_s16 }
  0x12   : > { %s3188_s17 = scalar_lea.hbm (!%p192_p9), %s3187_s16, 1  ;;  %s3192_s26 = scalar_lea.hbm (!%p192_p9), %s5356_s5, 2 }
  0x13   : > { %s5412_s30 = smov (!%p219_p10, %s3023_s30), 31  ;;  %vm303_vm0 = vcmask 23552   ;;  %v255_v7 = vld [vmem:[%s5353_s2 + $0x30] sm:$0xff]  ;;  %v3236_v9 = vmov 0   ;;  %v249_v14 = vld [vmem:[%s5353_s2] sm:$0xff]  ;;  %v256_v22 = vld [vmem:[%s5353_s2 + $0x38] sm:$0xff]  ;;  %p3189_p11 = scmp.ne.s32.totalorder %s3187_s16, %s3188_s17 }
  0x14   : > { %s3024_s6 = sshll.u32 %s5412_s30, 3  ;;  %3170 = vset.pattern.permute.xlu1 %v3236_v9  ;;  %3169 = vset.pattern.permute.xlu0 %v3236_v9  ;;  %v251_v11 = vld [vmem:[%s5353_s2 + $0x10] sm:$0xff]  ;;  %v257_v19 = vld [vmem:[%s5353_s2 + $0x40] sm:$0xff]  ;;  %v254_v23 = vld [vmem:[%s5353_s2 + $0x28] sm:$0xff]  ;;  %vm908_vm1 = vcmask 1040384   ;;  %v3237_v47 = vmov 1.0   ;;  %p3193_p0 = scmp.lt.s32.totalorder %s3187_s16, %s5356_s5 }
  0x15   : > { %s3326_s9 = scalar_lea.vmem %s5351_s0, %s3024_s6  ;;  %290 = vperm.xlu1 %3170, %v255_v7   ;;  %3171 = vset.pattern.permute.xlu2 %v3236_v9  ;;  %v240_v21 = vld [vmem:[%s5352_s1] sm:$0xff]  ;;  %v241_v24 = vld [vmem:[%s5352_s1 + $0x8] sm:$0xff]  ;;  %v242_v27 = vld [vmem:[%s5352_s1 + $0x10] sm:$0xff]  ;;  %v5359_v7 = vmov 920167782   ;;  %p3190_p12 = pnand %p3189_p11, %p3312_p5 }
  0x16   : > { %v239_v0 = vld [vmem:[%s3326_s9 + $0x78] sm:$0xff]  ;;  %v238_v1 = vld [vmem:[%s3326_s9 + $0x70] sm:$0xff]  ;;  %v237_v2 = vld [vmem:[%s3326_s9 + $0x68] sm:$0xff]  ;;  %300 = vperm.xlu0 %3169, %v257_v19   ;;  %285 = vperm.xlu2 %3171, %v254_v23   ;;  %p3194_p1 = scmp.lt.s32.totalorder %s3192_s26, %s3188_s17 }
  0x17   : > { %3025 = vmatpush.xpose.msk.msra.mxu0 %vm303_vm0, %v239_v0  ;;  %v236_v3 = vld [vmem:[%s3326_s9 + $0x60] sm:$0xff]  ;;  %v235_v4 = vld [vmem:[%s3326_s9 + $0x58] sm:$0xff]  ;;  %v234_v5 = vld [vmem:[%s3326_s9 + $0x50] sm:$0xff]  ;;  %3059 = vmatpush.msk.msra.mxu1 %vm908_vm1, %v3237_v47  ;;  %p3191_p13 = pneg %p3190_p12 }
  0x18   : > { %v233_v6 = vld [vmem:[%s3326_s9 + $0x48] sm:$0xff]  ;;  %v232_v8 = vld [vmem:[%s3326_s9 + $0x40] sm:$0xff]  ;;  %v231_v10 = vld [vmem:[%s3326_s9 + $0x38] sm:$0xff]  ;;  %p3195_p2 = por %p3194_p1, %p3193_p0 }
  0x19   : > { %v230_v12 = vld [vmem:[%s3326_s9 + $0x30] sm:$0xff]  ;;  %v229_v13 = vld [vmem:[%s3326_s9 + $0x28] sm:$0xff]  ;;  %v228_v15 = vld [vmem:[%s3326_s9 + $0x20] sm:$0xff] }
  0x1a   : > { %v227_v16 = vld [vmem:[%s3326_s9 + $0x18] sm:$0xff]  ;;  %v226_v17 = vld [vmem:[%s3326_s9 + $0x10] sm:$0xff]  ;;  %v225_v18 = vld [vmem:[%s3326_s9 + $0x8] sm:$0xff]  ;;  %p3196_p3 = pnand %p3195_p2, %p3191_p13 }
  0x1b   : > { %3026 = vmatpush.xpose.msk.msra.mxu0 %vm303_vm0, %v238_v1  ;;  %v224_v20 = vld [vmem:[%s3326_s9] sm:$0xff]  ;;  %v250_v26 = vld [vmem:[%s5353_s2 + $0x8] sm:$0xff]  ;;  %v243_v28 = vld [vmem:[%s5352_s1 + $0x18] sm:$0xff] }
  0x1c   : > { %v253_v25 = vld [vmem:[%s5353_s2 + $0x20] sm:$0xff]  ;;  %v252_v29 = vld [vmem:[%s5353_s2 + $0x18] sm:$0xff]  ;;  %v245_v31 = vld [vmem:[%s5352_s1 + $0x28] sm:$0xff] }
  0x1d   : > { %270 = vperm.xlu1 %3170, %v251_v11   ;;  %v244_v30 = vld [vmem:[%s5352_s1 + $0x20] sm:$0xff]  ;;  %v246_v32 = vld [vmem:[%s5352_s1 + $0x30] sm:$0xff]  ;;  %v247_v33 = vld [vmem:[%s5352_s1 + $0x38] sm:$0xff] }
  0x1e   : > { %295 = vperm.xlu0 %3169, %v256_v22   ;;  %265 = vperm.xlu2 %3171, %v250_v26   ;;  %v248_v34 = vld [vmem:[%s5352_s1 + $0x40] sm:$0xff]  ;;  %v3241_v22 = vmov 683565275   ;;  %v5362_v26 = vmov 2475754826  }
  0x1f   : > { %3027 = vmatpush.xpose.msk.msra.mxu0 %vm303_vm0, %v237_v2 }
  0x23   : > { %3028 = vmatpush.xpose.msk.msra.mxu0 %vm303_vm0, %v236_v3 }
  0x25   : > { %260 = vperm.xlu1 %3170, %v249_v14   ;;  %v3239_v14 = vmov 2102212464  }
  0x26   : > { %280 = vperm.xlu0 %3169, %v253_v25   ;;  %275 = vperm.xlu2 %3171, %v252_v29  }
  0x27   : > { %3029 = vmatpush.xpose.msk.msra.mxu0 %vm303_vm0, %v235_v4 }
  0x2b   : > { %3030 = vmatpush.xpose.msk.msra.mxu0 %vm303_vm0, %v234_v5 }
  0x2f   : > { %3031 = vmatpush.xpose.msk.msra.mxu0 %vm303_vm0, %v233_v6 }
  0x33   : > { %3032 = vmatpush.xpose.msk.msra.mxu0 %vm303_vm0, %v232_v8 }
  0x37   : > { %3033 = vmatpush.xpose.msk.msra.mxu0 %vm303_vm0, %v231_v10 }
  0x3b   : > { %3034 = vmatpush.xpose.msk.msra.mxu0 %vm303_vm0, %v230_v12 }
  0x3f   : > { %3035 = vmatpush.xpose.msk.msra.mxu0 %vm303_vm0, %v229_v13 }
  0x43   : > { %3036 = vmatpush.xpose.msk.msra.mxu0 %vm303_vm0, %v228_v15 }
  0x47   : > { %3037 = vmatpush.xpose.msk.msra.mxu0 %vm303_vm0, %v227_v16  ;;  %v5357_v16 = vmov 1326507024  }
  0x4b   : > { %3038 = vmatpush.xpose.msk.msra.mxu0 %vm303_vm0, %v226_v17 }
  0x4f   : > { %3039 = vmatpush.xpose.msk.msra.mxu0 %vm303_vm0, %v225_v18 }
  0x53   : > { %3040 = vmatpush.xpose.msk.msra.mxu0 %vm303_vm0, %v224_v20 }
  0x56   : > { %3041 = vmatmul.msk.f32.vlgmr.msra.gmra.mxu0 %vm303_vm0, %v240_v21 }
  0x5e   : > { %3042 = vmatmul.msk.f32.gmra.mxu0 %vm303_vm0, %v241_v24 }
  0x66   : > { %3043 = vmatmul.msk.f32.gmra.mxu0 %vm303_vm0, %v242_v27 }
  0x6e   : > { %3044 = vmatmul.msk.f32.gmra.mxu0 %vm303_vm0, %v243_v28 }
  0x76   : > { %3045 = vmatmul.msk.f32.gmra.mxu0 %vm303_vm0, %v244_v30 }
  0x7e   : > { %3046 = vmatmul.msk.f32.gmra.mxu0 %vm303_vm0, %v245_v31 }
  0x86   : > { %3047 = vmatmul.msk.f32.gmra.mxu0 %vm303_vm0, %v246_v32  ;;  %v5366_v32 = vmov 2131351028  }
  0x87   : > { %v291_v42 = vpop.permute.xlu1 %290 }
  0x88   : > { %v301_v41 = vpop.permute.xlu0 %300 }
  0x8e   : > { %3048 = vmatmul.msk.f32.gmra.mxu0 %vm303_vm0, %v247_v33 }
  0x90   : > { %v296_v49 = vpop.permute.xlu0 %295 }
  0x96   : > { %3049 = vmatmul.msk.f32.gmra.mxu0 %vm303_vm0, %v248_v34 }
  0xd3   : > { %v3426_v35 = vpop.f32.mrf.mxu0 }
  0xdb   : > { %v3428_v36 = vpop.f32.mrf.mxu0 }
  0xe3   : > { %v3430_v37 = vpop.f32.mrf.mxu0 }
  0xeb   : > { %v3432_v38 = vpop.f32.mrf.mxu0 }
  0xf3   : > { %v3434_v39 = vpop.f32.mrf.mxu0 }
  0xfb   : > { %v3436_v40 = vpop.f32.mrf.mxu0 }
 0x103   : > { %v414_v43 = vpop.f32.mrf.mxu0 }
 0x104   : > { %v3438_v44 = vadd.f32 %v414_v43, %v291_v42 }
 0x106   : > { %v426_v45 = vand.u32 2139095040, %v3438_v44  ;;  %v5361_v58 = vand.u32 2147483647, %v3438_v44 }
 0x108   : > { %v427_v46 = vshrl.u32 %v426_v45, 23  ;;  %v3458_v1 = vand.u32 8388607, %v5361_v58 }
 0x10a   : > { %v3050_v48 = vadd.s32 4294967169, %v427_v46 }
 0x10b   : > { %v417_v50 = vpop.f32.mrf.mxu0 }
 0x10c   : > { %v433_v51 = vadd.s32 1, %v3050_v48  ;;  %v3442_v52 = vadd.f32 %v417_v50, %v296_v49 }
 0x10e   : > { %vm434_vm2 = vcmp.gt.s32.totalorder %v433_v51, 0  ;;  %v581_v53 = vand.u32 2139095040, %v3442_v52  ;;  %v5364_v55 = vand.u32 2147483647, %v3442_v52 }
 0x10f   : > { %v435_v54 = vsel %vm434_vm2, %v433_v51, 0 }
 0x110   : > { %v582_v56 = vshrl.u32 %v581_v53, 23  ;;  %v3446_v57 = vand.u32 31, %v435_v54  ;;  %v585_v61 = vand.u32 8388607, %v5364_v55  ;;  %v3467_v13 = vshrl.u32 %v435_v54, 5 }
 0x112   : > { %v3053_v59 = vadd.s32 4294967169, %v582_v56  ;;  %v3454_v63 = vsub.s32 32, %v3446_v57  ;;  %v586_v4 = vor.u32 8388608, %v585_v61  ;;  %v449_v15 = vshll.u32 %v3239_v14, %v3446_v57 }
 0x113   : > { %v420_v60 = vpop.f32.mrf.mxu0  ;;  %v3477_v19 = vshll.u32 %v5359_v7, %v3446_v57  ;;  %v3485_v23 = vshll.u32 %v3241_v22, %v3446_v57  ;;  %v3493_v28 = vshll.u32 %v5362_v26, %v3446_v57  ;;  %vm458_vm13 = vcmp.lt.s32.totalorder %v3467_v13, 4 }
 0x114   : > { %v3451_v62 = vadd.f32 %v420_v60, %v301_v41  ;;  %v588_v0 = vadd.s32 1, %v3053_v59  ;;  %v450_v8 = vshrl.u32 %v5359_v7, %v3454_v63  ;;  %v3473_v17 = vshrl.u32 %v5357_v16, %v3454_v63 }
 0x115   : > { %v3481_v21 = vshll.u32 %v586_v4, 8  ;;  %v3489_v27 = vshrl.u32 %v5362_v26, %v3454_v63  ;;  %v3503_v33 = vshrl.u32 %v5366_v32, %v3454_v63 }
 0x116   : > { %v736_v2 = vand.u32 2139095040, %v3451_v62  ;;  %v5365_v3 = vand.u32 2147483647, %v3451_v62  ;;  %vm589_vm3 = vcmp.gt.s32.totalorder %v588_v0, 0  ;;  %v3495_v29 = vor.u32 %v450_v8, %v449_v15 }
 0x117   : > { %v590_v5 = vsel %vm589_vm3, %v588_v0, 0  ;;  %v3515_v47 = vand.u32 65535, %v3481_v21  ;;  %v3520_v51 = vshrl.u32 %v3481_v21, 16 }
 0x118   : > { %v737_v6 = vshrl.u32 %v736_v2, 23  ;;  %v592_v10 = vand.u32 31, %v590_v5  ;;  %v740_v11 = vand.u32 8388607, %v5365_v3  ;;  %v3497_v30 = vshrl.u32 %v590_v5, 5 }
 0x11a   : > { %v3056_v18 = vadd.s32 4294967169, %v737_v6  ;;  %v3479_v20 = vsub.s32 32, %v592_v10  ;;  %v741_v25 = vor.u32 8388608, %v740_v11  ;;  %v604_v43 = vshll.u32 %v3239_v14, %v592_v10 }
 0x11b   : > { %v607_v48 = vshll.u32 %v5359_v7, %v592_v10  ;;  %v595_v50 = vshll.u32 %v3241_v22, %v592_v10  ;;  %vm613_vm5 = vcmp.lt.s32.totalorder %v3497_v30, 4  ;;  %v598_v54 = vshll.u32 %v5362_v26, %v592_v10 }
 0x11c   : > { %v743_v24 = vadd.s32 1, %v3056_v18  ;;  %v605_v31 = vshrl.u32 %v5359_v7, %v3479_v20  ;;  %v608_v41 = vshrl.u32 %v5357_v16, %v3479_v20  ;;  %v596_v42 = vshrl.u32 %v5362_v26, %v3479_v20 }
 0x11d   : > { %v3512_v46 = vshll.u32 %v741_v25, 8  ;;  %v599_v56 = vshrl.u32 %v5366_v32, %v3479_v20  ;;  %v601_v59 = vshll.u32 %v5366_v32, %v592_v10  ;;  %vm610_vm10 = vcmp.lt.s32.totalorder %v3497_v30, 1 }
 0x11e   : > { %vm744_vm4 = vcmp.gt.s32.totalorder %v743_v24, 0  ;;  %v3522_v53 = vor.u32 %v605_v31, %v604_v43  ;;  %v609_v60 = vor.u32 %v608_v41, %v607_v48  ;;  %v3529_v2 = vor.u32 %v596_v42, %v595_v50 }
 0x11f   : > { %v745_v45 = vsel %vm744_vm4, %v743_v24, 0  ;;  %v782_v6 = vand.u32 65535, %v3512_v46  ;;  %v783_v8 = vshrl.u32 %v3512_v46, 16  ;;  %v602_v48 = vshrl.u32 %v3239_v14, %v3479_v20 }
 0x120   : > { %v747_v49 = vand.u32 31, %v745_v45  ;;  %v746_v61 = vshrl.u32 %v745_v45, 5  ;;  %v3556_v34 = vor.u32 %v599_v56, %v598_v54  ;;  %vm611_vm11 = vcmp.lt.s32.totalorder %v3497_v30, 2 }
 0x121   : > { %vm612_vm12 = vcmp.lt.s32.totalorder %v3497_v30, 3 }
 0x122   : > { %v748_v0 = vsub.s32 32, %v747_v49  ;;  %v759_v4 = vshll.u32 %v3239_v14, %v747_v49  ;;  %v762_v5 = vshll.u32 %v5359_v7, %v747_v49  ;;  %v750_v18 = vshll.u32 %v3241_v22, %v747_v49 }
 0x123   : > { %v753_v24 = vshll.u32 %v5362_v26, %v747_v49  ;;  %v756_v31 = vshll.u32 %v5366_v32, %v747_v49  ;;  %vm768_vm6 = vcmp.lt.s32.totalorder %v746_v61, 4  ;;  %vm765_vm7 = vcmp.lt.s32.totalorder %v746_v61, 1 }
 0x124   : > { %v760_v11 = vshrl.u32 %v5359_v7, %v748_v0  ;;  %v763_v15 = vshrl.u32 %v5357_v16, %v748_v0  ;;  %v751_v10 = vshrl.u32 %v5362_v26, %v748_v0  ;;  %v754_v25 = vshrl.u32 %v5366_v32, %v748_v0 }
 0x125   : > { %v757_v41 = vshrl.u32 %v3239_v14, %v748_v0  ;;  %vm766_vm8 = vcmp.lt.s32.totalorder %v746_v61, 2  ;;  %vm767_vm9 = vcmp.lt.s32.totalorder %v746_v61, 3  ;;  %v618_v61 = vsel %vm610_vm10, %v3529_v2, %v3556_v34 }
 0x126   : > { %v761_v42 = vor.u32 %v760_v11, %v759_v4  ;;  %v764_v43 = vor.u32 %v763_v15, %v762_v5  ;;  %v752_v45 = vor.u32 %v751_v10, %v750_v18  ;;  %v755_v50 = vor.u32 %v754_v25, %v753_v24 }
 0x127   : > { %v758_v16 = vor.u32 %v757_v41, %v756_v31  ;;  %v619_v4 = vsel %vm613_vm5, %v3522_v53, 920167782  ;;  %v749_v5 = vshrl.u32 %v3241_v22, %v748_v0  ;;  %v623_v18 = vsel %vm613_vm5, %v609_v60, 1326507024 }
 0x128   : > { %v774_v7 = vsel %vm768_vm6, %v761_v42, 920167782  ;;  %v778_v58 = vsel %vm768_vm6, %v764_v43, 1326507024  ;;  %v773_v55 = vsel %vm765_vm7, %v752_v45, %v755_v50  ;;  %v603_v0 = vor.u32 %v602_v48, %v601_v59 }
 0x129   : > { %v770_v26 = vsel %vm768_vm6, %v758_v16, 2102212464  ;;  %v775_v49 = vsel %vm767_vm9, %v758_v16, %v774_v7  ;;  %v777_v3 = vsel %vm765_vm7, %v755_v50, %v758_v16  ;;  %v779_v15 = vsel %vm767_vm9, %v761_v42, %v778_v58 }
 0x12a   : > { %v776_v11 = vsel %vm766_vm8, %v773_v55, %v775_v49  ;;  %v780_v10 = vsel %vm766_vm8, %v777_v3, %v779_v15  ;;  %v769_v7 = vsel %vm765_vm7, %v749_v5, %v752_v45  ;;  %v771_v31 = vsel %vm767_vm9, %v755_v50, %v770_v26 }
 0x12b   : > { %v806_v24 = vand.u32 65535, %v776_v11  ;;  %v807_v25 = vshrl.u32 %v776_v11, 16  ;;  %v784_v16 = vand.u32 65535, %v780_v10  ;;  %v785_v41 = vshrl.u32 %v780_v10, 16 }
 0x12c   : > { %v772_v58 = vsel %vm766_vm8, %v769_v7, %v771_v31  ;;  %v620_v10 = vsel %vm612_vm12, %v603_v0, %v619_v4  ;;  %v622_v31 = vsel %vm610_vm10, %v3556_v34, %v603_v0  ;;  %vm455_vm8 = vcmp.lt.s32.totalorder %v3467_v13, 1 }
 0x12d   : > { %v809_v43 = vmul.u32 %v807_v25, %v782_v6  ;;  %v810_v12 = vmul.u32 %v806_v24, %v783_v8  ;;  %v787_v32 = vmul.u32 %v785_v41, %v782_v6  ;;  %v788_v55 = vmul.u32 %v784_v16, %v783_v8 }
 0x12e   : > { %v808_v3 = vmul.u32 %v806_v24, %v782_v6  ;;  %v786_v26 = vmul.u32 %v784_v16, %v782_v6  ;;  %v789_v42 = vmul.u32 %v785_v41, %v783_v8  ;;  %v811_v54 = vmul.u32 %v807_v25, %v783_v8 }
 0x12f   : > { %v812_v60 = vshll.u32 %v809_v43, 16  ;;  %v790_v45 = vshll.u32 %v787_v32, 16  ;;  %v792_v56 = vshll.u32 %v788_v55, 16  ;;  %v814_v59 = vshll.u32 %v810_v12, 16 }
 0x130   : > { %v813_v11 = vshrl.u32 %v809_v43, 16  ;;  %v621_v7 = vsel %vm611_vm11, %v618_v61, %v620_v10  ;;  %v791_v16 = vshrl.u32 %v787_v32, 16  ;;  %v624_v43 = vsel %vm612_vm12, %v3522_v53, %v623_v18 }
 0x131   : > { %vm816_vm14 = vc.u32 %v808_v3, %v812_v60  ;;  %v818_v48 = vadd.s32 %v812_v60, %v808_v3  ;;  %vm794_vm15 = vc.u32 %v786_v26, %v790_v45  ;;  %v796_v50 = vadd.s32 %v790_v45, %v786_v26 }
 0x132   : > { %v817_v49 = vsel %vm816_vm14, 1, %v3236_v9  ;;  %v795_v5 = vsel %vm794_vm15, 1, %v3236_v9  ;;  %v652_v3 = vshrl.u32 %v621_v7, 16  ;;  %v815_v60 = vshrl.u32 %v810_v12, 16 }
 0x133   : > { %v819_v6 = vadd.s32 %v817_v49, %v811_v54  ;;  %vm820_vm0 = vc.u32 %v818_v48, %v814_v59  ;;  %v797_v15 = vadd.s32 %v795_v5, %v789_v42  ;;  %vm798_vm2 = vc.u32 %v796_v50, %v792_v56 }
 0x134   : > { %v821_v8 = vsel %vm820_vm0, 1, %v3236_v9  ;;  %v799_v24 = vsel %vm798_vm2, 1, %v3236_v9  ;;  %v625_v4 = vsel %vm611_vm11, %v622_v31, %v624_v43  ;;  %v651_v42 = vand.u32 65535, %v621_v7 }
 0x135   : > { %v823_v25 = vadd.s32 %v821_v8, %v819_v6  ;;  %v801_v41 = vadd.s32 %v799_v24, %v797_v15  ;;  %v793_v45 = vshrl.u32 %v788_v55, 16  ;;  %v629_v56 = vand.u32 65535, %v625_v4 }
 0x136   : > { %v630_v50 = vshrl.u32 %v625_v4, 16  ;;  %v3586_v32 = vsel %vm458_vm13, %v3495_v29, 920167782  ;;  %v594_v53 = vshrl.u32 %v3241_v22, %v3479_v20  ;;  %v654_v12 = vmul.u32 %v652_v3, %v3515_v47 }
 0x137   : > { %v824_v26 = vadd.s32 %v823_v25, %v813_v11  ;;  %v802_v54 = vadd.s32 %v801_v41, %v791_v16  ;;  %v3593_v61 = vadd.s32 %v818_v48, %v814_v59  ;;  %v633_v5 = vmul.u32 %v629_v56, %v3520_v51 }
 0x138   : > { %v632_v55 = vmul.u32 %v630_v50, %v3515_v47  ;;  %v826_v11 = vmul.u32 %v3512_v46, %v772_v58  ;;  %v655_v15 = vmul.u32 %v651_v42, %v3520_v51  ;;  %v657_v8 = vshll.u32 %v654_v12, 16 }
 0x139   : > { %v825_v49 = vadd.s32 %v824_v26, %v815_v60  ;;  %v3591_v18 = vadd.s32 %v802_v54, %v793_v45  ;;  %v615_v20 = vsel %vm613_vm5, %v603_v0, 2102212464  ;;  %v631_v10 = vmul.u32 %v629_v56, %v3515_v47 }
 0x13a   : > { %v635_v59 = vshll.u32 %v632_v55, 16  ;;  %v634_v24 = vmul.u32 %v630_v50, %v3520_v51  ;;  %v653_v25 = vmul.u32 %v651_v42, %v3515_v47  ;;  %v656_v46 = vmul.u32 %v652_v3, %v3520_v51 }
 0x13b   : > { %v829_v6 = vadd.s32 1, %v825_v49  ;;  %vm828_vm3 = vc.u32 %v3591_v18, %v3593_v61  ;;  %v637_v7 = vshll.u32 %v633_v5, 16  ;;  %v659_v41 = vshll.u32 %v655_v15, 16 }
 0x13c   : > { %vm639_vm4 = vc.u32 %v631_v10, %v635_v59  ;;  %v641_v31 = vadd.s32 %v635_v59, %v631_v10  ;;  %vm661_vm6 = vc.u32 %v653_v25, %v657_v8  ;;  %v663_v43 = vadd.s32 %v657_v8, %v653_v25 }
 0x13d   : > { %v830_v48 = vsel %vm828_vm3, %v829_v6, %v825_v49  ;;  %v640_v16 = vsel %vm639_vm4, 1, %v3236_v9  ;;  %v662_v26 = vsel %vm661_vm6, 1, %v3236_v9  ;;  %v447_v47 = vshrl.u32 %v3239_v14, %v3454_v63 }
 0x13e   : > { %v831_v58 = vadd.s32 %v830_v48, %v826_v11  ;;  %v642_v60 = vadd.s32 %v640_v16, %v634_v24  ;;  %vm643_vm5 = vc.u32 %v641_v31, %v637_v7  ;;  %v664_v45 = vadd.s32 %v662_v26, %v656_v46 }
 0x13f   : > { %v644_v4 = vsel %vm643_vm5, 1, %v3236_v9  ;;  %vm665_vm7 = vc.u32 %v663_v43, %v659_v41  ;;  %v636_v3 = vshrl.u32 %v632_v55, 16  ;;  %v614_v56 = vsel %vm610_vm10, %v594_v53, %v3529_v2 }
 0x140   : > { %v832_v0 = vadd.s32 536870912, %v831_v58  ;;  %v646_v42 = vadd.s32 %v644_v4, %v642_v60  ;;  %v666_v54 = vsel %vm665_vm7, 1, %v3236_v9  ;;  %v658_v50 = vshrl.u32 %v654_v12, 16 }
 0x141   : > { %v668_v49 = vadd.s32 %v666_v54, %v664_v45  ;;  %v5370_v11 = vmov 2131351028   ;;  %v616_v10 = vsel %vm612_vm12, %v3556_v34, %v615_v20  ;;  %v638_v59 = vshrl.u32 %v633_v5, 16 }
 0x142   : > { %v3612_v51 = vshrl.u32 %v832_v0, 30  ;;  %v446_v6 = vshll.u32 %v5370_v11, %v3446_v57  ;;  %v647_v55 = vadd.s32 %v646_v42, %v636_v3  ;;  %v660_v48 = vshrl.u32 %v655_v15, 16 }
 0x143   : > { %v669_v24 = vadd.s32 %v668_v49, %v658_v50  ;;  %v3626_v25 = vor.u32 %v3503_v33, %v3493_v28  ;;  %v5371_v53 = vor.u32 %v3473_v17, %v3477_v19  ;;  %v3639_v34 = vor.u32 %v3489_v27, %v3485_v23 }
 0x144   : > { %v834_v8 = vshll.u32 %v3612_v51, 30  ;;  %v3628_v2 = vor.u32 %v447_v47, %v446_v6  ;;  %v3635_v46 = vadd.s32 %v647_v55, %v638_v59  ;;  %v617_v5 = vsel %vm611_vm11, %v614_v56, %v616_v10 }
 0x145   : > { %v468_v57 = vsel %vm458_vm13, %v5371_v53, 1326507024  ;;  %v3643_v28 = vadd.s32 %v663_v43, %v659_v41  ;;  %v670_v33 = vadd.s32 %v669_v24, %v660_v48  ;;  %vm456_vm10 = vcmp.lt.s32.totalorder %v3467_v13, 2 }
 0x146   : > { %v835_v12 = vsub.s32 %v831_v58, %v834_v8  ;;  %vm457_vm12 = vcmp.lt.s32.totalorder %v3467_v13, 3  ;;  %v467_v23 = vsel %vm455_vm8, %v3626_v25, %v3628_v2  ;;  %v671_v15 = vmul.u32 %v3481_v21, %v617_v5 }
 0x147   : > { %vm673_vm14 = vc.u32 %v3635_v46, %v3643_v28  ;;  %v674_v19 = vadd.s32 1, %v670_v33  ;;  %v469_v27 = vsel %vm457_vm12, %v3495_v29, %v468_v57  ;;  %v5372_v58 = vor.u32 8388608, %v3458_v1 }
 0x148   : > { %vm836_vm9 = vcmp.lt.s32.totalorder %v835_v12, 0  ;;  %v837_v17 = vsub.s32 0, %v835_v12  ;;  %v470_v20 = vsel %vm456_vm10, %v467_v23, %v469_v27  ;;  %v463_v0 = vsel %vm455_vm8, %v3639_v34, %v3626_v25 }
 0x149   : > { %v3662_v7 = vshll.u32 %v5372_v58, 8  ;;  %v675_v16 = vsel %vm673_vm14, %v674_v19, %v670_v33  ;;  %v475_v41 = vshrl.u32 %v470_v20, 16  ;;  %v465_v21 = vsel %vm457_vm12, %v3628_v2, %v3586_v32 }
 0x14a   : > { %v838_v30 = vsel %vm836_vm9, %v837_v17, %v835_v12  ;;  %v676_v43 = vadd.s32 %v675_v16, %v671_v15  ;;  %v474_v29 = vand.u32 65535, %v470_v20  ;;  %v466_v45 = vsel %vm456_vm10, %v463_v0, %v465_v21 }
 0x14b   : > { %v839_v31 = vclz %v838_v30  ;;  %v472_v1 = vand.u32 65535, %v3662_v7  ;;  %v473_v4 = vshrl.u32 %v3662_v7, 16  ;;  %v827_v3 = vadd.s32 %v3593_v61, %v3591_v18 }
 0x14c   : > { %v677_v26 = vadd.s32 536870912, %v676_v43  ;;  %v496_v59 = vand.u32 65535, %v466_v45  ;;  %v497_v55 = vshrl.u32 %v466_v45, 16  ;;  %v439_v58 = vshrl.u32 %v3241_v22, %v3454_v63 }
 0x14d   : > { %v3057_v60 = vadd.s32 4294967294, %v839_v31  ;;  %v477_v47 = vmul.u32 %v475_v41, %v472_v1  ;;  %v3680_v56 = vmul.u32 %v474_v29, %v473_v4  ;;  %v476_v49 = vmul.u32 %v474_v29, %v472_v1 }
 0x14e   : > { %v3678_v54 = vshrl.u32 %v677_v26, 30  ;;  %v479_v10 = vmul.u32 %v475_v41, %v473_v4  ;;  %v499_v15 = vmul.u32 %v497_v55, %v472_v1  ;;  %v500_v31 = vmul.u32 %v496_v59, %v473_v4 }
 0x14f   : > { %vm3058_vm11 = vcmp.lt.s32.totalorder %v3057_v60, 0  ;;  %v480_v6 = vshll.u32 %v477_v47, 16  ;;  %v482_v18 = vshll.u32 %v3680_v56, 16  ;;  %v5373_v21 = vand.u32 2147483647, %v3451_v62 }
 0x150   : > { %v842_v42 = vsel %vm3058_vm11, 0, %v3057_v60  ;;  %v679_v8 = vshll.u32 %v3678_v54, 30  ;;  %v502_v0 = vshll.u32 %v499_v15, 16  ;;  %vm735_vm4 = vcmp.lt.s32.totalorder %v3451_v62, 0 }
 0x151   : > { %v843_v32 = vsub.s32 32, %v842_v42  ;;  %v847_v50 = vsub.s32 4294967266, %v842_v42  ;;  %v844_v48 = vshll.u32 %v835_v12, %v842_v42  ;;  %vm484_vm15 = vc.u32 %v476_v49, %v480_v6 }
 0x152   : > { %v680_v57 = vsub.s32 %v676_v43, %v679_v8  ;;  %v485_v61 = vsel %vm484_vm15, 1, %v3236_v9  ;;  %v486_v5 = vadd.s32 %v480_v6, %v476_v49  ;;  %v857_v12 = vsub.s32 4, %v3612_v51 }
 0x153   : > { %v845_v24 = vshrl.u32 %v827_v3, %v843_v32  ;;  %v848_v53 = vadd.s32 127, %v847_v50  ;;  %v487_v23 = vadd.s32 %v485_v61, %v479_v10  ;;  %vm3691_vm3 = vcmp.le.f32.partialorder %v5373_v21, 0.7853982 }
 0x154   : > { %vm681_vm0 = vcmp.lt.s32.totalorder %v680_v57, 0  ;;  %v682_v19 = vsub.s32 0, %v680_v57  ;;  %vm488_vm2 = vc.u32 %v486_v5, %v482_v18  ;;  %v498_v26 = vmul.u32 %v496_v59, %v472_v1 }
 0x155   : > { %v846_v33 = vor.u32 %v845_v24, %v844_v48  ;;  %v849_v17 = vshll.u32 %v848_v53, 23  ;;  %v489_v30 = vsel %vm488_vm2, 1, %v3236_v9  ;;  %v460_v63 = vsel %vm458_vm13, %v3628_v2, 2102212464 }
 0x156   : > { %v683_v20 = vsel %vm681_vm0, %v682_v19, %v680_v57  ;;  %v491_v60 = vadd.s32 %v489_v30, %v487_v23  ;;  %v481_v42 = vshrl.u32 %v477_v47, 16  ;;  %v501_v32 = vmul.u32 %v497_v55, %v473_v4 }
 0x157   : > { %v850_v27 = vor.u32 4788187, %v849_v17  ;;  %v853_v41 = vcvt.s32.f32 %v846_v33  ;;  %v684_v43 = vclz %v683_v20  ;;  %v504_v50 = vshll.u32 %v500_v31, 16 }
 0x158   : > { %vm506_vm6 = vc.u32 %v498_v26, %v502_v0  ;;  %v508_v49 = vadd.s32 %v502_v0, %v498_v26  ;;  %v858_v8 = vsel %vm735_vm4, %v857_v12, %v3612_v51  ;;  %v492_v59 = vadd.s32 %v491_v60, %v481_v42 }
 0x159   : > { %v851_v16 = vand.u32 2147483647, %v850_v27  ;;  %v3054_v3 = vadd.s32 4294967294, %v684_v43  ;;  %v507_v10 = vsel %vm506_vm6, 1, %v3236_v9  ;;  %v672_v4 = vadd.s32 %v3643_v28, %v3635_v46 }
 0x15a   : > { %v509_v48 = vadd.s32 %v507_v10, %v501_v32  ;;  %vm510_vm7 = vc.u32 %v508_v49, %v504_v50  ;;  %v483_v53 = vshrl.u32 %v3680_v56, 16  ;;  %v459_v19 = vsel %vm455_vm8, %v439_v58, %v3639_v34 }
 0x15b   : > { %v854_v45 = vmul.f32 %v853_v41, %v851_v16  ;;  %vm3055_vm5 = vcmp.lt.s32.totalorder %v3054_v3, 0  ;;  %v511_v18 = vsel %vm510_vm7, 1, %v3236_v9  ;;  %v461_v46 = vsel %vm457_vm12, %v3626_v25, %v460_v63 }
 0x15c   : > { %v687_v1 = vsel %vm3055_vm5, 0, %v3054_v3  ;;  %v513_v17 = vadd.s32 %v511_v18, %v509_v48  ;;  %v3718_v28 = vadd.s32 %v492_v59, %v483_v53  ;;  %v503_v23 = vshrl.u32 %v499_v15, 16 }
 0x15d   : > { %v855_v6 = vxor.u32 2147483648, %v854_v45  ;;  %v688_v47 = vsub.s32 32, %v687_v1  ;;  %v692_v55 = vsub.s32 4294967266, %v687_v1  ;;  %v689_v51 = vshll.u32 %v680_v57, %v687_v1 }
 0x15e   : > { %v860_v12 = vsel %vm3691_vm3, 0, %v858_v8  ;;  %v505_v20 = vshrl.u32 %v500_v31, 16  ;;  %v3722_v16 = vadd.s32 %v508_v49, %v504_v50  ;;  %v514_v41 = vadd.s32 %v513_v17, %v503_v23 }
 0x15f   : > { %v856_v2 = vsel %vm735_vm4, %v855_v6, %v854_v45  ;;  %v690_v5 = vshrl.u32 %v672_v4, %v688_v47  ;;  %v693_v33 = vadd.s32 127, %v692_v55  ;;  %v462_v25 = vsel %vm456_vm10, %v459_v19, %v461_v46 }
 0x160   : > { %v859_v24 = vsel %vm3691_vm3, %v3451_v62, %v856_v2  ;;  %v515_v0 = vadd.s32 %v514_v41, %v505_v20  ;;  %vm518_vm13 = vc.u32 %v3718_v28, %v3722_v16  ;;  %v877_v29 = vadd.s32 3, %v860_v12 }
 0x161   : > { %v861_v61 = vmul.f32 %v859_v24, %v859_v24  ;;  %v691_v56 = vor.u32 %v690_v5, %v689_v51  ;;  %v694_v30 = vshll.u32 %v693_v33, 23  ;;  %v516_v42 = vmul.u32 %v3662_v7, %v462_v25 }
 0x162   : > { %v519_v45 = vadd.s32 1, %v515_v0  ;;  %v878_v8 = vand.u32 3, %v877_v29  ;;  %v5376_v10 = vand.u32 2147483647, %v3442_v52  ;;  %vm580_vm9 = vcmp.lt.s32.totalorder %v3442_v52, 0 }
 0x163   : > { %v862_v57 = vmul.f32 -0.001358992, %v861_v61  ;;  %v869_v27 = vmul.f32 -0.00019511016, %v861_v61  ;;  %v695_v58 = vor.u32 4788187, %v694_v30  ;;  %v698_v26 = vcvt.s32.f32 %v691_v56 }
 0x164   : > { %v520_v32 = vsel %vm518_vm13, %v519_v45, %v515_v0  ;;  %vm3731_vm8 = vcmp.le.f32.partialorder %v5376_v10, 0.7853982  ;;  %v702_v4 = vsub.s32 4, %v3678_v54  ;;  %vm879_vm10 = vcmp.lt.s32.totalorder %v878_v8, 2 }
 0x165   : > { %v863_v43 = vadd.f32 0.041655596, %v862_v57  ;;  %v870_v34 = vadd.f32 0.008332121, %v869_v27  ;;  %v696_v60 = vand.u32 2147483647, %v695_v58  ;;  %v521_v6 = vadd.s32 %v520_v32, %v516_v42 }
 0x166   : > { %vm880_vm12 = vcmp.eq.s32.totalorder %v878_v8, 0  ;;  %vm883_vm14 = vcmp.eq.s32.totalorder %v878_v8, 2  ;;  %v703_v17 = vsel %vm580_vm9, %v702_v4, %v3678_v54  ;;  %vm876_vm11 = vweird.f32 %v3451_v62 }
 0x167   : > { %v864_v15 = vmul.f32 %v863_v43, %v861_v61  ;;  %v871_v21 = vmul.f32 %v870_v34, %v861_v61  ;;  %v699_v63 = vmul.f32 %v698_v26, %v696_v60  ;;  %v522_v7 = vadd.s32 536870912, %v521_v6 }
 0x168   : > { %v705_v12 = vsel %vm3731_vm8, 0, %v703_v17  ;;  %v517_v42 = vadd.s32 %v3722_v16, %v3718_v28  ;;  %vm721_vm6 = vweird.f32 %v3442_v52  ;;  %vm425_vm5 = vcmp.lt.s32.totalorder %v3438_v44, 0 }
 0x169   : > { %v865_v31 = vadd.f32 -0.4999988, %v864_v15  ;;  %v872_v3 = vadd.f32 -0.16666654, %v871_v21  ;;  %v700_v13 = vxor.u32 2147483648, %v699_v63  ;;  %v3742_v18 = vshrl.u32 %v522_v7, 30 }
 0x16a   : > { %v722_v58 = vadd.s32 3, %v705_v12 }
 0x16b   : > { %v866_v50 = vmul.f32 %v865_v31, %v861_v61  ;;  %v873_v49 = vmul.f32 %v872_v3, %v861_v61  ;;  %v701_v2 = vsel %vm580_vm9, %v700_v13, %v699_v63  ;;  %v524_v19 = vshll.u32 %v3742_v18, 30 }
 0x16c   : > { %v704_v47 = vsel %vm3731_vm8, %v3442_v52, %v701_v2  ;;  %v723_v29 = vand.u32 3, %v722_v58  ;;  %v547_v52 = vsub.s32 4, %v3742_v18 }
 0x16d   : > { %v867_v59 = vadd.f32 1.0, %v866_v50  ;;  %v874_v48 = vadd.f32 1.0, %v873_v49  ;;  %v706_v53 = vmul.f32 %v704_v47, %v704_v47  ;;  %v525_v56 = vsub.s32 %v521_v6, %v524_v19 }
 0x16e   : > { %vm725_vm2 = vcmp.eq.s32.totalorder %v723_v29, 0  ;;  %vm728_vm3 = vcmp.eq.s32.totalorder %v723_v29, 2  ;;  %vm724_vm4 = vcmp.lt.s32.totalorder %v723_v29, 2  ;;  %v548_v17 = vsel %vm425_vm5, %v547_v52, %v3742_v18 }
 0x16f   : > { %v875_v55 = vmul.f32 %v874_v48, %v859_v24  ;;  %v884_v51 = vxor.u32 2147483648, %v867_v59  ;;  %v707_v5 = vmul.f32 -0.001358992, %v706_v53  ;;  %v714_v33 = vmul.f32 -0.00019511016, %v706_v53 }
 0x170   : > { %vm526_vm15 = vcmp.lt.s32.totalorder %v525_v56, 0  ;;  %v527_v43 = vsub.s32 0, %v525_v56 }
 0x171   : > { %v881_v61 = vxor.u32 2147483648, %v875_v55  ;;  %v885_v23 = vsel %vm883_vm14, %v884_v51, %v875_v55  ;;  %v708_v57 = vadd.f32 0.041655596, %v707_v5  ;;  %v715_v24 = vadd.f32 0.008332121, %v714_v33 }
 0x172   : > { %v528_v25 = vsel %vm526_vm15, %v527_v43, %v525_v56  ;;  %v5379_v55 = vand.u32 2147483647, %v3438_v44 }
 0x173   : > { %v882_v46 = vsel %vm880_vm12, %v867_v59, %v881_v61  ;;  %v709_v20 = vmul.f32 %v708_v57, %v706_v53  ;;  %v716_v41 = vmul.f32 %v715_v24, %v706_v53  ;;  %v529_v21 = vclz %v528_v25 }
 0x174   : > { %v886_v27 = vsel %vm879_vm10, %v882_v46, %v885_v23  ;;  %vm424_vm7 = vcmp.le.f32.partialorder %v5379_v55, 0.7853982  ;;  %vm566_vm10 = vweird.f32 %v3438_v44  ;;  %vm895_vm12 = vcmask 203776  }
 0x175   : > { %v887_v30 = vsel %vm876_vm11, nan, %v886_v27  ;;  %v710_v54 = vadd.f32 -0.4999988, %v709_v20  ;;  %v717_v34 = vadd.f32 -0.16666654, %v716_v41  ;;  %v3051_v26 = vadd.s32 4294967294, %v529_v21 }
 0x176   : > { %925 = vmatpush.msra.mxu1 %v887_v30  ;;  %v550_v23 = vsel %vm424_vm7, 0, %v548_v17  ;;  %v891_v21 = vld [vmem:[%s5354_s3] sm:$0xff] }
 0x177   : > { %v711_v0 = vmul.f32 %v710_v54, %v706_v53  ;;  %v718_v15 = vmul.f32 %v717_v34, %v706_v53  ;;  %vm3052_vm0 = vcmp.lt.s32.totalorder %v3051_v26, 0  ;;  %v567_v30 = vadd.s32 3, %v550_v23 }
 0x178   : > { %v532_v3 = vsel %vm3052_vm0, 0, %v3051_v26  ;;  %v894_v26 = vld [vmem:[%s5354_s3 + $0x18] sm:$0x1] }
 0x179   : > { %v712_v60 = vadd.f32 1.0, %v711_v0  ;;  %v719_v62 = vadd.f32 1.0, %v718_v15  ;;  %v533_v32 = vsub.s32 32, %v532_v3  ;;  %v537_v50 = vsub.s32 4294967266, %v532_v3 }
 0x17a   : > { %v534_v10 = vshll.u32 %v525_v56, %v532_v3  ;;  %v568_v54 = vand.u32 3, %v567_v30 }
 0x17b   : > { %v720_v45 = vmul.f32 %v719_v62, %v704_v47  ;;  %v729_v31 = vxor.u32 2147483648, %v712_v60  ;;  %v535_v6 = vshrl.u32 %v517_v42, %v533_v32  ;;  %v538_v1 = vadd.s32 127, %v537_v50  ;;  %v892_v62 = vld [vmem:[%s5354_s3 + $0x8] sm:$0xff] }
 0x17c   : > { %vm570_vm13 = vcmp.eq.s32.totalorder %v568_v54, 0  ;;  %vm573_vm8 = vcmp.eq.s32.totalorder %v568_v54, 2  ;;  %vm569_vm9 = vcmp.lt.s32.totalorder %v568_v54, 2 }
 0x17d   : > { %v726_v63 = vxor.u32 2147483648, %v720_v45  ;;  %v730_v13 = vsel %vm728_vm3, %v729_v31, %v720_v45  ;;  %v536_v48 = vor.u32 %v535_v6, %v534_v10  ;;  %v539_v2 = vshll.u32 %v538_v1, 23 }
 0x17f   : > { %v727_v49 = vsel %vm725_vm2, %v712_v60, %v726_v63  ;;  %v540_v7 = vor.u32 4788187, %v539_v2  ;;  %v543_v28 = vcvt.s32.f32 %v536_v48 }
 0x180   : > { %v731_v8 = vsel %vm724_vm4, %v727_v49, %v730_v13 }
 0x181   : > { %v732_v59 = vsel %vm721_vm6, nan, %v731_v8  ;;  %v541_v4 = vand.u32 2147483647, %v540_v7  ;;  %v5380_v7 = vmov 2475754826  }
 0x182   : > { %926 = vmatpush.msra.mxu1 %v732_v59 }
 0x183   : > { %v544_v16 = vmul.f32 %v543_v28, %v541_v4 }
 0x185   : > { %v545_v47 = vxor.u32 2147483648, %v544_v16 }
 0x187   : > { %v546_v51 = vsel %vm425_vm5, %v545_v47, %v544_v16 }
 0x188   : > { %v549_v53 = vsel %vm424_vm7, %v3438_v44, %v546_v51  ;;  %v893_v44 = vld [vmem:[%s5354_s3 + $0x10] sm:$0xff] }
 0x189   : > { %v551_v61 = vmul.f32 %v549_v53, %v549_v53 }
 0x18b   : > { %v552_v5 = vmul.f32 -0.001358992, %v551_v61  ;;  %v559_v33 = vmul.f32 -0.00019511016, %v551_v61 }
 0x18d   : > { %v553_v19 = vadd.f32 0.041655596, %v552_v5  ;;  %v560_v46 = vadd.f32 0.008332121, %v559_v33  ;;  %v5382_v33 = vmov 1326507024  }
 0x18f   : > { %v554_v57 = vmul.f32 %v553_v19, %v551_v61  ;;  %v561_v24 = vmul.f32 %v560_v46, %v551_v61 }
 0x191   : > { %v555_v27 = vadd.f32 -0.4999988, %v554_v57  ;;  %v562_v56 = vadd.f32 -0.16666654, %v561_v24 }
 0x193   : > { %v556_v12 = vmul.f32 %v555_v27, %v551_v61  ;;  %v563_v20 = vmul.f32 %v562_v56, %v551_v61 }
 0x195   : > { %v557_v41 = vadd.f32 1.0, %v556_v12  ;;  %v564_v43 = vadd.f32 1.0, %v563_v20 }
 0x197   : > { %v565_v34 = vmul.f32 %v564_v43, %v549_v53  ;;  %v574_v58 = vxor.u32 2147483648, %v557_v41  ;;  %v5381_v53 = vmov 920167782  }
 0x199   : > { %v571_v25 = vxor.u32 2147483648, %v565_v34  ;;  %v575_v0 = vsel %vm573_vm8, %v574_v58, %v565_v34 }
 0x19b   : > { %v572_v18 = vsel %vm570_vm13, %v557_v41, %v571_v25 }
 0x19c   : > { %v576_v15 = vsel %vm569_vm9, %v572_v18, %v575_v0 }
 0x19d   : > { %v577_v60 = vsel %vm566_vm10, nan, %v576_v15 }
 0x19e   : > { %927 = vmatpush.msra.mxu1 %v577_v60 }
 0x19f   : > { %3060 = vmatmul.msk.f32.vlgmr.msra.gmra.mxu1 %vm895_vm12, %v891_v21 }
 0x1a7   : > { %3061 = vmatmul.msk.f32.gmra.mxu1 %vm895_vm12, %v892_v62 }
 0x1af   : > { %3062 = vmatmul.msk.f32.gmra.mxu1 %vm895_vm12, %v893_v44 }
 0x1b7   : > { %3063 = vmatmul.msk.f32.gmra.mxu1 %vm895_vm12, %v894_v26 }
 0x21c   : > { %v3777_v29 = vpop.f32.mrf.mxu1 }
 0x21d   : > { %v941_v45 = vand.u32 2147483647, %v3777_v29  ;;  %v944_v31 = vand.u32 2139095040, %v3777_v29 }
 0x21f   : > { %v945_v3 = vshrl.u32 %v944_v31, 23  ;;  %v948_v42 = vand.u32 8388607, %v941_v45 }
 0x221   : > { %v3064_v63 = vadd.s32 4294967169, %v945_v3  ;;  %v949_v49 = vor.u32 8388608, %v948_v42 }
 0x223   : > { %v951_v32 = vadd.s32 1, %v3064_v63  ;;  %v3786_v1 = vshll.u32 %v949_v49, 8 }
 0x224   : > { %v3783_v50 = vpop.f32.mrf.mxu1 }
 0x225   : > { %vm952_vm14 = vcmp.gt.s32.totalorder %v951_v32, 0  ;;  %v1099_v6 = vand.u32 2139095040, %v3783_v50  ;;  %v1096_v28 = vand.u32 2147483647, %v3783_v50  ;;  %v990_v12 = vand.u32 65535, %v3786_v1 }
 0x226   : > { %v953_v13 = vsel %vm952_vm14, %v951_v32, 0  ;;  %v991_v0 = vshrl.u32 %v3786_v1, 16 }
 0x227   : > { %v955_v8 = vand.u32 31, %v953_v13  ;;  %v1100_v59 = vshrl.u32 %v1099_v6, 23  ;;  %v3788_v48 = vshrl.u32 %v953_v13, 5  ;;  %v3827_v58 = vand.u32 8388607, %v1096_v28 }
 0x229   : > { %v956_v10 = vsub.s32 32, %v955_v8  ;;  %v958_v2 = vshll.u32 %v3241_v22, %v955_v8  ;;  %v961_v4 = vshll.u32 %v5380_v7, %v955_v8  ;;  %v964_v55 = vshll.u32 %v5370_v11, %v955_v8 }
 0x22a   : > { %v967_v52 = vshll.u32 %v3239_v14, %v955_v8  ;;  %v970_v5 = vshll.u32 %v5381_v53, %v955_v8  ;;  %v3067_v57 = vadd.s32 4294967169, %v1100_v59  ;;  %vm973_vm11 = vcmp.lt.s32.totalorder %v3788_v48, 1 }
 0x22b   : > { %v959_v16 = vshrl.u32 %v5380_v7, %v956_v10  ;;  %v962_v47 = vshrl.u32 %v5370_v11, %v956_v10  ;;  %v965_v51 = vshrl.u32 %v3239_v14, %v956_v10  ;;  %v968_v61 = vshrl.u32 %v5381_v53, %v956_v10 }
 0x22c   : > { %v971_v17 = vshrl.u32 %v5382_v33, %v956_v10  ;;  %vm976_vm15 = vcmp.lt.s32.totalorder %v3788_v48, 4  ;;  %vm975_vm0 = vcmp.lt.s32.totalorder %v3788_v48, 3  ;;  %v1106_v43 = vadd.s32 1, %v3067_v57 }
 0x22d   : > { %v3801_v19 = vor.u32 %v959_v16, %v958_v2  ;;  %v3803_v46 = vor.u32 %v962_v47, %v961_v4  ;;  %v966_v23 = vor.u32 %v965_v51, %v964_v55  ;;  %v969_v24 = vor.u32 %v968_v61, %v967_v52 }
 0x22e   : > { %v972_v27 = vor.u32 %v971_v17, %v970_v5  ;;  %vm974_vm2 = vcmp.lt.s32.totalorder %v3788_v48, 2  ;;  %vm1107_vm3 = vcmp.gt.s32.totalorder %v1106_v43, 0  ;;  %v957_v44 = vshrl.u32 %v3241_v22, %v956_v10 }
 0x22f   : > { %v981_v56 = vsel %vm973_vm11, %v3801_v19, %v3803_v46  ;;  %v985_v30 = vsel %vm973_vm11, %v3803_v46, %v966_v23  ;;  %v982_v20 = vsel %vm976_vm15, %v969_v24, 920167782  ;;  %v978_v26 = vsel %vm976_vm15, %v966_v23, 2102212464 }
 0x230   : > { %v986_v41 = vsel %vm976_vm15, %v972_v27, 1326507024  ;;  %v983_v54 = vsel %vm975_vm0, %v966_v23, %v982_v20  ;;  %v1104_v63 = vor.u32 8388608, %v3827_v58  ;;  %v1108_v13 = vsel %vm1107_vm3, %v1106_v43, 0 }
 0x231   : > { %v987_v34 = vsel %vm975_vm0, %v969_v24, %v986_v41  ;;  %v984_v25 = vsel %vm974_vm2, %v981_v56, %v983_v54  ;;  %v1110_v52 = vand.u32 31, %v1108_v13  ;;  %v3844_v41 = vshrl.u32 %v1108_v13, 5 }
 0x232   : > { %v988_v18 = vsel %vm974_vm2, %v985_v30, %v987_v34  ;;  %v1014_v60 = vand.u32 65535, %v984_v25  ;;  %v1015_v62 = vshrl.u32 %v984_v25, 16 }
 0x233   : > { %v992_v15 = vand.u32 65535, %v988_v18  ;;  %v993_v21 = vshrl.u32 %v988_v18, 16  ;;  %v3840_v24 = vsub.s32 32, %v1110_v52  ;;  %v1113_v43 = vshll.u32 %v3241_v22, %v1110_v52 }
 0x234   : > { %v1017_v32 = vmul.u32 %v1015_v62, %v990_v12  ;;  %v1018_v49 = vmul.u32 %v1014_v60, %v991_v0  ;;  %v1016_v59 = vmul.u32 %v1014_v60, %v990_v12  ;;  %v1019_v2 = vmul.u32 %v1015_v62, %v991_v0 }
 0x235   : > { %v995_v31 = vmul.u32 %v993_v21, %v990_v12  ;;  %v996_v3 = vmul.u32 %v992_v15, %v991_v0  ;;  %v994_v42 = vmul.u32 %v992_v15, %v990_v12  ;;  %v997_v6 = vmul.u32 %v993_v21, %v991_v0 }
 0x236   : > { %v1020_v55 = vshll.u32 %v1017_v32, 16  ;;  %v1021_v51 = vshrl.u32 %v1017_v32, 16  ;;  %v1022_v5 = vshll.u32 %v1018_v49, 16  ;;  %v1023_v56 = vshrl.u32 %v1018_v49, 16 }
 0x237   : > { %v998_v8 = vshll.u32 %v995_v31, 16  ;;  %v999_v4 = vshrl.u32 %v995_v31, 16  ;;  %v1000_v16 = vshll.u32 %v996_v3, 16  ;;  %v1001_v47 = vshrl.u32 %v996_v3, 16 }
 0x238   : > { %vm1024_vm6 = vc.u32 %v1016_v59, %v1020_v55  ;;  %v1026_v17 = vadd.s32 %v1020_v55, %v1016_v59  ;;  %v1114_v34 = vshrl.u32 %v5380_v7, %v3840_v24  ;;  %v1116_v58 = vshll.u32 %v5380_v7, %v1110_v52 }
 0x239   : > { %vm1002_vm4 = vc.u32 %v994_v42, %v998_v8  ;;  %v1004_v10 = vadd.s32 %v998_v8, %v994_v42  ;;  %v1025_v57 = vsel %vm1024_vm6, 1, %v3236_v9  ;;  %v1117_v25 = vshrl.u32 %v5370_v11, %v3840_v24 }
 0x23a   : > { %v1003_v61 = vsel %vm1002_vm4, 1, %v3236_v9  ;;  %v1027_v30 = vadd.s32 %v1025_v57, %v1019_v2  ;;  %vm1028_vm7 = vc.u32 %v1026_v17, %v1022_v5  ;;  %v1119_v0 = vshll.u32 %v5370_v11, %v1110_v52 }
 0x23b   : > { %v1005_v23 = vadd.s32 %v1003_v61, %v997_v6  ;;  %vm1006_vm5 = vc.u32 %v1004_v10, %v1000_v16  ;;  %v1029_v20 = vsel %vm1028_vm7, 1, %v3236_v9  ;;  %v1120_v15 = vshrl.u32 %v3239_v14, %v3840_v24 }
 0x23c   : > { %v1007_v27 = vsel %vm1006_vm5, 1, %v3236_v9  ;;  %v1031_v54 = vadd.s32 %v1029_v20, %v1027_v30  ;;  %v1122_v21 = vshll.u32 %v3239_v14, %v1110_v52  ;;  %v3856_v62 = vor.u32 %v1114_v34, %v1113_v43  ;;  %v3914_v43 = vpop.f32.mrf.mxu1 }
 0x23d   : > { %v1009_v12 = vadd.s32 %v1007_v27, %v1005_v23  ;;  %v3858_v31 = vor.u32 %v1117_v25, %v1116_v58  ;;  %v1123_v3 = vshrl.u32 %v5381_v53, %v3840_v24  ;;  %v3864_v32 = vor.u32 %v1120_v15, %v1119_v0 }
 0x23e   : > { %v1032_v60 = vadd.s32 %v1031_v54, %v1021_v51  ;;  %v1125_v49 = vshll.u32 %v5381_v53, %v1110_v52  ;;  %v1126_v13 = vshrl.u32 %v5382_v33, %v3840_v24  ;;  %v977_v6 = vsel %vm973_vm11, %v957_v44, %v3801_v19 }
 0x23f   : > { %v1010_v18 = vadd.s32 %v1009_v12, %v999_v4  ;;  %v3872_v8 = vadd.s32 %v1026_v17, %v1022_v5  ;;  %v1124_v2 = vor.u32 %v1123_v3, %v1122_v21  ;;  %v979_v4 = vsel %vm975_vm0, %v3803_v46, %v978_v26 }
 0x240   : > { %v1033_v59 = vadd.s32 %v1032_v60, %v1023_v56  ;;  %v1127_v16 = vor.u32 %v1126_v13, %v1125_v49  ;;  %vm1128_vm13 = vcmp.lt.s32.totalorder %v3844_v41, 1  ;;  %vm1131_vm9 = vcmp.lt.s32.totalorder %v3844_v41, 4 }
 0x241   : > { %v3862_v42 = vadd.s32 %v1010_v18, %v1001_v47  ;;  %v3878_v47 = vshll.u32 %v1104_v63, 8  ;;  %v1136_v19 = vsel %vm1128_vm13, %v3856_v62, %v3858_v31  ;;  %vm1130_vm10 = vcmp.lt.s32.totalorder %v3844_v41, 3 }
 0x242   : > { %v1037_v55 = vadd.s32 1, %v1033_v59  ;;  %v1137_v46 = vsel %vm1131_vm9, %v1124_v2, 920167782  ;;  %v1140_v44 = vsel %vm1128_vm13, %v3858_v31, %v3864_v32  ;;  %v1141_v26 = vsel %vm1131_vm9, %v1127_v16, 1326507024 }
 0x243   : > { %vm1036_vm8 = vc.u32 %v3862_v42, %v3872_v8  ;;  %v980_v63 = vsel %vm974_vm2, %v977_v6, %v979_v4  ;;  %vm1129_vm14 = vcmp.lt.s32.totalorder %v3844_v41, 2  ;;  %v1138_v10 = vsel %vm1130_vm10, %v3864_v32, %v1137_v46 }
 0x244   : > { %v1142_v51 = vsel %vm1130_vm10, %v1124_v2, %v1141_v26  ;;  %v1139_v52 = vsel %vm1129_vm14, %v1136_v19, %v1138_v10  ;;  %v1145_v5 = vand.u32 65535, %v3878_v47  ;;  %v1146_v48 = vshrl.u32 %v3878_v47, 16 }
 0x245   : > { %v1143_v61 = vsel %vm1129_vm14, %v1140_v44, %v1142_v51  ;;  %v1038_v17 = vsel %vm1036_vm8, %v1037_v55, %v1033_v59  ;;  %v1170_v27 = vshrl.u32 %v1139_v52, 16  ;;  %v1034_v56 = vmul.u32 %v3786_v1, %v980_v63 }
 0x246   : > { %v1147_v23 = vand.u32 65535, %v1143_v61  ;;  %v1148_v57 = vshrl.u32 %v1143_v61, 16  ;;  %v1169_v30 = vand.u32 65535, %v1139_v52  ;;  %v1254_v21 = vand.u32 2139095040, %v3914_v43 }
 0x247   : > { %v1039_v54 = vadd.s32 %v1038_v17, %v1034_v56  ;;  %v1172_v34 = vmul.u32 %v1170_v27, %v1145_v5  ;;  %v1174_v4 = vmul.u32 %v1170_v27, %v1146_v48  ;;  %v1112_v10 = vshrl.u32 %v3241_v22, %v3840_v24 }
 0x248   : > { %v1150_v12 = vmul.u32 %v1148_v57, %v1145_v5  ;;  %v1151_v20 = vmul.u32 %v1147_v23, %v1146_v48  ;;  %v1149_v58 = vmul.u32 %v1147_v23, %v1145_v5  ;;  %v1152_v18 = vmul.u32 %v1148_v57, %v1146_v48 }
 0x249   : > { %v1173_v0 = vmul.u32 %v1169_v30, %v1146_v48  ;;  %v1175_v15 = vshll.u32 %v1172_v34, 16  ;;  %v1171_v49 = vmul.u32 %v1169_v30, %v1145_v5  ;;  %v1040_v13 = vadd.s32 536870912, %v1039_v54 }
 0x24a   : > { %v1153_v25 = vshll.u32 %v1150_v12, 16  ;;  %v1155_v60 = vshll.u32 %v1151_v20, 16  ;;  %v1154_v59 = vshrl.u32 %v1150_v12, 16  ;;  %v1255_v44 = vshrl.u32 %v1254_v21, 23 }
 0x24b   : > { %vm1179_vm0 = vc.u32 %v1171_v49, %v1175_v15  ;;  %v1177_v16 = vshll.u32 %v1173_v0, 16  ;;  %v1181_v46 = vadd.s32 %v1175_v15, %v1171_v49  ;;  %v3920_v26 = vshrl.u32 %v1040_v13, 30 }
 0x24c   : > { %vm1157_vm11 = vc.u32 %v1149_v58, %v1153_v25  ;;  %v1159_v3 = vadd.s32 %v1153_v25, %v1149_v58  ;;  %v1180_v19 = vsel %vm1179_vm0, 1, %v3236_v9  ;;  %v1133_v51 = vsel %vm1131_vm9, %v3864_v32, 2102212464 }
 0x24d   : > { %v1158_v1 = vsel %vm1157_vm11, 1, %v3236_v9  ;;  %v1182_v63 = vadd.s32 %v1180_v19, %v1174_v4  ;;  %vm1183_vm2 = vc.u32 %v1181_v46, %v1177_v16  ;;  %v1156_v61 = vshrl.u32 %v1151_v20, 16 }
 0x24e   : > { %v1160_v6 = vadd.s32 %v1158_v1, %v1152_v18  ;;  %vm1161_vm15 = vc.u32 %v1159_v3, %v1155_v60  ;;  %v1184_v5 = vsel %vm1183_vm2, 1, %v3236_v9  ;;  %v3070_v48 = vadd.s32 4294967169, %v1255_v44 }
 0x24f   : > { %v1162_v2 = vsel %vm1161_vm15, 1, %v3236_v9  ;;  %v1132_v17 = vsel %vm1128_vm13, %v1112_v10, %v3856_v62  ;;  %v1176_v23 = vshrl.u32 %v1172_v34, 16  ;;  %v1186_v57 = vadd.s32 %v1184_v5, %v1182_v63 }
 0x250   : > { %v1164_v55 = vadd.s32 %v1162_v2, %v1160_v6  ;;  %v1042_v27 = vshll.u32 %v3920_v26, 30  ;;  %v1134_v24 = vsel %vm1130_vm10, %v3858_v31, %v1133_v51  ;;  %v1261_v32 = vadd.s32 1, %v3070_v48  ;;  %v3975_v51 = vpop.f32.mrf.mxu1 }
 0x251   : > { %v1178_v30 = vshrl.u32 %v1173_v0, 16  ;;  %v1187_v12 = vadd.s32 %v1186_v57, %v1176_v23  ;;  %v1251_v20 = vand.u32 2147483647, %v3914_v43  ;;  %v3938_v58 = vadd.s32 %v1181_v46, %v1177_v16 }
 0x252   : > { %v1165_v52 = vadd.s32 %v1164_v55, %v1154_v59  ;;  %vm1262_vm3 = vcmp.gt.s32.totalorder %v1261_v32, 0  ;;  %v1135_v62 = vsel %vm1129_vm14, %v1132_v17, %v1134_v24  ;;  %v3942_v25 = vsub.s32 %v1039_v54, %v1042_v27 }
 0x253   : > { %v1188_v34 = vadd.s32 %v1187_v12, %v1178_v30  ;;  %v1263_v31 = vsel %vm1262_vm3, %v1261_v32, 0  ;;  %v1258_v0 = vand.u32 8388607, %v1251_v20  ;;  %v1189_v15 = vmul.u32 %v3878_v47, %v1135_v62 }
 0x254   : > { %v3935_v56 = vadd.s32 %v1165_v52, %v1156_v61  ;;  %v1265_v21 = vand.u32 31, %v1263_v31  ;;  %vm1044_vm6 = vcmp.lt.s32.totalorder %v3942_v25, 0  ;;  %v1045_v54 = vsub.s32 0, %v3942_v25 }
 0x255   : > { %v1192_v18 = vadd.s32 1, %v1188_v34  ;;  %v1259_v49 = vor.u32 8388608, %v1258_v0  ;;  %v3953_v13 = vshrl.u32 %v1263_v31, 5  ;;  %v1409_v27 = vand.u32 2139095040, %v3975_v51 }
 0x256   : > { %vm1191_vm4 = vc.u32 %v3935_v56, %v3938_v58  ;;  %v3950_v41 = vsub.s32 32, %v1265_v21  ;;  %v1268_v1 = vshll.u32 %v3241_v22, %v1265_v21  ;;  %v1271_v47 = vshll.u32 %v5380_v7, %v1265_v21 }
 0x257   : > { %v1193_v60 = vsel %vm1191_vm4, %v1192_v18, %v1188_v34  ;;  %v1274_v4 = vshll.u32 %v5370_v11, %v1265_v21  ;;  %v1277_v55 = vshll.u32 %v3239_v14, %v1265_v21  ;;  %v1280_v5 = vshll.u32 %v5381_v53, %v1265_v21 }
 0x258   : > { %v1194_v3 = vadd.s32 %v1193_v60, %v1189_v15  ;;  %v1269_v59 = vshrl.u32 %v5380_v7, %v3950_v41  ;;  %v1272_v2 = vshrl.u32 %v5370_v11, %v3950_v41  ;;  %v1275_v16 = vshrl.u32 %v3239_v14, %v3950_v41 }
 0x259   : > { %v1278_v19 = vshrl.u32 %v5381_v53, %v3950_v41  ;;  %v1281_v10 = vshrl.u32 %v5382_v33, %v3950_v41  ;;  %v1046_v48 = vsel %vm1044_vm6, %v1045_v54, %v3942_v25  ;;  %v3982_v23 = vshll.u32 %v1259_v49, 8 }
 0x25a   : > { %v1195_v6 = vadd.s32 536870912, %v1194_v3  ;;  %v3969_v44 = vor.u32 %v1269_v59, %v1268_v1  ;;  %v3971_v63 = vor.u32 %v1272_v2, %v1271_v47  ;;  %v1276_v52 = vor.u32 %v1275_v16, %v1274_v4 }
 0x25b   : > { %v1279_v61 = vor.u32 %v1278_v19, %v1277_v55  ;;  %v1282_v57 = vor.u32 %v1281_v10, %v1280_v5  ;;  %vm1283_vm5 = vcmp.lt.s32.totalorder %v3953_v13, 1  ;;  %vm1286_vm7 = vcmp.lt.s32.totalorder %v3953_v13, 4 }
 0x25c   : > { %v3967_v46 = vshrl.u32 %v1195_v6, 30  ;;  %vm1285_vm13 = vcmp.lt.s32.totalorder %v3953_v13, 3  ;;  %v1291_v32 = vsel %vm1283_vm5, %v3969_v44, %v3971_v63  ;;  %v1047_v62 = vclz %v1046_v48 }
 0x25d   : > { %v1292_v30 = vsel %vm1286_vm7, %v1279_v61, 920167782  ;;  %vm1284_vm9 = vcmp.lt.s32.totalorder %v3953_v13, 2  ;;  %v1295_v18 = vsel %vm1283_vm5, %v3971_v63, %v1276_v52  ;;  %v1410_v0 = vshrl.u32 %v1409_v27, 23 }
 0x25e   : > { %v1197_v17 = vshll.u32 %v3967_v46, 30  ;;  %v1293_v12 = vsel %vm1285_vm13, %v1276_v52, %v1292_v30  ;;  %v1296_v15 = vsel %vm1286_vm7, %v1282_v57, 1326507024  ;;  %v1300_v21 = vand.u32 65535, %v3982_v23 }
 0x25f   : > { %v1294_v31 = vsel %vm1284_vm9, %v1291_v32, %v1293_v12  ;;  %v1297_v54 = vsel %vm1285_vm13, %v1279_v61, %v1296_v15  ;;  %v3065_v1 = vadd.s32 4294967294, %v1047_v62  ;;  %v1301_v47 = vshrl.u32 %v3982_v23, 16 }
 0x260   : > { %v3987_v24 = vsub.s32 %v1194_v3, %v1197_v17  ;;  %v1325_v60 = vshrl.u32 %v1294_v31, 16  ;;  %v1324_v49 = vand.u32 65535, %v1294_v31  ;;  %v1298_v6 = vsel %vm1284_vm9, %v1295_v18, %v1297_v54 }
 0x261   : > { %v1302_v2 = vand.u32 65535, %v1298_v6  ;;  %v1303_v4 = vshrl.u32 %v1298_v6, 16  ;;  %v3073_v16 = vadd.s32 4294967169, %v1410_v0  ;;  %v1406_v17 = vand.u32 2147483647, %v3975_v51 }
 0x262   : > { %vm1199_vm8 = vcmp.lt.s32.totalorder %v3987_v24, 0  ;;  %v1200_v34 = vsub.s32 0, %v3987_v24  ;;  %v1327_v59 = vmul.u32 %v1325_v60, %v1300_v21  ;;  %v1328_v10 = vmul.u32 %v1324_v49, %v1301_v47 }
 0x263   : > { %v1305_v19 = vmul.u32 %v1303_v4, %v1300_v21  ;;  %v1306_v48 = vmul.u32 %v1302_v2, %v1301_v47  ;;  %vm3066_vm10 = vcmp.lt.s32.totalorder %v3065_v1, 0  ;;  %v1288_v61 = vsel %vm1286_vm7, %v1276_v52, 2102212464 }
 0x264   : > { %v1201_v3 = vsel %vm1199_vm8, %v1200_v34, %v3987_v24  ;;  %v1330_v5 = vshll.u32 %v1327_v59, 16  ;;  %v1326_v57 = vmul.u32 %v1324_v49, %v1300_v21  ;;  %v1416_v27 = vadd.s32 1, %v3073_v16 }
 0x265   : > { %v1202_v55 = vclz %v1201_v3  ;;  %v1304_v30 = vmul.u32 %v1302_v2, %v1300_v21  ;;  %v1308_v12 = vshll.u32 %v1305_v19, 16  ;;  %v1329_v62 = vmul.u32 %v1325_v60, %v1301_v47 }
 0x266   : > { %v1307_v34 = vmul.u32 %v1303_v4, %v1301_v47  ;;  %v1310_v31 = vshll.u32 %v1306_v48, 16  ;;  %v1332_v18 = vshll.u32 %v1328_v10, 16  ;;  %vm1334_vm14 = vc.u32 %v1326_v57, %v1330_v5 }
 0x267   : > { %v3068_v32 = vadd.s32 4294967294, %v1202_v55  ;;  %vm1312_vm11 = vc.u32 %v1304_v30, %v1308_v12  ;;  %v1314_v0 = vadd.s32 %v1308_v12, %v1304_v30  ;;  %v1335_v15 = vsel %vm1334_vm14, 1, %v3236_v9 }
 0x268   : > { %v1336_v3 = vadd.s32 %v1330_v5, %v1326_v57  ;;  %v4020_v54 = vsel %vm3066_vm10, 0, %v3065_v1  ;;  %v1267_v52 = vshrl.u32 %v3241_v22, %v3950_v41  ;;  %v1313_v49 = vsel %vm1312_vm11, 1, %v3236_v9 }
 0x269   : > { %v1413_v21 = vand.u32 8388607, %v1406_v17  ;;  %v1315_v60 = vadd.s32 %v1313_v49, %v1307_v34  ;;  %vm1316_vm15 = vc.u32 %v1314_v0, %v1310_v31  ;;  %v1337_v6 = vadd.s32 %v1335_v15, %v1329_v62 }
 0x26a   : > { %vm1338_vm0 = vc.u32 %v1336_v3, %v1332_v18  ;;  %vm3069_vm2 = vcmp.lt.s32.totalorder %v3068_v32, 0  ;;  %v1287_v47 = vsel %vm1283_vm5, %v1267_v52, %v3969_v44  ;;  %v1289_v1 = vsel %vm1285_vm13, %v3971_v63, %v1288_v61 }
 0x26b   : > { %v1317_v41 = vsel %vm1316_vm15, 1, %v3236_v9  ;;  %v1309_v2 = vshrl.u32 %v1305_v19, 16  ;;  %v1339_v16 = vsel %vm1338_vm0, 1, %v3236_v9  ;;  %vm1417_vm3 = vcmp.gt.s32.totalorder %v1416_v27, 0 }
 0x26c   : > { %v1319_v4 = vadd.s32 %v1317_v41, %v1315_v60  ;;  %v1055_v55 = vsub.s32 4294967266, %v4020_v54  ;;  %v1331_v5 = vshrl.u32 %v1327_v59, 16  ;;  %v1341_v57 = vadd.s32 %v1339_v16, %v1337_v6 }
 0x26d   : > { %v1418_v30 = vsel %vm1417_vm3, %v1416_v27, 0  ;;  %v1290_v12 = vsel %vm1284_vm9, %v1287_v47, %v1289_v1  ;;  %v1311_v44 = vshrl.u32 %v1306_v48, 16  ;;  %v4039_v63 = vsel %vm3069_vm2, 0, %v3068_v32 }
 0x26e   : > { %v1320_v62 = vadd.s32 %v1319_v4, %v1309_v2  ;;  %v1420_v34 = vand.u32 31, %v1418_v30  ;;  %v1333_v61 = vshrl.u32 %v1328_v10, 16  ;;  %v1342_v19 = vadd.s32 %v1341_v57, %v1331_v5 }
 0x26f   : > { %v4043_v0 = vadd.s32 %v1336_v3, %v1332_v18  ;;  %v1056_v59 = vadd.s32 127, %v1055_v55  ;;  %v1344_v27 = vmul.u32 %v3982_v23, %v1290_v12  ;;  %v1414_v13 = vor.u32 8388608, %v1413_v21 }
 0x270   : > { %v4041_v31 = vadd.s32 %v1320_v62, %v1311_v44  ;;  %v4045_v15 = vsub.s32 32, %v1420_v34  ;;  %v1343_v52 = vadd.s32 %v1342_v19, %v1333_v61  ;;  %v1210_v48 = vsub.s32 4294967266, %v4039_v63 }
 0x271   : > { %v1423_v32 = vshll.u32 %v3241_v22, %v1420_v34  ;;  %v1426_v18 = vshll.u32 %v5380_v7, %v1420_v34  ;;  %v4059_v21 = vshrl.u32 %v1418_v30, 5  ;;  %v1429_v60 = vshll.u32 %v5370_v11, %v1420_v34 }
 0x272   : > { %vm1346_vm4 = vc.u32 %v4041_v31, %v4043_v0  ;;  %v1424_v10 = vshrl.u32 %v5380_v7, %v4045_v15  ;;  %v1347_v49 = vadd.s32 1, %v1343_v52  ;;  %v1427_v3 = vshrl.u32 %v5370_v11, %v4045_v15 }
 0x273   : > { %v1430_v23 = vshrl.u32 %v3239_v14, %v4045_v15  ;;  %v1432_v6 = vshll.u32 %v3239_v14, %v1420_v34  ;;  %v1433_v47 = vshrl.u32 %v5381_v53, %v4045_v15  ;;  %v1435_v4 = vshll.u32 %v5381_v53, %v1420_v34 }
 0x274   : > { %v1348_v1 = vsel %vm1346_vm4, %v1347_v49, %v1343_v52  ;;  %v4065_v41 = vor.u32 %v1424_v10, %v1423_v32  ;;  %v4067_v2 = vor.u32 %v1427_v3, %v1426_v18  ;;  %v1436_v57 = vshrl.u32 %v5382_v33, %v4045_v15 }
 0x275   : > { %v1349_v16 = vadd.s32 %v1348_v1, %v1344_v27  ;;  %v1431_v55 = vor.u32 %v1430_v23, %v1429_v60  ;;  %v1434_v5 = vor.u32 %v1433_v47, %v1432_v6  ;;  %v1035_v30 = vadd.s32 %v3872_v8, %v3862_v42 }
 0x276   : > { %v1051_v12 = vsub.s32 32, %v4020_v54  ;;  %v1057_v44 = vshll.u32 %v1056_v59, 23  ;;  %v1211_v62 = vadd.s32 127, %v1210_v48  ;;  %v1437_v19 = vor.u32 %v1436_v57, %v1435_v4 }
 0x277   : > { %v1350_v61 = vadd.s32 536870912, %v1349_v16  ;;  %vm1438_vm6 = vcmp.lt.s32.totalorder %v4059_v21, 1  ;;  %vm1441_vm5 = vcmp.lt.s32.totalorder %v4059_v21, 4  ;;  %vm1440_vm7 = vcmp.lt.s32.totalorder %v4059_v21, 3 }
 0x278   : > { %v1446_v34 = vsel %vm1438_vm6, %v4065_v41, %v4067_v2  ;;  %v1447_v42 = vsel %vm1441_vm5, %v1434_v5, 920167782  ;;  %v4084_v8 = vshll.u32 %v1414_v13, 8  ;;  %vm1439_vm13 = vcmp.lt.s32.totalorder %v4059_v21, 2 }
 0x279   : > { %v4086_v59 = vshrl.u32 %v1350_v61, 30  ;;  %v1448_v52 = vsel %vm1440_vm7, %v1431_v55, %v1447_v42  ;;  %v1450_v27 = vsel %vm1438_vm6, %v4067_v2, %v1431_v55  ;;  %v1052_v48 = vshll.u32 %v3942_v25, %v4020_v54 }
 0x27a   : > { %v1053_v32 = vshrl.u32 %v1035_v30, %v1051_v12  ;;  %v1449_v10 = vsel %vm1439_vm13, %v1446_v34, %v1448_v52  ;;  %v1451_v13 = vsel %vm1441_vm5, %v1437_v19, 1326507024  ;;  %v4100_v49 = vor.u32 4788187, %v1057_v44 }
 0x27b   : > { %v1206_v18 = vsub.s32 32, %v4039_v63  ;;  %v1352_v3 = vshll.u32 %v4086_v59, 30  ;;  %v1452_v23 = vsel %vm1440_vm7, %v1434_v5, %v1451_v13  ;;  %v1212_v60 = vshll.u32 %v1211_v62, 23 }
 0x27c   : > { %v1453_v25 = vsel %vm1439_vm13, %v1450_v27, %v1452_v23  ;;  %v1455_v54 = vand.u32 65535, %v4084_v8  ;;  %v1480_v6 = vshrl.u32 %v1449_v10, 16  ;;  %v1479_v57 = vand.u32 65535, %v1449_v10 }
 0x27d   : > { %v1353_v47 = vsub.s32 %v1349_v16, %v1352_v3  ;;  %v1457_v1 = vand.u32 65535, %v1453_v25  ;;  %v1458_v4 = vshrl.u32 %v1453_v25, 16  ;;  %v4109_v30 = vor.u32 %v1053_v32, %v1052_v48 }
 0x27e   : > { %v1190_v12 = vadd.s32 %v3938_v58, %v3935_v56  ;;  %v1456_v44 = vshrl.u32 %v4084_v8, 16  ;;  %v1482_v61 = vmul.u32 %v1480_v6, %v1455_v54  ;;  %v1059_v5 = vand.u32 2147483647, %v4100_v49 }
 0x27f   : > { %v1207_v62 = vshll.u32 %v3987_v24, %v4039_v63  ;;  %vm1354_vm8 = vcmp.lt.s32.totalorder %v1353_v47, 0  ;;  %v1355_v19 = vsub.s32 0, %v1353_v47  ;;  %v4117_v16 = vor.u32 4788187, %v1212_v60 }
 0x280   : > { %v1208_v34 = vshrl.u32 %v1190_v12, %v1206_v18  ;;  %v1460_v42 = vmul.u32 %v1458_v4, %v1455_v54  ;;  %v1461_v52 = vmul.u32 %v1457_v1, %v1456_v44  ;;  %v1345_v27 = vadd.s32 %v4043_v0, %v4041_v31 }
 0x281   : > { %v1356_v48 = vsel %vm1354_vm8, %v1355_v19, %v1353_v47  ;;  %v1483_v56 = vmul.u32 %v1479_v57, %v1456_v44  ;;  %v1485_v58 = vshll.u32 %v1482_v61, 16  ;;  %v1422_v10 = vshrl.u32 %v3241_v22, %v4045_v15 }
 0x282   : > { %v1357_v32 = vclz %v1356_v48  ;;  %v1459_v13 = vmul.u32 %v1457_v1, %v1455_v54  ;;  %v1463_v49 = vshll.u32 %v1460_v42, 16  ;;  %v1443_v24 = vsel %vm1441_vm5, %v1431_v55, 2102212464 }
 0x283   : > { %v1462_v63 = vmul.u32 %v1458_v4, %v1456_v44  ;;  %v1481_v18 = vmul.u32 %v1479_v57, %v1455_v54  ;;  %v1484_v3 = vmul.u32 %v1480_v6, %v1456_v44  ;;  %v1465_v60 = vshll.u32 %v1461_v52, 16 }
 0x284   : > { %v3071_v23 = vadd.s32 4294967294, %v1357_v32  ;;  %vm1467_vm9 = vc.u32 %v1459_v13, %v1463_v49  ;;  %v1469_v25 = vadd.s32 %v1463_v49, %v1459_v13  ;;  %v1487_v0 = vshll.u32 %v1483_v56, 16 }
 0x285   : > { %v1468_v31 = vsel %vm1467_vm9, 1, %v3236_v9  ;;  %vm1489_vm10 = vc.u32 %v1481_v18, %v1485_v58  ;;  %v1491_v12 = vadd.s32 %v1485_v58, %v1481_v18  ;;  %v1464_v57 = vshrl.u32 %v1460_v42, 16 }
 0x286   : > { %vm3072_vm14 = vcmp.lt.s32.totalorder %v3071_v23, 0  ;;  %v1470_v19 = vadd.s32 %v1468_v31, %v1462_v63  ;;  %vm1471_vm11 = vc.u32 %v1469_v25, %v1465_v60  ;;  %v1490_v15 = vsel %vm1489_vm10, 1, %v3236_v9 }
 0x287   : > { %v1360_v1 = vsel %vm3072_vm14, 0, %v3071_v23  ;;  %v1472_v55 = vsel %vm1471_vm11, 1, %v3236_v9  ;;  %v1492_v4 = vadd.s32 %v1490_v15, %v1484_v3  ;;  %vm1493_vm15 = vc.u32 %v1491_v12, %v1487_v0 }
 0x288   : > { %v1361_v54 = vsub.s32 32, %v1360_v1  ;;  %v1365_v6 = vsub.s32 4294967266, %v1360_v1  ;;  %v1474_v44 = vadd.s32 %v1472_v55, %v1470_v19  ;;  %v1362_v48 = vshll.u32 %v1353_v47, %v1360_v1 }
 0x289   : > { %v1466_v32 = vshrl.u32 %v1461_v52, 16  ;;  %v1486_v13 = vshrl.u32 %v1482_v61, 16  ;;  %v1494_v49 = vsel %vm1493_vm15, 1, %v3236_v9  ;;  %v1209_v25 = vor.u32 %v1208_v34, %v1207_v62 }
 0x28a   : > { %v1363_v58 = vshrl.u32 %v1345_v27, %v1361_v54  ;;  %v1366_v18 = vadd.s32 127, %v1365_v6  ;;  %v1475_v63 = vadd.s32 %v1474_v44, %v1464_v57  ;;  %v1496_v60 = vadd.s32 %v1494_v49, %v1492_v4 }
 0x28b   : > { %v1442_v23 = vsel %vm1438_vm6, %v1422_v10, %v4065_v41  ;;  %v1444_v3 = vsel %vm1440_vm7, %v4067_v2, %v1443_v24  ;;  %v1488_v42 = vshrl.u32 %v1483_v56, 16  ;;  %v1061_v19 = vcvt.s32.f32 %v4109_v30 }
 0x28c   : > { %v1364_v31 = vor.u32 %v1363_v58, %v1362_v48  ;;  %v1367_v47 = vshll.u32 %v1366_v18, 23  ;;  %v1476_v52 = vadd.s32 %v1475_v63, %v1466_v32  ;;  %v1497_v61 = vadd.s32 %v1496_v60, %v1486_v13 }
 0x28d   : > { %v1214_v27 = vand.u32 2147483647, %v4117_v16  ;;  %v1495_v15 = vadd.s32 %v1491_v12, %v1487_v0  ;;  %v1445_v62 = vsel %vm1439_vm13, %v1442_v23, %v1444_v3  ;;  %v1062_v41 = vmul.f32 %v1061_v19, %v1059_v5 }
 0x28e   : > { %v1368_v1 = vor.u32 4788187, %v1367_v47  ;;  %v1498_v34 = vadd.s32 %v1497_v61, %v1488_v42  ;;  %v1216_v10 = vcvt.s32.f32 %v1209_v25  ;;  %v1371_v2 = vcvt.s32.f32 %v1364_v31  ;;  %v4198_v31 = vpop.permute.xlu2 %285 }
 0x28f   : > { %vm1501_vm0 = vc.u32 %v1476_v52, %v1495_v15  ;;  %v1499_v4 = vmul.u32 %v4084_v8, %v1445_v62  ;;  %v1063_v30 = vxor.u32 2147483648, %v1062_v41  ;;  %vm943_vm2 = vcmp.lt.s32.totalorder %v3777_v29, 0 }
 0x290   : > { %v1369_v55 = vand.u32 2147483647, %v1368_v1  ;;  %v1502_v56 = vadd.s32 1, %v1498_v34  ;;  %v1217_v24 = vmul.f32 %v1216_v10, %v1214_v27  ;;  %vm1253_vm3 = vcmp.lt.s32.totalorder %v3914_v43, 0 }
 0x291   : > { %v1064_v21 = vsel %vm943_vm2, %v1063_v30, %v1062_v41  ;;  %vm1098_vm4 = vcmp.lt.s32.totalorder %v3783_v50, 0  ;;  %vm4151_vm6 = vcmp.le.f32.partialorder %v941_v45, 0.7853982  ;;  %vm4165_vm5 = vcmp.le.f32.partialorder %v1251_v20, 0.7853982 }
 0x292   : > { %v1372_v54 = vmul.f32 %v1371_v2, %v1369_v55  ;;  %v1503_v6 = vsel %vm1501_vm0, %v1502_v56, %v1498_v34  ;;  %v1218_v0 = vxor.u32 2147483648, %v1217_v24  ;;  %v4161_v13 = vsel %vm4151_vm6, %v3777_v29, %v1064_v21 }
 0x293   : > { %v1504_v57 = vadd.s32 %v1503_v6, %v1499_v4  ;;  %vm4171_vm7 = vcmp.le.f32.partialorder %v1096_v28, 0.7853982  ;;  %v4187_v20 = vmul.f32 %v4161_v13, %v4161_v13  ;;  %v1500_v34 = vadd.s32 %v1495_v15, %v1476_v52 }
 0x294   : > { %v1373_v16 = vxor.u32 2147483648, %v1372_v54  ;;  %v1219_v48 = vsel %vm1098_vm4, %v1218_v0, %v1217_v24  ;;  %vm1408_vm9 = vcmp.lt.s32.totalorder %v3975_v51, 0  ;;  %vm4229_vm10 = vcmp.le.f32.partialorder %v1406_v17, 0.7853982 }
 0x295   : > { %v1505_v12 = vadd.s32 536870912, %v1504_v57  ;;  %v4183_v63 = vsel %vm4171_vm7, %v3783_v50, %v1219_v48  ;;  %v1077_v42 = vmul.f32 -0.00019511016, %v4187_v20  ;;  %v1070_v52 = vmul.f32 -0.001358992, %v4187_v20 }
 0x296   : > { %v1374_v8 = vsel %vm1253_vm3, %v1373_v16, %v1372_v54  ;;  %v4195_v25 = vmul.f32 %v4183_v63, %v4183_v63  ;;  %v266_v15 = vpop.permute.xlu2 %265  ;;  %v412_v49 = vadd.f32 %v3436_v40, %v4198_v31  ;;  %vm1394_vm14 = vweird.f32 %v3914_v43 }
 0x297   : > { %v4144_v5 = vshrl.u32 %v1505_v12, 30  ;;  %v4178_v58 = vsel %vm4165_vm5, %v3914_v43, %v1374_v8  ;;  %v1078_v27 = vadd.f32 0.008332121, %v1077_v42  ;;  %v1071_v42 = vadd.f32 0.041655596, %v1070_v52 }
 0x298   : > { %v4191_v60 = vmul.f32 %v4178_v58, %v4178_v58  ;;  %v1232_v19 = vmul.f32 -0.00019511016, %v4195_v25  ;;  %v1225_v16 = vmul.f32 -0.001358992, %v4195_v25 }
 0x299   : > { %v1507_v32 = vshll.u32 %v4144_v5, 30  ;;  %v1079_v54 = vmul.f32 %v1078_v27, %v4187_v20  ;;  %v1065_v27 = vsub.s32 4, %v3920_v26 }
 0x29a   : > { %v1387_v47 = vmul.f32 -0.00019511016, %v4191_v60  ;;  %v1233_v55 = vadd.f32 0.008332121, %v1232_v19  ;;  %v1380_v4 = vmul.f32 -0.001358992, %v4191_v60  ;;  %v4211_v19 = vadd.f32 %v3428_v36, %v266_v15 }
 0x29b   : > { %v1508_v18 = vsub.s32 %v1504_v57, %v1507_v32  ;;  %v1080_v8 = vadd.f32 -0.16666654, %v1079_v54 }
 0x29c   : > { %v1388_v62 = vadd.f32 0.008332121, %v1387_v47  ;;  %v1234_v0 = vmul.f32 %v1233_v55, %v4195_v25  ;;  %v1381_v21 = vadd.f32 0.041655596, %v1380_v4 }
 0x29d   : > { %vm1509_vm13 = vcmp.lt.s32.totalorder %v1508_v18, 0  ;;  %v1510_v28 = vsub.s32 0, %v1508_v18  ;;  %v1081_v55 = vmul.f32 %v1080_v8, %v4187_v20 }
 0x29e   : > { %v1389_v6 = vmul.f32 %v1388_v62, %v4191_v60  ;;  %v276_v4 = vpop.permute.xlu2 %275 }
 0x29f   : > { %v1511_v23 = vsel %vm1509_vm13, %v1510_v28, %v1508_v18  ;;  %v1226_v28 = vadd.f32 0.041655596, %v1225_v16 }
 0x2a0   : > { %v1512_v3 = vclz %v1511_v23  ;;  %v1390_v48 = vadd.f32 -0.16666654, %v1389_v6  ;;  %v1235_v23 = vadd.f32 -0.16666654, %v1234_v0 }
 0x2a2   : > { %v3074_v61 = vadd.s32 4294967294, %v1512_v3  ;;  %v1375_v3 = vsub.s32 4, %v4086_v59  ;;  %v1391_v62 = vmul.f32 %v1390_v48, %v4191_v60 }
 0x2a4   : > { %vm3075_vm8 = vcmp.lt.s32.totalorder %v3074_v61, 0  ;;  %v1376_v36 = vsel %vm1253_vm3, %v1375_v3, %v4086_v59  ;;  %v1066_v59 = vsel %vm943_vm2, %v1065_v27, %v3920_v26  ;;  %v1392_v0 = vadd.f32 1.0, %v1391_v62  ;;  %v281_v3 = vpop.permute.xlu0 %280 }
 0x2a5   : > { %v1515_v1 = vsel %vm3075_vm8, 0, %v3074_v61  ;;  %v1382_v61 = vmul.f32 %v1381_v21, %v4191_v60  ;;  %v1378_v16 = vsel %vm4165_vm5, 0, %v1376_v36  ;;  %v1082_v26 = vadd.f32 1.0, %v1081_v55 }
 0x2a6   : > { %v1516_v41 = vsub.s32 32, %v1515_v1  ;;  %v1520_v10 = vsub.s32 4294967266, %v1515_v1  ;;  %v1517_v2 = vshll.u32 %v1508_v18, %v1515_v1  ;;  %v1220_v1 = vsub.s32 4, %v3967_v46 }
 0x2a8   : > { %v1518_v56 = vshrl.u32 %v1500_v34, %v1516_v41  ;;  %v1521_v24 = vadd.s32 127, %v1520_v10  ;;  %v1227_v41 = vmul.f32 %v1226_v28, %v4195_v25  ;;  %v271_v10 = vpop.permute.xlu1 %270  ;;  %v1068_v28 = vsel %vm4151_vm6, 0, %v1066_v59 }
 0x2aa   : > { %v1519_v30 = vor.u32 %v1518_v56, %v1517_v2  ;;  %v1522_v57 = vshll.u32 %v1521_v24, 23  ;;  %v1236_v2 = vmul.f32 %v1235_v23, %v4195_v25  ;;  %v1072_v56 = vmul.f32 %v1071_v42, %v4187_v20 }
 0x2ab   : > { %v4225_v24 = vadd.f32 %v3430_v37, %v271_v10  ;;  %v1221_v37 = vsel %vm1098_vm4, %v1220_v1, %v3967_v46  ;;  %v1228_v15 = vadd.f32 -0.4999988, %v1227_v41  ;;  %v1395_v23 = vadd.s32 3, %v1378_v16 }
 0x2ac   : > { %v1523_v12 = vor.u32 4788187, %v1522_v57  ;;  %v1526_v18 = vcvt.s32.f32 %v1519_v30  ;;  %v1383_v30 = vadd.f32 -0.4999988, %v1382_v61  ;;  %v1530_v57 = vsub.s32 4, %v4144_v5 }
 0x2ad   : > { %v1237_v21 = vadd.f32 1.0, %v1236_v2  ;;  %v1073_v8 = vadd.f32 -0.4999988, %v1072_v56  ;;  %v1223_v46 = vsel %vm4171_vm7, 0, %v1221_v37  ;;  %v1393_v42 = vmul.f32 %v1392_v0, %v4178_v58 }
 0x2ae   : > { %v1524_v32 = vand.u32 2147483647, %v1523_v12  ;;  %v4248_v12 = vadd.f32 %v3432_v38, %v276_v4  ;;  %v1531_v38 = vsel %vm1408_vm9, %v1530_v57, %v4144_v5  ;;  %v1229_v61 = vmul.f32 %v1228_v15, %v4195_v25 }
 0x2af   : > { %v1238_v27 = vmul.f32 %v1237_v21, %v4183_v63  ;;  %v1240_v40 = vadd.s32 3, %v1223_v46  ;;  %v1074_v44 = vmul.f32 %v1073_v8, %v4187_v20  ;;  %v1533_v1 = vsel %vm4229_vm10, 0, %v1531_v38 }
 0x2b0   : > { %v1527_v47 = vmul.f32 %v1526_v18, %v1524_v32  ;;  %v1384_v18 = vmul.f32 %v1383_v30, %v4191_v60  ;;  %v1083_v60 = vmul.f32 %v1082_v26, %v4161_v13  ;;  %v4269_v58 = vsub.f32 %v412_v49, %v4225_v24  ;;  %v261_v49 = vpop.permute.xlu1 %260 }
 0x2b1   : > { %v1085_v41 = vadd.s32 3, %v1068_v28  ;;  %v1396_v25 = vand.u32 3, %v1395_v23  ;;  %v1399_v10 = vxor.u32 2147483648, %v1393_v42  ;;  %v1230_v63 = vadd.f32 1.0, %v1229_v61 }
 0x2b2   : > { %v1528_v34 = vxor.u32 2147483648, %v1527_v47  ;;  %v1385_v5 = vadd.f32 1.0, %v1384_v18  ;;  %v1089_v2 = vxor.u32 2147483648, %v1083_v60  ;;  %v1550_v36 = vadd.s32 3, %v1533_v1 }
 0x2b3   : > { %v1241_v20 = vand.u32 3, %v1240_v40  ;;  %v1075_v56 = vadd.f32 1.0, %v1074_v44  ;;  %v1244_v4 = vxor.u32 2147483648, %v1238_v27  ;;  %vm1397_vm11 = vcmp.lt.s32.totalorder %v1396_v25, 2 }
 0x2b4   : > { %v1529_v6 = vsel %vm1408_vm9, %v1528_v34, %v1527_v47  ;;  %v409_v34 = vadd.f32 %v3434_v39, %v281_v3  ;;  %v1402_v30 = vxor.u32 2147483648, %v1385_v5  ;;  %vm1398_vm15 = vcmp.eq.s32.totalorder %v1396_v25, 0 }
 0x2b5   : > { %v1532_v17 = vsel %vm4229_vm10, %v3975_v51, %v1529_v6  ;;  %vm1401_vm0 = vcmp.eq.s32.totalorder %v1396_v25, 2  ;;  %v1086_v39 = vand.u32 3, %v1085_v41  ;;  %v1400_v57 = vsel %vm1398_vm15, %v1385_v5, %v1399_v10  ;;  %v3077_v5 = vld [vmem:[%s5354_s3 + $0x28] sm:$0xff]  ;;  %v3079_v41 = vld [vmem:[%s5354_s3 + $0x38] sm:$0x1] }
 0x2b6   : > { %v1534_v52 = vmul.f32 %v1532_v17, %v1532_v17  ;;  %v1247_v16 = vxor.u32 2147483648, %v1230_v63  ;;  %v1551_v0 = vand.u32 3, %v1550_v36  ;;  %vm1242_vm2 = vcmp.lt.s32.totalorder %v1241_v20, 2 }
 0x2b7   : > { %vm1243_vm3 = vcmp.eq.s32.totalorder %v1241_v20, 0  ;;  %v1092_v15 = vxor.u32 2147483648, %v1075_v56  ;;  %v1403_v8 = vsel %vm1401_vm0, %v1402_v30, %v1393_v42  ;;  %vm1246_vm4 = vcmp.eq.s32.totalorder %v1241_v20, 2 }
 0x2b8   : > { %v1542_v48 = vmul.f32 -0.00019511016, %v1534_v52  ;;  %v1535_v32 = vmul.f32 -0.001358992, %v1534_v52  ;;  %v1245_v46 = vsel %vm1243_vm3, %v1230_v63, %v1244_v4  ;;  %vm1087_vm6 = vcmp.lt.s32.totalorder %v1086_v39, 2 }
 0x2b9   : > { %vm1088_vm5 = vcmp.eq.s32.totalorder %v1086_v39, 0  ;;  %vm1091_vm7 = vcmp.eq.s32.totalorder %v1086_v39, 2  ;;  %vm1553_vm13 = vcmp.eq.s32.totalorder %v1551_v0, 0  ;;  %vm1556_vm8 = vcmp.eq.s32.totalorder %v1551_v0, 2 }
 0x2ba   : > { %v1543_v45 = vadd.f32 0.008332121, %v1542_v48  ;;  %v1536_v47 = vadd.f32 0.041655596, %v1535_v32  ;;  %v1404_v48 = vsel %vm1397_vm11, %v1400_v57, %v1403_v8  ;;  %v1248_v32 = vsel %vm1246_vm4, %v1247_v16, %v1238_v27 }
 0x2bb   : > { %v1090_v18 = vsel %vm1088_vm5, %v1075_v56, %v1089_v2  ;;  %v1249_v28 = vsel %vm1242_vm2, %v1245_v46, %v1248_v32  ;;  %v1093_v23 = vsel %vm1091_vm7, %v1092_v15, %v1083_v60  ;;  %vm1552_vm9 = vcmp.lt.s32.totalorder %v1551_v0, 2 }
 0x2bc   : > { %v1544_v31 = vmul.f32 %v1543_v45, %v1534_v52  ;;  %v1537_v62 = vmul.f32 %v1536_v47, %v1534_v52  ;;  %v1405_v3 = vsel %vm1394_vm14, nan, %v1404_v48  ;;  %vm1549_vm10 = vweird.f32 %v3975_v51 }
 0x2bd   : > { %vm1239_vm11 = vweird.f32 %v3783_v50  ;;  %v1094_v45 = vsel %vm1087_vm6, %v1090_v18, %v1093_v23  ;;  %v4280_v47 = vadd.f32 %v3426_v35, %v261_v49  ;;  %v4283_v60 = vsub.f32 %v409_v34, %v4211_v19  ;;  %v3078_v34 = vld [vmem:[%s5354_s3 + $0x30] sm:$0xff] }
 0x2be   : > { %v1545_v13 = vadd.f32 -0.16666654, %v1544_v31  ;;  %v1538_v55 = vadd.f32 -0.4999988, %v1537_v62  ;;  %v1250_v27 = vsel %vm1239_vm11, nan, %v1249_v28  ;;  %v1563_v44 = vmul.f32 %v1405_v3, %v4269_v58 }
 0x2bf   : > { %vm1084_vm14 = vweird.f32 %v3777_v29  ;;  %v4289_v51 = vsub.f32 %v4248_v12, %v4280_v47  ;;  %v1562_v31 = vmul.f32 %v1250_v27, %v4283_v60  ;;  %v3076_v12 = vld [vmem:[%s5354_s3 + $0x20] sm:$0xff] }
 0x2c0   : > { %v1546_v54 = vmul.f32 %v1545_v13, %v1534_v52  ;;  %v1539_v6 = vmul.f32 %v1538_v55, %v1534_v52  ;;  %v1095_v43 = vsel %vm1084_vm14, nan, %v1094_v45  ;;  %v1567_v35 = vadd.f32 %v1563_v44, %v4225_v24 }
 0x2c1   : > { %v1561_v1 = vmul.f32 %v1095_v43, %v4289_v51  ;;  %v1566_v62 = vadd.f32 %v1562_v31, %v4211_v19 }
 0x2c2   : > { %v1547_v59 = vadd.f32 1.0, %v1546_v54  ;;  %v1540_v37 = vadd.f32 1.0, %v1539_v6 }
 0x2c3   : > { %v1565_v29 = vadd.f32 %v1561_v1, %v4280_v47 }
 0x2c4   : > { %v1548_v26 = vmul.f32 %v1547_v59, %v1532_v17  ;;  %v1557_v21 = vxor.u32 2147483648, %v1540_v37 }
 0x2c6   : > { %v1554_v52 = vxor.u32 2147483648, %v1548_v26  ;;  %v1558_v38 = vsel %vm1556_vm8, %v1557_v21, %v1548_v26 }
 0x2c8   : > { %v1555_v17 = vsel %vm1553_vm13, %v1540_v37, %v1554_v52 }
 0x2c9   : > { %v1559_v42 = vsel %vm1552_vm9, %v1555_v17, %v1558_v38 }
 0x2ca   : > { %v1560_v61 = vsel %vm1549_vm10, nan, %v1559_v42 }
 0x2cb   : > { %v1564_v40 = vmul.f32 0.0, %v1560_v61 }
 0x2cd   : > { %v1568_v50 = vadd.f32 1.0, %v1564_v40 }
 0x2cf   : > { %3080 = vmatpush.msk.msra.mxu2 %vm908_vm1, %v1568_v50 }
 0x2d1   : > { %1602 = vmatpush.msra.mxu2 %v1567_v35 }
 0x2d3   : > { %1603 = vmatpush.msra.mxu2 %v1566_v62 }
 0x2d5   : > { %1604 = vmatpush.msra.mxu2 %v1565_v29 }
 0x2d6   : > { %3081 = vmatmul.msk.f32.vlgmr.msra.gmra.mxu2 %vm895_vm12, %v3076_v12 }
 0x2de   : > { %3082 = vmatmul.msk.f32.gmra.mxu2 %vm895_vm12, %v3077_v5 }
 0x2e6   : > { %3083 = vmatmul.msk.f32.gmra.mxu2 %vm895_vm12, %v3078_v34 }
 0x2ee   : > { %3084 = vmatmul.msk.f32.gmra.mxu2 %vm895_vm12, %v3079_v41 }
 0x359   : > { %v4313_v25 = vpop.f32.mrf.mxu2 }
 0x35a   : > { %v1618_v10 = vand.u32 2147483647, %v4313_v25  ;;  %v1621_v13 = vand.u32 2139095040, %v4313_v25 }
 0x35c   : > { %v1622_v55 = vshrl.u32 %v1621_v13, 23  ;;  %v1625_v2 = vand.u32 8388607, %v1618_v10 }
 0x35e   : > { %v3085_v63 = vadd.s32 4294967169, %v1622_v55  ;;  %v1626_v56 = vor.u32 8388608, %v1625_v2 }
 0x360   : > { %v1628_v36 = vadd.s32 1, %v3085_v63  ;;  %v4322_v39 = vshll.u32 %v1626_v56, 8 }
 0x361   : > { %v4319_v20 = vpop.f32.mrf.mxu2 }
 0x362   : > { %vm1629_vm15 = vcmp.gt.s32.totalorder %v1628_v36, 0  ;;  %v1776_v54 = vand.u32 2139095040, %v4319_v20  ;;  %v1773_v0 = vand.u32 2147483647, %v4319_v20  ;;  %v1667_v45 = vand.u32 65535, %v4322_v39 }
 0x363   : > { %v1630_v4 = vsel %vm1629_vm15, %v1628_v36, 0  ;;  %v1668_v1 = vshrl.u32 %v4322_v39, 16 }
 0x364   : > { %v1632_v6 = vand.u32 31, %v1630_v4  ;;  %v1777_v59 = vshrl.u32 %v1776_v54, 23  ;;  %v4324_v37 = vshrl.u32 %v1630_v4, 5  ;;  %v4363_v50 = vand.u32 8388607, %v1773_v0 }
 0x366   : > { %v1633_v30 = vsub.s32 32, %v1632_v6  ;;  %v1635_v57 = vshll.u32 %v3241_v22, %v1632_v6  ;;  %v1638_v16 = vshll.u32 %v5380_v7, %v1632_v6  ;;  %v1641_v21 = vshll.u32 %v5370_v11, %v1632_v6 }
 0x367   : > { %v1644_v46 = vshll.u32 %v3239_v14, %v1632_v6  ;;  %v1647_v52 = vshll.u32 %v5381_v53, %v1632_v6  ;;  %v3088_v23 = vadd.s32 4294967169, %v1777_v59  ;;  %vm1650_vm0 = vcmp.lt.s32.totalorder %v4324_v37, 1 }
 0x368   : > { %v1636_v15 = vshrl.u32 %v5380_v7, %v1633_v30  ;;  %v1639_v26 = vshrl.u32 %v5370_v11, %v1633_v30  ;;  %v1642_v8 = vshrl.u32 %v3239_v14, %v1633_v30  ;;  %v1645_v48 = vshrl.u32 %v5381_v53, %v1633_v30 }
 0x369   : > { %v1648_v32 = vshrl.u32 %v5382_v33, %v1633_v30  ;;  %vm1653_vm2 = vcmp.lt.s32.totalorder %v4324_v37, 4  ;;  %vm1652_vm3 = vcmp.lt.s32.totalorder %v4324_v37, 3  ;;  %v1783_v40 = vadd.s32 1, %v3088_v23 }
 0x36a   : > { %v4337_v18 = vor.u32 %v1636_v15, %v1635_v57  ;;  %v4339_v49 = vor.u32 %v1639_v26, %v1638_v16  ;;  %v1643_v28 = vor.u32 %v1642_v8, %v1641_v21  ;;  %v1646_v17 = vor.u32 %v1645_v48, %v1644_v46 }
 0x36b   : > { %v1649_v38 = vor.u32 %v1648_v32, %v1647_v52  ;;  %vm1651_vm4 = vcmp.lt.s32.totalorder %v4324_v37, 2  ;;  %vm1784_vm6 = vcmp.gt.s32.totalorder %v1783_v40, 0  ;;  %v1634_v34 = vshrl.u32 %v3241_v22, %v1633_v30 }
 0x36c   : > { %v1658_v3 = vsel %vm1650_vm0, %v4337_v18, %v4339_v49  ;;  %v1662_v42 = vsel %vm1650_vm0, %v4339_v49, %v1643_v28  ;;  %v1659_v61 = vsel %vm1653_vm2, %v1646_v17, 920167782  ;;  %v1655_v41 = vsel %vm1653_vm2, %v1643_v28, 2102212464 }
 0x36d   : > { %v1663_v27 = vsel %vm1653_vm2, %v1649_v38, 1326507024  ;;  %v1660_v44 = vsel %vm1652_vm3, %v1643_v28, %v1659_v61  ;;  %v1781_v63 = vor.u32 8388608, %v4363_v50  ;;  %v1785_v4 = vsel %vm1784_vm6, %v1783_v40, 0 }
 0x36e   : > { %v1664_v43 = vsel %vm1652_vm3, %v1646_v17, %v1663_v27  ;;  %v1661_v31 = vsel %vm1651_vm4, %v1658_v3, %v1660_v44  ;;  %v1787_v46 = vand.u32 31, %v1785_v4  ;;  %v4380_v27 = vshrl.u32 %v1785_v4, 5 }
 0x36f   : > { %v1665_v35 = vsel %vm1651_vm4, %v1662_v42, %v1664_v43  ;;  %v1691_v12 = vand.u32 65535, %v1661_v31  ;;  %v1692_v5 = vshrl.u32 %v1661_v31, 16 }
 0x370   : > { %v1669_v62 = vand.u32 65535, %v1665_v35  ;;  %v1670_v29 = vshrl.u32 %v1665_v35, 16  ;;  %v4376_v17 = vsub.s32 32, %v1787_v46  ;;  %v1790_v40 = vshll.u32 %v3241_v22, %v1787_v46 }
 0x371   : > { %v1694_v36 = vmul.u32 %v1692_v5, %v1667_v45  ;;  %v1695_v56 = vmul.u32 %v1691_v12, %v1668_v1  ;;  %v1693_v59 = vmul.u32 %v1691_v12, %v1667_v45  ;;  %v1696_v57 = vmul.u32 %v1692_v5, %v1668_v1 }
 0x372   : > { %v1672_v13 = vmul.u32 %v1670_v29, %v1667_v45  ;;  %v1673_v55 = vmul.u32 %v1669_v62, %v1668_v1  ;;  %v1671_v2 = vmul.u32 %v1669_v62, %v1667_v45  ;;  %v1674_v54 = vmul.u32 %v1670_v29, %v1668_v1 }
 0x373   : > { %v1697_v21 = vshll.u32 %v1694_v36, 16  ;;  %v1698_v8 = vshrl.u32 %v1694_v36, 16  ;;  %v1699_v52 = vshll.u32 %v1695_v56, 16  ;;  %v1700_v3 = vshrl.u32 %v1695_v56, 16 }
 0x374   : > { %v1675_v6 = vshll.u32 %v1672_v13, 16  ;;  %v1676_v16 = vshrl.u32 %v1672_v13, 16  ;;  %v1677_v15 = vshll.u32 %v1673_v55, 16  ;;  %v1678_v26 = vshrl.u32 %v1673_v55, 16 }
 0x375   : > { %vm1701_vm7 = vc.u32 %v1693_v59, %v1697_v21  ;;  %v1703_v32 = vadd.s32 %v1697_v21, %v1693_v59  ;;  %v1791_v43 = vshrl.u32 %v5380_v7, %v4376_v17  ;;  %v1793_v50 = vshll.u32 %v5380_v7, %v1787_v46 }
 0x376   : > { %vm1679_vm5 = vc.u32 %v1671_v2, %v1675_v6  ;;  %v1681_v30 = vadd.s32 %v1675_v6, %v1671_v2  ;;  %v1702_v23 = vsel %vm1701_vm7, 1, %v3236_v9  ;;  %v1794_v31 = vshrl.u32 %v5370_v11, %v4376_v17 }
 0x377   : > { %v1680_v48 = vsel %vm1679_vm5, 1, %v3236_v9  ;;  %v1704_v42 = vadd.s32 %v1702_v23, %v1696_v57  ;;  %vm1705_vm8 = vc.u32 %v1703_v32, %v1699_v52  ;;  %v1796_v1 = vshll.u32 %v5370_v11, %v1787_v46 }
 0x378   : > { %v1682_v28 = vadd.s32 %v1680_v48, %v1674_v54  ;;  %vm1683_vm13 = vc.u32 %v1681_v30, %v1677_v15  ;;  %v1706_v61 = vsel %vm1705_vm8, 1, %v3236_v9  ;;  %v1797_v62 = vshrl.u32 %v3239_v14, %v4376_v17 }
 0x379   : > { %v1684_v38 = vsel %vm1683_vm13, 1, %v3236_v9  ;;  %v1708_v44 = vadd.s32 %v1706_v61, %v1704_v42  ;;  %v1799_v29 = vshll.u32 %v3239_v14, %v1787_v46  ;;  %v4392_v5 = vor.u32 %v1791_v43, %v1790_v40  ;;  %v4450_v40 = vpop.f32.mrf.mxu2 }
 0x37a   : > { %v1686_v45 = vadd.s32 %v1684_v38, %v1682_v28  ;;  %v4394_v13 = vor.u32 %v1794_v31, %v1793_v50  ;;  %v1800_v55 = vshrl.u32 %v5381_v53, %v4376_v17  ;;  %v4400_v36 = vor.u32 %v1797_v62, %v1796_v1 }
 0x37b   : > { %v1709_v12 = vadd.s32 %v1708_v44, %v1698_v8  ;;  %v1802_v56 = vshll.u32 %v5381_v53, %v1787_v46  ;;  %v1803_v4 = vshrl.u32 %v5382_v33, %v4376_v17  ;;  %v1654_v54 = vsel %vm1650_vm0, %v1634_v34, %v4337_v18 }
 0x37c   : > { %v1687_v35 = vadd.s32 %v1686_v45, %v1676_v16  ;;  %v4408_v6 = vadd.s32 %v1703_v32, %v1699_v52  ;;  %v1801_v57 = vor.u32 %v1800_v55, %v1799_v29  ;;  %v1656_v16 = vsel %vm1652_vm3, %v4339_v49, %v1655_v41 }
 0x37d   : > { %v1710_v59 = vadd.s32 %v1709_v12, %v1700_v3  ;;  %v1804_v15 = vor.u32 %v1803_v4, %v1802_v56  ;;  %vm1805_vm9 = vcmp.lt.s32.totalorder %v4380_v27, 1  ;;  %vm1808_vm11 = vcmp.lt.s32.totalorder %v4380_v27, 4 }
 0x37e   : > { %v4398_v2 = vadd.s32 %v1687_v35, %v1678_v26  ;;  %v4414_v26 = vshll.u32 %v1781_v63, 8  ;;  %v1813_v18 = vsel %vm1805_vm9, %v4392_v5, %v4394_v13  ;;  %vm1807_vm14 = vcmp.lt.s32.totalorder %v4380_v27, 3 }
 0x37f   : > { %v1714_v21 = vadd.s32 1, %v1710_v59  ;;  %v1814_v49 = vsel %vm1808_vm11, %v1801_v57, 920167782  ;;  %v1817_v34 = vsel %vm1805_vm9, %v4394_v13, %v4400_v36  ;;  %v1818_v41 = vsel %vm1808_vm11, %v1804_v15, 1326507024 }
 0x380   : > { %vm1713_vm10 = vc.u32 %v4398_v2, %v4408_v6  ;;  %v1657_v63 = vsel %vm1651_vm4, %v1654_v54, %v1656_v16  ;;  %vm1806_vm15 = vcmp.lt.s32.totalorder %v4380_v27, 2  ;;  %v1815_v30 = vsel %vm1807_vm14, %v4400_v36, %v1814_v49 }
 0x381   : > { %v1819_v8 = vsel %vm1807_vm14, %v1801_v57, %v1818_v41  ;;  %v1816_v46 = vsel %vm1806_vm15, %v1813_v18, %v1815_v30  ;;  %v1822_v52 = vand.u32 65535, %v4414_v26  ;;  %v1823_v37 = vshrl.u32 %v4414_v26, 16 }
 0x382   : > { %v1820_v48 = vsel %vm1806_vm15, %v1817_v34, %v1819_v8  ;;  %v1715_v32 = vsel %vm1713_vm10, %v1714_v21, %v1710_v59  ;;  %v1847_v38 = vshrl.u32 %v1816_v46, 16  ;;  %v1711_v3 = vmul.u32 %v4322_v39, %v1657_v63 }
 0x383   : > { %v1824_v28 = vand.u32 65535, %v1820_v48  ;;  %v1825_v23 = vshrl.u32 %v1820_v48, 16  ;;  %v1846_v42 = vand.u32 65535, %v1816_v46  ;;  %v1931_v29 = vand.u32 2139095040, %v4450_v40 }
 0x384   : > { %v1716_v44 = vadd.s32 %v1715_v32, %v1711_v3  ;;  %v1849_v43 = vmul.u32 %v1847_v38, %v1822_v52  ;;  %v1851_v16 = vmul.u32 %v1847_v38, %v1823_v37  ;;  %v1789_v30 = vshrl.u32 %v3241_v22, %v4376_v17 }
 0x385   : > { %v1827_v45 = vmul.u32 %v1825_v23, %v1822_v52  ;;  %v1828_v61 = vmul.u32 %v1824_v28, %v1823_v37  ;;  %v1826_v50 = vmul.u32 %v1824_v28, %v1822_v52  ;;  %v1829_v35 = vmul.u32 %v1825_v23, %v1823_v37 }
 0x386   : > { %v1850_v1 = vmul.u32 %v1846_v42, %v1823_v37  ;;  %v1852_v62 = vshll.u32 %v1849_v43, 16  ;;  %v1848_v56 = vmul.u32 %v1846_v42, %v1822_v52  ;;  %v1717_v4 = vadd.s32 536870912, %v1716_v44 }
 0x387   : > { %v1830_v31 = vshll.u32 %v1827_v45, 16  ;;  %v1832_v12 = vshll.u32 %v1828_v61, 16  ;;  %v1831_v59 = vshrl.u32 %v1827_v45, 16  ;;  %v1932_v34 = vshrl.u32 %v1931_v29, 23 }
 0x388   : > { %vm1856_vm3 = vc.u32 %v1848_v56, %v1852_v62  ;;  %v1854_v15 = vshll.u32 %v1850_v1, 16  ;;  %v1858_v49 = vadd.s32 %v1852_v62, %v1848_v56  ;;  %v4456_v41 = vshrl.u32 %v1717_v4, 30 }
 0x389   : > { %vm1834_vm0 = vc.u32 %v1826_v50, %v1830_v31  ;;  %v1836_v55 = vadd.s32 %v1830_v31, %v1826_v50  ;;  %v1857_v18 = vsel %vm1856_vm3, 1, %v3236_v9  ;;  %v1810_v8 = vsel %vm1808_vm11, %v4400_v36, 2102212464 }
 0x38a   : > { %v1835_v39 = vsel %vm1834_vm0, 1, %v3236_v9  ;;  %v1859_v63 = vadd.s32 %v1857_v18, %v1851_v16  ;;  %vm1860_vm4 = vc.u32 %v1858_v49, %v1854_v15  ;;  %v1833_v48 = vshrl.u32 %v1828_v61, 16 }
 0x38b   : > { %v1837_v54 = vadd.s32 %v1835_v39, %v1829_v35  ;;  %vm1838_vm2 = vc.u32 %v1836_v55, %v1832_v12  ;;  %v1861_v52 = vsel %vm1860_vm4, 1, %v3236_v9  ;;  %v3091_v37 = vadd.s32 4294967169, %v1932_v34 }
 0x38c   : > { %v1839_v57 = vsel %vm1838_vm2, 1, %v3236_v9  ;;  %v1809_v32 = vsel %vm1805_vm9, %v1789_v30, %v4392_v5  ;;  %v1853_v28 = vshrl.u32 %v1849_v43, 16  ;;  %v1863_v23 = vadd.s32 %v1861_v52, %v1859_v63 }
 0x38d   : > { %v1841_v21 = vadd.s32 %v1839_v57, %v1837_v54  ;;  %v1719_v38 = vshll.u32 %v4456_v41, 30  ;;  %v1811_v17 = vsel %vm1807_vm14, %v4394_v13, %v1810_v8  ;;  %v1938_v36 = vadd.s32 1, %v3091_v37  ;;  %v4511_v8 = vpop.f32.mrf.mxu2 }
 0x38e   : > { %v1855_v42 = vshrl.u32 %v1850_v1, 16  ;;  %v1864_v45 = vadd.s32 %v1863_v23, %v1853_v28  ;;  %v1928_v61 = vand.u32 2147483647, %v4450_v40  ;;  %v4474_v50 = vadd.s32 %v1858_v49, %v1854_v15 }
 0x38f   : > { %v1842_v46 = vadd.s32 %v1841_v21, %v1831_v59  ;;  %vm1939_vm6 = vcmp.gt.s32.totalorder %v1938_v36, 0  ;;  %v1812_v5 = vsel %vm1806_vm15, %v1809_v32, %v1811_v17  ;;  %v4478_v31 = vsub.s32 %v1716_v44, %v1719_v38 }
 0x390   : > { %v1865_v43 = vadd.s32 %v1864_v45, %v1855_v42  ;;  %v1940_v13 = vsel %vm1939_vm6, %v1938_v36, 0  ;;  %v1935_v1 = vand.u32 8388607, %v1928_v61  ;;  %v1866_v62 = vmul.u32 %v4414_v26, %v1812_v5 }
 0x391   : > { %v4471_v3 = vadd.s32 %v1842_v46, %v1833_v48  ;;  %v1942_v29 = vand.u32 31, %v1940_v13  ;;  %vm1721_vm7 = vcmp.lt.s32.totalorder %v4478_v31, 0  ;;  %v1722_v44 = vsub.s32 0, %v4478_v31 }
 0x392   : > { %v1869_v35 = vadd.s32 1, %v1865_v43  ;;  %v1936_v56 = vor.u32 8388608, %v1935_v1  ;;  %v4489_v4 = vshrl.u32 %v1940_v13, 5  ;;  %v2086_v38 = vand.u32 2139095040, %v4511_v8 }
 0x393   : > { %vm1868_vm5 = vc.u32 %v4471_v3, %v4474_v50  ;;  %v4486_v27 = vsub.s32 32, %v1942_v29  ;;  %v1945_v39 = vshll.u32 %v3241_v22, %v1942_v29  ;;  %v1948_v26 = vshll.u32 %v5380_v7, %v1942_v29 }
 0x394   : > { %v1870_v12 = vsel %vm1868_vm5, %v1869_v35, %v1865_v43  ;;  %v1951_v16 = vshll.u32 %v5370_v11, %v1942_v29  ;;  %v1954_v21 = vshll.u32 %v3239_v14, %v1942_v29  ;;  %v1957_v52 = vshll.u32 %v5381_v53, %v1942_v29 }
 0x395   : > { %v1871_v55 = vadd.s32 %v1870_v12, %v1866_v62  ;;  %v1946_v59 = vshrl.u32 %v5380_v7, %v4486_v27  ;;  %v1949_v57 = vshrl.u32 %v5370_v11, %v4486_v27  ;;  %v1952_v15 = vshrl.u32 %v3239_v14, %v4486_v27 }
 0x396   : > { %v1955_v18 = vshrl.u32 %v5381_v53, %v4486_v27  ;;  %v1958_v30 = vshrl.u32 %v5382_v33, %v4486_v27  ;;  %v1723_v37 = vsel %vm1721_vm7, %v1722_v44, %v4478_v31  ;;  %v4518_v28 = vshll.u32 %v1936_v56, 8 }
 0x397   : > { %v1872_v54 = vadd.s32 536870912, %v1871_v55  ;;  %v4505_v34 = vor.u32 %v1946_v59, %v1945_v39  ;;  %v4507_v63 = vor.u32 %v1949_v57, %v1948_v26  ;;  %v1953_v46 = vor.u32 %v1952_v15, %v1951_v16 }
 0x398   : > { %v1956_v48 = vor.u32 %v1955_v18, %v1954_v21  ;;  %v1959_v23 = vor.u32 %v1958_v30, %v1957_v52  ;;  %vm1960_vm13 = vcmp.lt.s32.totalorder %v4489_v4, 1  ;;  %vm1963_vm8 = vcmp.lt.s32.totalorder %v4489_v4, 4 }
 0x399   : > { %v4503_v49 = vshrl.u32 %v1872_v54, 30  ;;  %vm1962_vm9 = vcmp.lt.s32.totalorder %v4489_v4, 3  ;;  %v1968_v36 = vsel %vm1960_vm13, %v4505_v34, %v4507_v63  ;;  %v1724_v5 = vclz %v1723_v37 }
 0x39a   : > { %v1969_v42 = vsel %vm1963_vm8, %v1956_v48, 920167782  ;;  %vm1961_vm11 = vcmp.lt.s32.totalorder %v4489_v4, 2  ;;  %v1972_v35 = vsel %vm1960_vm13, %v4507_v63, %v1953_v46  ;;  %v2087_v1 = vshrl.u32 %v2086_v38, 23 }
 0x39b   : > { %v1874_v32 = vshll.u32 %v4503_v49, 30  ;;  %v1970_v45 = vsel %vm1962_vm9, %v1953_v46, %v1969_v42  ;;  %v1973_v62 = vsel %vm1963_vm8, %v1959_v23, 1326507024  ;;  %v1977_v29 = vand.u32 65535, %v4518_v28 }
 0x39c   : > { %v1971_v13 = vsel %vm1961_vm11, %v1968_v36, %v1970_v45  ;;  %v1974_v44 = vsel %vm1962_vm9, %v1956_v48, %v1973_v62  ;;  %v3086_v39 = vadd.s32 4294967294, %v1724_v5  ;;  %v1978_v26 = vshrl.u32 %v4518_v28, 16 }
 0x39d   : > { %v4523_v17 = vsub.s32 %v1871_v55, %v1874_v32  ;;  %v2002_v12 = vshrl.u32 %v1971_v13, 16  ;;  %v2001_v56 = vand.u32 65535, %v1971_v13  ;;  %v1975_v54 = vsel %vm1961_vm11, %v1972_v35, %v1974_v44 }
 0x39e   : > { %v1979_v57 = vand.u32 65535, %v1975_v54  ;;  %v1980_v16 = vshrl.u32 %v1975_v54, 16  ;;  %v3094_v15 = vadd.s32 4294967169, %v2087_v1  ;;  %v2083_v32 = vand.u32 2147483647, %v4511_v8 }
 0x39f   : > { %vm1876_vm10 = vcmp.lt.s32.totalorder %v4523_v17, 0  ;;  %v1877_v43 = vsub.s32 0, %v4523_v17  ;;  %v2004_v59 = vmul.u32 %v2002_v12, %v1977_v29  ;;  %v2005_v30 = vmul.u32 %v2001_v56, %v1978_v26 }
 0x3a0   : > { %v1982_v18 = vmul.u32 %v1980_v16, %v1977_v29  ;;  %v1983_v37 = vmul.u32 %v1979_v57, %v1978_v26  ;;  %vm3087_vm14 = vcmp.lt.s32.totalorder %v3086_v39, 0  ;;  %v1965_v48 = vsel %vm1963_vm8, %v1953_v46, 2102212464 }
 0x3a1   : > { %v1878_v55 = vsel %vm1876_vm10, %v1877_v43, %v4523_v17  ;;  %v2007_v52 = vshll.u32 %v2004_v59, 16  ;;  %v2003_v23 = vmul.u32 %v2001_v56, %v1977_v29  ;;  %v2093_v38 = vadd.s32 1, %v3094_v15 }
 0x3a2   : > { %v1879_v21 = vclz %v1878_v55  ;;  %v1981_v42 = vmul.u32 %v1979_v57, %v1977_v29  ;;  %v1985_v45 = vshll.u32 %v1982_v18, 16  ;;  %v2006_v5 = vmul.u32 %v2002_v12, %v1978_v26 }
 0x3a3   : > { %v1984_v43 = vmul.u32 %v1980_v16, %v1978_v26  ;;  %v1987_v13 = vshll.u32 %v1983_v37, 16  ;;  %v2009_v35 = vshll.u32 %v2005_v30, 16  ;;  %vm2011_vm15 = vc.u32 %v2003_v23, %v2007_v52 }
 0x3a4   : > { %v3089_v36 = vadd.s32 4294967294, %v1879_v21  ;;  %vm1989_vm0 = vc.u32 %v1981_v42, %v1985_v45  ;;  %v1991_v1 = vadd.s32 %v1985_v45, %v1981_v42  ;;  %v2012_v62 = vsel %vm2011_vm15, 1, %v3236_v9 }
 0x3a5   : > { %v2013_v55 = vadd.s32 %v2007_v52, %v2003_v23  ;;  %v4556_v44 = vsel %vm3087_vm14, 0, %v3086_v39  ;;  %v1944_v46 = vshrl.u32 %v3241_v22, %v4486_v27  ;;  %v1990_v56 = vsel %vm1989_vm0, 1, %v3236_v9 }
 0x3a6   : > { %v2090_v29 = vand.u32 8388607, %v2083_v32  ;;  %v1992_v12 = vadd.s32 %v1990_v56, %v1984_v43  ;;  %vm1993_vm2 = vc.u32 %v1991_v1, %v1987_v13  ;;  %v2014_v54 = vadd.s32 %v2012_v62, %v2006_v5 }
 0x3a7   : > { %vm2015_vm3 = vc.u32 %v2013_v55, %v2009_v35  ;;  %vm3090_vm4 = vcmp.lt.s32.totalorder %v3089_v36, 0  ;;  %v1964_v26 = vsel %vm1960_vm13, %v1944_v46, %v4505_v34  ;;  %v1966_v39 = vsel %vm1962_vm9, %v4507_v63, %v1965_v48 }
 0x3a8   : > { %v1994_v27 = vsel %vm1993_vm2, 1, %v3236_v9  ;;  %v1986_v57 = vshrl.u32 %v1982_v18, 16  ;;  %v2016_v15 = vsel %vm2015_vm3, 1, %v3236_v9  ;;  %vm2094_vm6 = vcmp.gt.s32.totalorder %v2093_v38, 0 }
 0x3a9   : > { %v1996_v16 = vadd.s32 %v1994_v27, %v1992_v12  ;;  %v1732_v21 = vsub.s32 4294967266, %v4556_v44  ;;  %v2008_v52 = vshrl.u32 %v2004_v59, 16  ;;  %v2018_v23 = vadd.s32 %v2016_v15, %v2014_v54 }
 0x3aa   : > { %v2095_v42 = vsel %vm2094_vm6, %v2093_v38, 0  ;;  %v1967_v45 = vsel %vm1961_vm11, %v1964_v26, %v1966_v39  ;;  %v1988_v34 = vshrl.u32 %v1983_v37, 16  ;;  %v4575_v63 = vsel %vm3090_vm4, 0, %v3089_v36 }
 0x3ab   : > { %v1997_v5 = vadd.s32 %v1996_v16, %v1986_v57  ;;  %v2097_v43 = vand.u32 31, %v2095_v42  ;;  %v2010_v48 = vshrl.u32 %v2005_v30, 16  ;;  %v2019_v18 = vadd.s32 %v2018_v23, %v2008_v52 }
 0x3ac   : > { %v4579_v1 = vadd.s32 %v2013_v55, %v2009_v35  ;;  %v1733_v59 = vadd.s32 127, %v1732_v21  ;;  %v2021_v38 = vmul.u32 %v4518_v28, %v1967_v45  ;;  %v2091_v4 = vor.u32 8388608, %v2090_v29 }
 0x3ad   : > { %v4577_v13 = vadd.s32 %v1997_v5, %v1988_v34  ;;  %v4581_v62 = vsub.s32 32, %v2097_v43  ;;  %v2020_v46 = vadd.s32 %v2019_v18, %v2010_v48  ;;  %v1887_v37 = vsub.s32 4294967266, %v4575_v63 }
 0x3ae   : > { %v2100_v36 = vshll.u32 %v3241_v22, %v2097_v43  ;;  %v2103_v35 = vshll.u32 %v5380_v7, %v2097_v43  ;;  %v4595_v29 = vshrl.u32 %v2095_v42, 5  ;;  %v2106_v12 = vshll.u32 %v5370_v11, %v2097_v43 }
 0x3af   : > { %vm2023_vm5 = vc.u32 %v4577_v13, %v4579_v1  ;;  %v2101_v30 = vshrl.u32 %v5380_v7, %v4581_v62  ;;  %v2024_v56 = vadd.s32 1, %v2020_v46  ;;  %v2104_v55 = vshrl.u32 %v5370_v11, %v4581_v62 }
 0x3b0   : > { %v2107_v28 = vshrl.u32 %v3239_v14, %v4581_v62  ;;  %v2109_v54 = vshll.u32 %v3239_v14, %v2097_v43  ;;  %v2110_v26 = vshrl.u32 %v5381_v53, %v4581_v62  ;;  %v2112_v16 = vshll.u32 %v5381_v53, %v2097_v43 }
 0x3b1   : > { %v2025_v39 = vsel %vm2023_vm5, %v2024_v56, %v2020_v46  ;;  %v4601_v27 = vor.u32 %v2101_v30, %v2100_v36  ;;  %v4603_v57 = vor.u32 %v2104_v55, %v2103_v35  ;;  %v2113_v23 = vshrl.u32 %v5382_v33, %v4581_v62 }
 0x3b2   : > { %v2026_v15 = vadd.s32 %v2025_v39, %v2021_v38  ;;  %v2108_v21 = vor.u32 %v2107_v28, %v2106_v12  ;;  %v2111_v52 = vor.u32 %v2110_v26, %v2109_v54  ;;  %v1712_v42 = vadd.s32 %v4408_v6, %v4398_v2 }
 0x3b3   : > { %v1728_v45 = vsub.s32 32, %v4556_v44  ;;  %v1734_v34 = vshll.u32 %v1733_v59, 23  ;;  %v1888_v5 = vadd.s32 127, %v1887_v37  ;;  %v2114_v18 = vor.u32 %v2113_v23, %v2112_v16 }
 0x3b4   : > { %v2027_v48 = vadd.s32 536870912, %v2026_v15  ;;  %vm2115_vm7 = vcmp.lt.s32.totalorder %v4595_v29, 1  ;;  %vm2118_vm13 = vcmp.lt.s32.totalorder %v4595_v29, 4  ;;  %vm2117_vm8 = vcmp.lt.s32.totalorder %v4595_v29, 3 }
 0x3b5   : > { %v2123_v43 = vsel %vm2115_vm7, %v4601_v27, %v4603_v57  ;;  %v2124_v2 = vsel %vm2118_vm13, %v2111_v52, 920167782  ;;  %v4620_v6 = vshll.u32 %v2091_v4, 8  ;;  %vm2116_vm9 = vcmp.lt.s32.totalorder %v4595_v29, 2 }
 0x3b6   : > { %v4622_v59 = vshrl.u32 %v2027_v48, 30  ;;  %v2125_v46 = vsel %vm2117_vm8, %v2108_v21, %v2124_v2  ;;  %v2127_v38 = vsel %vm2115_vm7, %v4603_v57, %v2108_v21  ;;  %v1729_v37 = vshll.u32 %v4478_v31, %v4556_v44 }
 0x3b7   : > { %v1730_v36 = vshrl.u32 %v1712_v42, %v1728_v45  ;;  %v2126_v30 = vsel %vm2116_vm9, %v2123_v43, %v2125_v46  ;;  %v2128_v4 = vsel %vm2118_vm13, %v2114_v18, 1326507024  ;;  %v4636_v56 = vor.u32 4788187, %v1734_v34 }
 0x3b8   : > { %v1883_v35 = vsub.s32 32, %v4575_v63  ;;  %v2029_v55 = vshll.u32 %v4622_v59, 30  ;;  %v2129_v28 = vsel %vm2117_vm8, %v2111_v52, %v2128_v4  ;;  %v1889_v12 = vshll.u32 %v1888_v5, 23 }
 0x3b9   : > { %v2130_v31 = vsel %vm2116_vm9, %v2127_v38, %v2129_v28  ;;  %v2132_v44 = vand.u32 65535, %v4620_v6  ;;  %v2157_v54 = vshrl.u32 %v2126_v30, 16  ;;  %v2156_v23 = vand.u32 65535, %v2126_v30 }
 0x3ba   : > { %v2030_v26 = vsub.s32 %v2026_v15, %v2029_v55  ;;  %v2134_v39 = vand.u32 65535, %v2130_v31  ;;  %v2135_v16 = vshrl.u32 %v2130_v31, 16  ;;  %v4645_v42 = vor.u32 %v1730_v36, %v1729_v37 }
 0x3bb   : > { %v1867_v45 = vadd.s32 %v4474_v50, %v4471_v3  ;;  %v2133_v34 = vshrl.u32 %v4620_v6, 16  ;;  %v2159_v48 = vmul.u32 %v2157_v54, %v2132_v44  ;;  %v1736_v52 = vand.u32 2147483647, %v4636_v56 }
 0x3bc   : > { %v1884_v5 = vshll.u32 %v4523_v17, %v4575_v63  ;;  %vm2031_vm10 = vcmp.lt.s32.totalorder %v2030_v26, 0  ;;  %v2032_v18 = vsub.s32 0, %v2030_v26  ;;  %v4653_v15 = vor.u32 4788187, %v1889_v12 }
 0x3bd   : > { %v1885_v43 = vshrl.u32 %v1867_v45, %v1883_v35  ;;  %v2137_v2 = vmul.u32 %v2135_v16, %v2132_v44  ;;  %v2138_v46 = vmul.u32 %v2134_v39, %v2133_v34  ;;  %v2022_v38 = vadd.s32 %v4579_v1, %v4577_v13 }
 0x3be   : > { %v2033_v37 = vsel %vm2031_vm10, %v2032_v18, %v2030_v26  ;;  %v2160_v3 = vmul.u32 %v2156_v23, %v2133_v34  ;;  %v2162_v50 = vshll.u32 %v2159_v48, 16  ;;  %v2099_v30 = vshrl.u32 %v3241_v22, %v4581_v62 }
 0x3bf   : > { %v2034_v36 = vclz %v2033_v37  ;;  %v2136_v4 = vmul.u32 %v2134_v39, %v2132_v44  ;;  %v2140_v56 = vshll.u32 %v2137_v2, 16  ;;  %v2120_v17 = vsel %vm2118_vm13, %v2108_v21, 2102212464 }
 0x3c0   : > { %v2139_v63 = vmul.u32 %v2135_v16, %v2133_v34  ;;  %v2158_v35 = vmul.u32 %v2156_v23, %v2132_v44  ;;  %v2161_v55 = vmul.u32 %v2157_v54, %v2133_v34  ;;  %v2142_v12 = vshll.u32 %v2138_v46, 16 }
 0x3c1   : > { %v3092_v28 = vadd.s32 4294967294, %v2034_v36  ;;  %vm2144_vm11 = vc.u32 %v2136_v4, %v2140_v56  ;;  %v2146_v31 = vadd.s32 %v2140_v56, %v2136_v4  ;;  %v2164_v1 = vshll.u32 %v2160_v3, 16 }
 0x3c2   : > { %v2145_v13 = vsel %vm2144_vm11, 1, %v3236_v9  ;;  %vm2166_vm14 = vc.u32 %v2158_v35, %v2162_v50  ;;  %v2168_v45 = vadd.s32 %v2162_v50, %v2158_v35  ;;  %v2141_v23 = vshrl.u32 %v2137_v2, 16 }
 0x3c3   : > { %vm3093_vm15 = vcmp.lt.s32.totalorder %v3092_v28, 0  ;;  %v2147_v18 = vadd.s32 %v2145_v13, %v2139_v63  ;;  %vm2148_vm0 = vc.u32 %v2146_v31, %v2142_v12  ;;  %v2167_v62 = vsel %vm2166_vm14, 1, %v3236_v9 }
 0x3c4   : > { %v2037_v39 = vsel %vm3093_vm15, 0, %v3092_v28  ;;  %v2149_v21 = vsel %vm2148_vm0, 1, %v3236_v9  ;;  %v2169_v16 = vadd.s32 %v2167_v62, %v2161_v55  ;;  %vm2170_vm2 = vc.u32 %v2168_v45, %v2164_v1 }
 0x3c5   : > { %v2038_v44 = vsub.s32 32, %v2037_v39  ;;  %v2042_v54 = vsub.s32 4294967266, %v2037_v39  ;;  %v2151_v34 = vadd.s32 %v2149_v21, %v2147_v18  ;;  %v2039_v37 = vshll.u32 %v2030_v26, %v2037_v39 }
 0x3c6   : > { %v2143_v36 = vshrl.u32 %v2138_v46, 16  ;;  %v2163_v4 = vshrl.u32 %v2159_v48, 16  ;;  %v2171_v56 = vsel %vm2170_vm2, 1, %v3236_v9  ;;  %v1886_v31 = vor.u32 %v1885_v43, %v1884_v5 }
 0x3c7   : > { %v2040_v50 = vshrl.u32 %v2022_v38, %v2038_v44  ;;  %v2043_v35 = vadd.s32 127, %v2042_v54  ;;  %v2152_v63 = vadd.s32 %v2151_v34, %v2141_v23  ;;  %v2173_v12 = vadd.s32 %v2171_v56, %v2169_v16 }
 0x3c8   : > { %v2119_v28 = vsel %vm2115_vm7, %v2099_v30, %v4601_v27  ;;  %v2121_v55 = vsel %vm2117_vm8, %v4603_v57, %v2120_v17  ;;  %v2165_v2 = vshrl.u32 %v2160_v3, 16  ;;  %v1738_v18 = vcvt.s32.f32 %v4645_v42 }
 0x3c9   : > { %v2041_v13 = vor.u32 %v2040_v50, %v2039_v37  ;;  %v2044_v26 = vshll.u32 %v2043_v35, 23  ;;  %v2153_v46 = vadd.s32 %v2152_v63, %v2143_v36  ;;  %v2174_v48 = vadd.s32 %v2173_v12, %v2163_v4 }
 0x3ca   : > { %v1891_v38 = vand.u32 2147483647, %v4653_v15  ;;  %v2172_v62 = vadd.s32 %v2168_v45, %v2164_v1  ;;  %v2122_v5 = vsel %vm2116_vm9, %v2119_v28, %v2121_v55  ;;  %v1739_v27 = vmul.f32 %v1738_v18, %v1736_v52 }
 0x3cb   : > { %v2045_v39 = vor.u32 4788187, %v2044_v26  ;;  %v2175_v43 = vadd.s32 %v2174_v48, %v2165_v2  ;;  %v1893_v30 = vcvt.s32.f32 %v1886_v31  ;;  %v2048_v57 = vcvt.s32.f32 %v2041_v13 }
 0x3cc   : > { %vm2178_vm3 = vc.u32 %v2153_v46, %v2172_v62  ;;  %v2176_v16 = vmul.u32 %v4620_v6, %v2122_v5  ;;  %v1740_v42 = vxor.u32 2147483648, %v1739_v27  ;;  %vm1620_vm4 = vcmp.lt.s32.totalorder %v4313_v25, 0 }
 0x3cd   : > { %v2046_v21 = vand.u32 2147483647, %v2045_v39  ;;  %v2179_v3 = vadd.s32 1, %v2175_v43  ;;  %v1894_v17 = vmul.f32 %v1893_v30, %v1891_v38  ;;  %vm1930_vm6 = vcmp.lt.s32.totalorder %v4450_v40, 0 }
 0x3ce   : > { %v1741_v29 = vsel %vm1620_vm4, %v1740_v42, %v1739_v27  ;;  %vm1775_vm5 = vcmp.lt.s32.totalorder %v4319_v20, 0  ;;  %vm4687_vm7 = vcmp.le.f32.partialorder %v1618_v10, 0.7853982  ;;  %vm4701_vm13 = vcmp.le.f32.partialorder %v1928_v61, 0.7853982 }
 0x3cf   : > { %v2049_v44 = vmul.f32 %v2048_v57, %v2046_v21  ;;  %v2180_v54 = vsel %vm2178_vm3, %v2179_v3, %v2175_v43  ;;  %v1895_v1 = vxor.u32 2147483648, %v1894_v17  ;;  %v4697_v4 = vsel %vm4687_vm7, %v4313_v25, %v1741_v29 }
 0x3d0   : > { %v2181_v23 = vadd.s32 %v2180_v54, %v2176_v16  ;;  %vm4707_vm8 = vcmp.le.f32.partialorder %v1773_v0, 0.7853982  ;;  %v4723_v61 = vmul.f32 %v4697_v4, %v4697_v4  ;;  %v2177_v5 = vadd.s32 %v2172_v62, %v2153_v46 }
 0x3d1   : > { %v2050_v15 = vxor.u32 2147483648, %v2049_v44  ;;  %v1896_v37 = vsel %vm1775_vm5, %v1895_v1, %v1894_v17  ;;  %vm2085_vm11 = vcmp.lt.s32.totalorder %v4511_v8, 0  ;;  %vm4757_vm14 = vcmp.le.f32.partialorder %v2083_v32, 0.7853982 }
 0x3d2   : > { %v2182_v45 = vadd.s32 536870912, %v2181_v23  ;;  %v4719_v63 = vsel %vm4707_vm8, %v4319_v20, %v1896_v37  ;;  %v1754_v2 = vmul.f32 -0.00019511016, %v4723_v61  ;;  %v1747_v46 = vmul.f32 -0.001358992, %v4723_v61 }
 0x3d3   : > { %v2051_v6 = vsel %vm1930_vm6, %v2050_v15, %v2049_v44  ;;  %v4731_v31 = vmul.f32 %v4719_v63, %v4719_v63  ;;  %vm2071_vm15 = vweird.f32 %v4450_v40 }
 0x3d4   : > { %v4680_v52 = vshrl.u32 %v2182_v45, 30  ;;  %v4714_v50 = vsel %vm4701_vm13, %v4450_v40, %v2051_v6  ;;  %v1755_v18 = vadd.f32 0.008332121, %v1754_v2 }
 0x3d5   : > { %v4727_v12 = vmul.f32 %v4714_v50, %v4714_v50  ;;  %v1909_v48 = vmul.f32 -0.00019511016, %v4731_v31 }
 0x3d6   : > { %v2184_v36 = vshll.u32 %v4680_v52, 30  ;;  %v1756_v16 = vmul.f32 %v1755_v18, %v4723_v61 }
 0x3d7   : > { %v2064_v13 = vmul.f32 -0.00019511016, %v4727_v12  ;;  %v1910_v30 = vadd.f32 0.008332121, %v1909_v48  ;;  %v2057_v17 = vmul.f32 -0.001358992, %v4727_v12 }
 0x3d8   : > { %v2185_v35 = vsub.s32 %v2181_v23, %v2184_v36  ;;  %v1902_v23 = vmul.f32 -0.001358992, %v4731_v31  ;;  %v1757_v45 = vadd.f32 -0.16666654, %v1756_v16 }
 0x3d9   : > { %v2065_v39 = vadd.f32 0.008332121, %v2064_v13  ;;  %v1911_v15 = vmul.f32 %v1910_v30, %v4731_v31  ;;  %v2058_v1 = vadd.f32 0.041655596, %v2057_v17  ;;  %v1742_v13 = vsub.s32 4, %v4456_v41 }
 0x3da   : > { %vm2186_vm9 = vcmp.lt.s32.totalorder %v2185_v35, 0  ;;  %v2187_v0 = vsub.s32 0, %v2185_v35  ;;  %v1903_v36 = vadd.f32 0.041655596, %v1902_v23  ;;  %v2207_v17 = vsub.s32 4, %v4680_v52 }
 0x3db   : > { %v2066_v44 = vmul.f32 %v2065_v39, %v4727_v12  ;;  %v2059_v2 = vmul.f32 %v2058_v1, %v4727_v12  ;;  %v1758_v39 = vmul.f32 %v1757_v45, %v4723_v61 }
 0x3dc   : > { %v2188_v28 = vsel %vm2186_vm9, %v2187_v0, %v2185_v35  ;;  %v2052_v0 = vsub.s32 4, %v4622_v59  ;;  %v2208_v56 = vsel %vm2085_vm11, %v2207_v17, %v4680_v52 }
 0x3dd   : > { %v2189_v55 = vclz %v2188_v28  ;;  %v2067_v29 = vadd.f32 -0.16666654, %v2066_v44  ;;  %v1748_v28 = vadd.f32 0.041655596, %v1747_v46  ;;  %v1759_v23 = vadd.f32 1.0, %v1758_v39 }
 0x3de   : > { %v2210_v34 = vsel %vm4757_vm14, 0, %v2208_v56 }
 0x3df   : > { %v3095_v26 = vadd.s32 4294967294, %v2189_v55  ;;  %v2068_v48 = vmul.f32 %v2067_v29, %v4727_v12  ;;  %v1760_v10 = vmul.f32 %v1759_v23, %v4697_v4  ;;  %v2227_v39 = vadd.s32 3, %v2210_v34 }
 0x3e1   : > { %vm3096_vm10 = vcmp.lt.s32.totalorder %v3095_v26, 0  ;;  %v2069_v44 = vadd.f32 1.0, %v2068_v48  ;;  %v2228_v17 = vand.u32 3, %v2227_v39 }
 0x3e2   : > { %v2192_v38 = vsel %vm3096_vm10, 0, %v3095_v26  ;;  %v1897_v26 = vsub.s32 4, %v4503_v49 }
 0x3e3   : > { %v2193_v43 = vsub.s32 32, %v2192_v38  ;;  %v2197_v27 = vsub.s32 4294967266, %v2192_v38  ;;  %v2194_v21 = vshll.u32 %v2185_v35, %v2192_v38  ;;  %v1912_v35 = vadd.f32 -0.16666654, %v1911_v15 }
 0x3e4   : > { %v1904_v38 = vmul.f32 %v1903_v36, %v4731_v31  ;;  %vm2230_vm9 = vcmp.eq.s32.totalorder %v2228_v17, 0  ;;  %vm2233_vm10 = vcmp.eq.s32.totalorder %v2228_v17, 2 }
 0x3e5   : > { %v2195_v57 = vshrl.u32 %v2177_v5, %v2193_v43  ;;  %v2198_v3 = vadd.s32 127, %v2197_v27  ;;  %v1913_v5 = vmul.f32 %v1912_v35, %v4731_v31  ;;  %v2053_v43 = vsel %vm1930_vm6, %v2052_v0, %v4622_v59 }
 0x3e6   : > { %v1749_v27 = vmul.f32 %v1748_v28, %v4723_v61  ;;  %v1898_v59 = vsel %vm1775_vm5, %v1897_v26, %v4503_v49  ;;  %v2055_v16 = vsel %vm4701_vm13, 0, %v2053_v43 }
 0x3e7   : > { %v2196_v54 = vor.u32 %v2195_v57, %v2194_v21  ;;  %v2199_v42 = vshll.u32 %v2198_v3, 23  ;;  %v2060_v57 = vadd.f32 -0.4999988, %v2059_v2  ;;  %v1743_v3 = vsel %vm1620_vm4, %v1742_v13, %v4456_v41 }
 0x3e8   : > { %v1914_v15 = vadd.f32 1.0, %v1913_v5  ;;  %v1750_v46 = vadd.f32 -0.4999988, %v1749_v27  ;;  %v1900_v41 = vsel %vm4707_vm8, 0, %v1898_v59  ;;  %v1745_v45 = vsel %vm4687_vm7, 0, %v1743_v3 }
 0x3e9   : > { %v2200_v62 = vor.u32 4788187, %v2199_v42  ;;  %v2203_v37 = vcvt.s32.f32 %v2196_v54  ;;  %v1905_v42 = vadd.f32 -0.4999988, %v1904_v38  ;;  %v2061_v1 = vmul.f32 %v2060_v57, %v4727_v12 }
 0x3ea   : > { %v2072_v29 = vadd.s32 3, %v2055_v16  ;;  %v1915_v0 = vmul.f32 %v1914_v15, %v4719_v63  ;;  %v1917_v28 = vadd.s32 3, %v1900_v41  ;;  %v1751_v12 = vmul.f32 %v1750_v46, %v4723_v61 }
 0x3eb   : > { %v2201_v6 = vand.u32 2147483647, %v2200_v62  ;;  %v1906_v35 = vmul.f32 %v1905_v42, %v4731_v31  ;;  %v2062_v13 = vadd.f32 1.0, %v2061_v1  ;;  %v1762_v52 = vadd.s32 3, %v1745_v45 }
 0x3ec   : > { %v2073_v26 = vand.u32 3, %v2072_v29  ;;  %v1766_v31 = vxor.u32 2147483648, %v1760_v10  ;;  %v1918_v4 = vand.u32 3, %v1917_v28  ;;  %v1752_v63 = vadd.f32 1.0, %v1751_v12 }
 0x3ed   : > { %v2204_v55 = vmul.f32 %v2203_v37, %v2201_v6  ;;  %v2070_v6 = vmul.f32 %v2069_v44, %v4714_v50  ;;  %v1907_v38 = vadd.f32 1.0, %v1906_v35  ;;  %v1921_v5 = vxor.u32 2147483648, %v1915_v0 }
 0x3ee   : > { %v2079_v27 = vxor.u32 2147483648, %v2062_v13  ;;  %vm2074_vm0 = vcmp.lt.s32.totalorder %v2073_v26, 2  ;;  %vm2075_vm2 = vcmp.eq.s32.totalorder %v2073_v26, 0  ;;  %vm2078_vm3 = vcmp.eq.s32.totalorder %v2073_v26, 2 }
 0x3ef   : > { %v2205_v18 = vxor.u32 2147483648, %v2204_v55  ;;  %v2076_v50 = vxor.u32 2147483648, %v2070_v6  ;;  %v1763_v30 = vand.u32 3, %v1762_v52  ;;  %v1924_v59 = vxor.u32 2147483648, %v1907_v38 }
 0x3f0   : > { %vm1919_vm4 = vcmp.lt.s32.totalorder %v1918_v4, 2  ;;  %vm1920_vm6 = vcmp.eq.s32.totalorder %v1918_v4, 0  ;;  %v1769_v16 = vxor.u32 2147483648, %v1752_v63  ;;  %v2080_v23 = vsel %vm2078_vm3, %v2079_v27, %v2070_v6 }
 0x3f1   : > { %v2206_v21 = vsel %vm2085_vm11, %v2205_v18, %v2204_v55  ;;  %v2077_v3 = vsel %vm2075_vm2, %v2062_v13, %v2076_v50  ;;  %v1922_v15 = vsel %vm1920_vm6, %v1907_v38, %v1921_v5  ;;  %vm1923_vm5 = vcmp.eq.s32.totalorder %v1918_v4, 2  ;;  %v3100_v13 = vld [vmem:[%s5354_s3 + $0x58] sm:$0x1] }
 0x3f2   : > { %v2209_v32 = vsel %vm4757_vm14, %v4511_v8, %v2206_v21  ;;  %v2081_v46 = vsel %vm2074_vm0, %v2077_v3, %v2080_v23  ;;  %vm1764_vm7 = vcmp.lt.s32.totalorder %v1763_v30, 2  ;;  %vm1765_vm13 = vcmp.eq.s32.totalorder %v1763_v30, 0 }
 0x3f3   : > { %v2211_v54 = vmul.f32 %v2209_v32, %v2209_v32  ;;  %v1925_v41 = vsel %vm1923_vm5, %v1924_v59, %v1915_v0  ;;  %vm1768_vm8 = vcmp.eq.s32.totalorder %v1763_v30, 2  ;;  %vm2229_vm11 = vcmp.lt.s32.totalorder %v2228_v17, 2 }
 0x3f4   : > { %v1770_v1 = vsel %vm1768_vm8, %v1769_v16, %v1760_v10  ;;  %v2082_v29 = vsel %vm2071_vm15, nan, %v2081_v46  ;;  %vm2226_vm14 = vweird.f32 %v4511_v8  ;;  %vm1916_vm0 = vweird.f32 %v4319_v20 }
 0x3f5   : > { %v2219_v62 = vmul.f32 -0.00019511016, %v2211_v54  ;;  %v2212_v49 = vmul.f32 -0.001358992, %v2211_v54  ;;  %v2240_v0 = vmul.f32 %v2082_v29, %v4269_v58  ;;  %vm1761_vm2 = vweird.f32 %v4313_v25  ;;  %v3097_v25 = vld [vmem:[%s5354_s3 + $0x40] sm:$0xff] }
 0x3f7   : > { %v2220_v37 = vadd.f32 0.008332121, %v2219_v62  ;;  %v2213_v36 = vadd.f32 0.041655596, %v2212_v49  ;;  %v1767_v62 = vsel %vm1765_vm13, %v1752_v63, %v1766_v31  ;;  %v1926_v49 = vsel %vm1919_vm4, %v1922_v15, %v1925_v41 }
 0x3f8   : > { %v1771_v6 = vsel %vm1764_vm7, %v1767_v62, %v1770_v1  ;;  %v2244_v40 = vadd.f32 %v2240_v0, %v4225_v24 }
 0x3f9   : > { %v2221_v55 = vmul.f32 %v2220_v37, %v2211_v54  ;;  %v2214_v2 = vmul.f32 %v2213_v36, %v2211_v54  ;;  %v1927_v36 = vsel %vm1916_vm0, nan, %v1926_v49  ;;  %v1772_v10 = vsel %vm1761_vm2, nan, %v1771_v6 }
 0x3fa   : > { %v2239_v12 = vmul.f32 %v1927_v36, %v4283_v60  ;;  %v2238_v8 = vmul.f32 %v1772_v10, %v4289_v51 }
 0x3fb   : > { %v2222_v48 = vadd.f32 -0.16666654, %v2221_v55  ;;  %v2215_v18 = vadd.f32 -0.4999988, %v2214_v2  ;;  %v3098_v55 = vld [vmem:[%s5354_s3 + $0x48] sm:$0xff]  ;;  %v3099_v2 = vld [vmem:[%s5354_s3 + $0x50] sm:$0xff] }
 0x3fc   : > { %v2243_v20 = vadd.f32 %v2239_v12, %v4211_v19  ;;  %v2242_v34 = vadd.f32 %v2238_v8, %v4280_v47 }
 0x3fd   : > { %v2223_v61 = vmul.f32 %v2222_v48, %v2211_v54  ;;  %v2216_v43 = vmul.f32 %v2215_v18, %v2211_v54 }
 0x3ff   : > { %v2224_v21 = vadd.f32 1.0, %v2223_v61  ;;  %v2217_v57 = vadd.f32 1.0, %v2216_v43 }
 0x401   : > { %v2225_v44 = vmul.f32 %v2224_v21, %v2209_v32  ;;  %v2234_v42 = vxor.u32 2147483648, %v2217_v57 }
 0x403   : > { %v2231_v54 = vxor.u32 2147483648, %v2225_v44  ;;  %v2235_v32 = vsel %vm2233_vm10, %v2234_v42, %v2225_v44 }
 0x405   : > { %v2232_v45 = vsel %vm2230_vm9, %v2217_v57, %v2231_v54 }
 0x406   : > { %v2236_v56 = vsel %vm2229_vm11, %v2232_v45, %v2235_v32 }
 0x407   : > { %v2237_v37 = vsel %vm2226_vm14, nan, %v2236_v56 }
 0x408   : > { %v2241_v35 = vmul.f32 0.0, %v2237_v37 }
 0x40a   : > { %v2245_v28 = vadd.f32 1.0, %v2241_v35 }
 0x40c   : > { %3101 = vmatpush.msk.msra.mxu3 %vm908_vm1, %v2245_v28 }
 0x40e   : > { %2279 = vmatpush.msra.mxu3 %v2244_v40 }
 0x410   : > { %2280 = vmatpush.msra.mxu3 %v2243_v20 }
 0x412   : > { %2281 = vmatpush.msra.mxu3 %v2242_v34 }
 0x413   : > { %3102 = vmatmul.msk.f32.vlgmr.msra.gmra.mxu3 %vm895_vm12, %v3097_v25 }
 0x41b   : > { %3103 = vmatmul.msk.f32.gmra.mxu3 %vm895_vm12, %v3098_v55 }
 0x423   : > { %3104 = vmatmul.msk.f32.gmra.mxu3 %vm895_vm12, %v3099_v2 }
 0x42b   : > { %3105 = vmatmul.msk.f32.gmra.mxu3 %vm895_vm12, %v3100_v13 }
 0x496   : > { %v4822_v52 = vpop.f32.mrf.mxu3 }
 0x497   : > { %v2295_v26 = vand.u32 2147483647, %v4822_v52  ;;  %v2298_v50 = vand.u32 2139095040, %v4822_v52 }
 0x499   : > { %v2299_v48 = vshrl.u32 %v2298_v50, 23  ;;  %v2302_v38 = vand.u32 8388607, %v2295_v26 }
 0x49b   : > { %v3106_v18 = vadd.s32 4294967169, %v2299_v48  ;;  %v2303_v4 = vor.u32 8388608, %v2302_v38 }
 0x49d   : > { %v2305_v31 = vadd.s32 1, %v3106_v18  ;;  %v4831_v27 = vshll.u32 %v2303_v4, 8 }
 0x49e   : > { %v4828_v39 = vpop.f32.mrf.mxu3 }
 0x49f   : > { %vm2306_vm15 = vcmp.gt.s32.totalorder %v2305_v31, 0  ;;  %v2453_v5 = vand.u32 2139095040, %v4828_v39  ;;  %v2450_v59 = vand.u32 2147483647, %v4828_v39  ;;  %v2344_v6 = vand.u32 65535, %v4831_v27 }
 0x4a0   : > { %v2307_v63 = vsel %vm2306_vm15, %v2305_v31, 0  ;;  %v2345_v8 = vshrl.u32 %v4831_v27, 16 }
 0x4a1   : > { %v2309_v61 = vand.u32 31, %v2307_v63  ;;  %v2454_v30 = vshrl.u32 %v2453_v5, 23  ;;  %v4833_v21 = vshrl.u32 %v2307_v63, 5  ;;  %v4872_v28 = vand.u32 8388607, %v2450_v59 }
 0x4a3   : > { %v2310_v43 = vsub.s32 32, %v2309_v61  ;;  %v2312_v57 = vshll.u32 %v3241_v22, %v2309_v61  ;;  %v2315_v3 = vshll.u32 %v5380_v7, %v2309_v61  ;;  %v2318_v44 = vshll.u32 %v5370_v11, %v2309_v61 }
 0x4a4   : > { %v2321_v23 = vshll.u32 %v3239_v14, %v2309_v61  ;;  %v2324_v46 = vshll.u32 %v5381_v53, %v2309_v61  ;;  %v3109_v1 = vadd.s32 4294967169, %v2454_v30  ;;  %vm2327_vm3 = vcmp.lt.s32.totalorder %v4833_v21, 1 }
 0x4a5   : > { %v2313_v17 = vshrl.u32 %v5380_v7, %v2310_v43  ;;  %v2316_v16 = vshrl.u32 %v5370_v11, %v2310_v43  ;;  %v2319_v42 = vshrl.u32 %v3239_v14, %v2310_v43  ;;  %v2322_v15 = vshrl.u32 %v5381_v53, %v2310_v43 }
 0x4a6   : > { %v2325_v54 = vshrl.u32 %v5382_v33, %v2310_v43  ;;  %vm2330_vm4 = vcmp.lt.s32.totalorder %v4833_v21, 4  ;;  %vm2329_vm6 = vcmp.lt.s32.totalorder %v4833_v21, 3  ;;  %v2460_v35 = vadd.s32 1, %v3109_v1 }
 0x4a7   : > { %v4846_v41 = vor.u32 %v2313_v17, %v2312_v57  ;;  %v4848_v62 = vor.u32 %v2316_v16, %v2315_v3  ;;  %v2320_v49 = vor.u32 %v2319_v42, %v2318_v44  ;;  %v2323_v45 = vor.u32 %v2322_v15, %v2321_v23 }
 0x4a8   : > { %v2326_v32 = vor.u32 %v2325_v54, %v2324_v46  ;;  %vm2328_vm5 = vcmp.lt.s32.totalorder %v4833_v21, 2  ;;  %vm2461_vm7 = vcmp.gt.s32.totalorder %v2460_v35, 0  ;;  %v2311_v2 = vshrl.u32 %v3241_v22, %v2310_v43 }
 0x4a9   : > { %v2335_v29 = vsel %vm2327_vm3, %v4846_v41, %v4848_v62  ;;  %v2339_v56 = vsel %vm2327_vm3, %v4848_v62, %v2320_v49  ;;  %v2336_v37 = vsel %vm2330_vm4, %v2323_v45, 920167782  ;;  %v2332_v13 = vsel %vm2330_vm4, %v2320_v49, 2102212464 }
 0x4aa   : > { %v2340_v36 = vsel %vm2330_vm4, %v2326_v32, 1326507024  ;;  %v2337_v0 = vsel %vm2329_vm6, %v2320_v49, %v2336_v37  ;;  %v2458_v18 = vor.u32 8388608, %v4872_v28  ;;  %v2462_v63 = vsel %vm2461_vm7, %v2460_v35, 0 }
 0x4ab   : > { %v2341_v10 = vsel %vm2329_vm6, %v2323_v45, %v2340_v36  ;;  %v2338_v12 = vsel %vm2328_vm5, %v2335_v29, %v2337_v0  ;;  %v2464_v23 = vand.u32 31, %v2462_v63  ;;  %v4889_v36 = vshrl.u32 %v2462_v63, 5 }
 0x4ac   : > { %v2342_v40 = vsel %vm2328_vm5, %v2339_v56, %v2341_v10  ;;  %v2368_v25 = vand.u32 65535, %v2338_v12  ;;  %v2369_v55 = vshrl.u32 %v2338_v12, 16 }
 0x4ad   : > { %v2346_v20 = vand.u32 65535, %v2342_v40  ;;  %v2347_v34 = vshrl.u32 %v2342_v40, 16  ;;  %v4885_v45 = vsub.s32 32, %v2464_v23  ;;  %v2467_v35 = vshll.u32 %v3241_v22, %v2464_v23 }
 0x4ae   : > { %v2371_v31 = vmul.u32 %v2369_v55, %v2344_v6  ;;  %v2372_v4 = vmul.u32 %v2368_v25, %v2345_v8  ;;  %v2370_v30 = vmul.u32 %v2368_v25, %v2344_v6  ;;  %v2373_v57 = vmul.u32 %v2369_v55, %v2345_v8 }
 0x4af   : > { %v2349_v50 = vmul.u32 %v2347_v34, %v2344_v6  ;;  %v2350_v48 = vmul.u32 %v2346_v20, %v2345_v8  ;;  %v2348_v38 = vmul.u32 %v2346_v20, %v2344_v6  ;;  %v2351_v5 = vmul.u32 %v2347_v34, %v2345_v8 }
 0x4b0   : > { %v2374_v44 = vshll.u32 %v2371_v31, 16  ;;  %v2375_v42 = vshrl.u32 %v2371_v31, 16  ;;  %v2376_v46 = vshll.u32 %v2372_v4, 16  ;;  %v2377_v29 = vshrl.u32 %v2372_v4, 16 }
 0x4b1   : > { %v2352_v61 = vshll.u32 %v2349_v50, 16  ;;  %v2353_v3 = vshrl.u32 %v2349_v50, 16  ;;  %v2354_v17 = vshll.u32 %v2350_v48, 16  ;;  %v2355_v16 = vshrl.u32 %v2350_v48, 16 }
 0x4b2   : > { %vm2378_vm8 = vc.u32 %v2370_v30, %v2374_v44  ;;  %v2380_v54 = vadd.s32 %v2374_v44, %v2370_v30  ;;  %v2468_v10 = vshrl.u32 %v5380_v7, %v4885_v45  ;;  %v2470_v28 = vshll.u32 %v5380_v7, %v2464_v23 }
 0x4b3   : > { %vm2356_vm13 = vc.u32 %v2348_v38, %v2352_v61  ;;  %v2358_v43 = vadd.s32 %v2352_v61, %v2348_v38  ;;  %v2379_v1 = vsel %vm2378_vm8, 1, %v3236_v9  ;;  %v2471_v12 = vshrl.u32 %v5370_v11, %v4885_v45 }
 0x4b4   : > { %v2357_v15 = vsel %vm2356_vm13, 1, %v3236_v9  ;;  %v2381_v56 = vadd.s32 %v2379_v1, %v2373_v57  ;;  %vm2382_vm10 = vc.u32 %v2380_v54, %v2376_v46  ;;  %v2473_v8 = vshll.u32 %v5370_v11, %v2464_v23 }
 0x4b5   : > { %v2359_v49 = vadd.s32 %v2357_v15, %v2351_v5  ;;  %vm2360_vm9 = vc.u32 %v2358_v43, %v2354_v17  ;;  %v2383_v37 = vsel %vm2382_vm10, 1, %v3236_v9  ;;  %v2474_v20 = vshrl.u32 %v3239_v14, %v4885_v45 }
 0x4b6   : > { %v2361_v32 = vsel %vm2360_vm9, 1, %v3236_v9  ;;  %v2385_v0 = vadd.s32 %v2383_v37, %v2381_v56  ;;  %v2476_v34 = vshll.u32 %v3239_v14, %v2464_v23  ;;  %v4901_v55 = vor.u32 %v2468_v10, %v2467_v35  ;;  %v4959_v35 = vpop.f32.mrf.mxu3 }
 0x4b7   : > { %v2363_v6 = vadd.s32 %v2361_v32, %v2359_v49  ;;  %v4903_v50 = vor.u32 %v2471_v12, %v2470_v28  ;;  %v2477_v48 = vshrl.u32 %v5381_v53, %v4885_v45  ;;  %v4909_v31 = vor.u32 %v2474_v20, %v2473_v8 }
 0x4b8   : > { %v2386_v25 = vadd.s32 %v2385_v0, %v2375_v42  ;;  %v2479_v4 = vshll.u32 %v5381_v53, %v2464_v23  ;;  %v2480_v63 = vshrl.u32 %v5382_v33, %v4885_v45  ;;  %v2331_v5 = vsel %vm2327_vm3, %v2311_v2, %v4846_v41 }
 0x4b9   : > { %v2364_v40 = vadd.s32 %v2363_v6, %v2353_v3  ;;  %v4917_v61 = vadd.s32 %v2380_v54, %v2376_v46  ;;  %v2478_v57 = vor.u32 %v2477_v48, %v2476_v34  ;;  %v2333_v3 = vsel %vm2329_vm6, %v4848_v62, %v2332_v13 }
 0x4ba   : > { %v2387_v30 = vadd.s32 %v2386_v25, %v2377_v29  ;;  %v2481_v17 = vor.u32 %v2480_v63, %v2479_v4  ;;  %vm2482_vm11 = vcmp.lt.s32.totalorder %v4889_v36, 1  ;;  %vm2485_vm0 = vcmp.lt.s32.totalorder %v4889_v36, 4 }
 0x4bb   : > { %v4907_v38 = vadd.s32 %v2364_v40, %v2355_v16  ;;  %v4923_v16 = vshll.u32 %v2458_v18, 8  ;;  %v2490_v41 = vsel %vm2482_vm11, %v4901_v55, %v4903_v50  ;;  %vm2484_vm2 = vcmp.lt.s32.totalorder %v4889_v36, 3 }
 0x4bc   : > { %v2391_v44 = vadd.s32 1, %v2387_v30  ;;  %v2491_v62 = vsel %vm2485_vm0, %v2478_v57, 920167782  ;;  %v2494_v2 = vsel %vm2482_vm11, %v4903_v50, %v4909_v31  ;;  %v2495_v13 = vsel %vm2485_vm0, %v2481_v17, 1326507024 }
 0x4bd   : > { %vm2390_vm14 = vc.u32 %v4907_v38, %v4917_v61  ;;  %v2334_v18 = vsel %vm2328_vm5, %v2331_v5, %v2333_v3  ;;  %vm2483_vm15 = vcmp.lt.s32.totalorder %v4889_v36, 2  ;;  %v2492_v43 = vsel %vm2484_vm2, %v4909_v31, %v2491_v62 }
 0x4be   : > { %v2496_v42 = vsel %vm2484_vm2, %v2478_v57, %v2495_v13  ;;  %v2493_v23 = vsel %vm2483_vm15, %v2490_v41, %v2492_v43  ;;  %v2499_v46 = vand.u32 65535, %v4923_v16  ;;  %v2500_v21 = vshrl.u32 %v4923_v16, 16 }
 0x4bf   : > { %v2497_v15 = vsel %vm2483_vm15, %v2494_v2, %v2496_v42  ;;  %v2392_v54 = vsel %vm2390_vm14, %v2391_v44, %v2387_v30  ;;  %v2524_v32 = vshrl.u32 %v2493_v23, 16  ;;  %v2388_v29 = vmul.u32 %v4831_v27, %v2334_v18 }
 0x4c0   : > { %v2501_v49 = vand.u32 65535, %v2497_v15  ;;  %v2502_v1 = vshrl.u32 %v2497_v15, 16  ;;  %v2523_v56 = vand.u32 65535, %v2493_v23  ;;  %v2608_v34 = vand.u32 2139095040, %v4959_v35 }
 0x4c1   : > { %v2393_v0 = vadd.s32 %v2392_v54, %v2388_v29  ;;  %v2526_v10 = vmul.u32 %v2524_v32, %v2499_v46  ;;  %v2528_v3 = vmul.u32 %v2524_v32, %v2500_v21  ;;  %v2466_v43 = vshrl.u32 %v3241_v22, %v4885_v45 }
 0x4c2   : > { %v2504_v6 = vmul.u32 %v2502_v1, %v2499_v46  ;;  %v2505_v37 = vmul.u32 %v2501_v49, %v2500_v21  ;;  %v2503_v28 = vmul.u32 %v2501_v49, %v2499_v46  ;;  %v2506_v40 = vmul.u32 %v2502_v1, %v2500_v21 }
 0x4c3   : > { %v2527_v8 = vmul.u32 %v2523_v56, %v2500_v21  ;;  %v2529_v20 = vshll.u32 %v2526_v10, 16  ;;  %v2525_v4 = vmul.u32 %v2523_v56, %v2499_v46  ;;  %v2394_v63 = vadd.s32 536870912, %v2393_v0 }
 0x4c4   : > { %v2507_v12 = vshll.u32 %v2504_v6, 16  ;;  %v2509_v25 = vshll.u32 %v2505_v37, 16  ;;  %v2508_v30 = vshrl.u32 %v2504_v6, 16  ;;  %v2609_v2 = vshrl.u32 %v2608_v34, 23 }
 0x4c5   : > { %vm2533_vm6 = vc.u32 %v2525_v4, %v2529_v20  ;;  %v2531_v17 = vshll.u32 %v2527_v8, 16  ;;  %v2535_v62 = vadd.s32 %v2529_v20, %v2525_v4  ;;  %v4965_v13 = vshrl.u32 %v2394_v63, 30 }
 0x4c6   : > { %vm2511_vm3 = vc.u32 %v2503_v28, %v2507_v12  ;;  %v2513_v48 = vadd.s32 %v2507_v12, %v2503_v28  ;;  %v2534_v41 = vsel %vm2533_vm6, 1, %v3236_v9  ;;  %v2487_v42 = vsel %vm2485_vm0, %v4909_v31, 2102212464 }
 0x4c7   : > { %v2512_v27 = vsel %vm2511_vm3, 1, %v3236_v9  ;;  %v2536_v18 = vadd.s32 %v2534_v41, %v2528_v3  ;;  %vm2537_vm5 = vc.u32 %v2535_v62, %v2531_v17  ;;  %v2510_v15 = vshrl.u32 %v2505_v37, 16 }
 0x4c8   : > { %v2514_v5 = vadd.s32 %v2512_v27, %v2506_v40  ;;  %vm2515_vm4 = vc.u32 %v2513_v48, %v2509_v25  ;;  %v2538_v46 = vsel %vm2537_vm5, 1, %v3236_v9  ;;  %v3112_v21 = vadd.s32 4294967169, %v2609_v2 }
 0x4c9   : > { %v2516_v57 = vsel %vm2515_vm4, 1, %v3236_v9  ;;  %v2486_v54 = vsel %vm2482_vm11, %v2466_v43, %v4901_v55  ;;  %v2530_v49 = vshrl.u32 %v2526_v10, 16  ;;  %v2540_v1 = vadd.s32 %v2538_v46, %v2536_v18 }
 0x4ca   : > { %v2518_v44 = vadd.s32 %v2516_v57, %v2514_v5  ;;  %v2396_v32 = vshll.u32 %v4965_v13, 30  ;;  %v2488_v45 = vsel %vm2484_vm2, %v4903_v50, %v2487_v42  ;;  %v2615_v31 = vadd.s32 1, %v3112_v21  ;;  %v5020_v42 = vpop.f32.mrf.mxu3 }
 0x4cb   : > { %v2532_v56 = vshrl.u32 %v2527_v8, 16  ;;  %v2541_v6 = vadd.s32 %v2540_v1, %v2530_v49  ;;  %v2605_v37 = vand.u32 2147483647, %v4959_v35  ;;  %v4983_v28 = vadd.s32 %v2535_v62, %v2531_v17 }
 0x4cc   : > { %v2519_v23 = vadd.s32 %v2518_v44, %v2508_v30  ;;  %vm2616_vm7 = vcmp.gt.s32.totalorder %v2615_v31, 0  ;;  %v2489_v55 = vsel %vm2483_vm15, %v2486_v54, %v2488_v45  ;;  %v4987_v12 = vsub.s32 %v2393_v0, %v2396_v32 }
 0x4cd   : > { %v2542_v10 = vadd.s32 %v2541_v6, %v2532_v56  ;;  %v2617_v50 = vsel %vm2616_vm7, %v2615_v31, 0  ;;  %v2612_v8 = vand.u32 8388607, %v2605_v37  ;;  %v2543_v20 = vmul.u32 %v4923_v16, %v2489_v55 }
 0x4ce   : > { %v4980_v29 = vadd.s32 %v2519_v23, %v2510_v15  ;;  %v2619_v34 = vand.u32 31, %v2617_v50  ;;  %vm2398_vm8 = vcmp.lt.s32.totalorder %v4987_v12, 0  ;;  %v2399_v0 = vsub.s32 0, %v4987_v12 }
 0x4cf   : > { %v2546_v40 = vadd.s32 1, %v2542_v10  ;;  %v2613_v4 = vor.u32 8388608, %v2612_v8  ;;  %v4998_v63 = vshrl.u32 %v2617_v50, 5  ;;  %v2763_v32 = vand.u32 2139095040, %v5020_v42 }
 0x4d0   : > { %vm2545_vm13 = vc.u32 %v4980_v29, %v4983_v28  ;;  %v4995_v36 = vsub.s32 32, %v2619_v34  ;;  %v2622_v27 = vshll.u32 %v3241_v22, %v2619_v34  ;;  %v2625_v16 = vshll.u32 %v5380_v7, %v2619_v34 }
 0x4d1   : > { %v2547_v25 = vsel %vm2545_vm13, %v2546_v40, %v2542_v10  ;;  %v2628_v3 = vshll.u32 %v5370_v11, %v2619_v34  ;;  %v2631_v44 = vshll.u32 %v3239_v14, %v2619_v34  ;;  %v2634_v46 = vshll.u32 %v5381_v53, %v2619_v34 }
 0x4d2   : > { %v2548_v48 = vadd.s32 %v2547_v25, %v2543_v20  ;;  %v2623_v30 = vshrl.u32 %v5380_v7, %v4995_v36  ;;  %v2626_v57 = vshrl.u32 %v5370_v11, %v4995_v36  ;;  %v2629_v17 = vshrl.u32 %v3239_v14, %v4995_v36 }
 0x4d3   : > { %v2632_v41 = vshrl.u32 %v5381_v53, %v4995_v36  ;;  %v2635_v43 = vshrl.u32 %v5382_v33, %v4995_v36  ;;  %v2400_v21 = vsel %vm2398_vm8, %v2399_v0, %v4987_v12  ;;  %v5027_v49 = vshll.u32 %v2613_v4, 8 }
 0x4d4   : > { %v2549_v5 = vadd.s32 536870912, %v2548_v48  ;;  %v5014_v2 = vor.u32 %v2623_v30, %v2622_v27  ;;  %v5016_v18 = vor.u32 %v2626_v57, %v2625_v16  ;;  %v2630_v23 = vor.u32 %v2629_v17, %v2628_v3 }
 0x4d5   : > { %v2633_v15 = vor.u32 %v2632_v41, %v2631_v44  ;;  %v2636_v1 = vor.u32 %v2635_v43, %v2634_v46  ;;  %vm2637_vm9 = vcmp.lt.s32.totalorder %v4998_v63, 1  ;;  %vm2640_vm10 = vcmp.lt.s32.totalorder %v4998_v63, 4 }
 0x4d6   : > { %v5012_v62 = vshrl.u32 %v2549_v5, 30  ;;  %vm2639_vm11 = vcmp.lt.s32.totalorder %v4998_v63, 3  ;;  %v2645_v31 = vsel %vm2637_vm9, %v5014_v2, %v5016_v18  ;;  %v2401_v55 = vclz %v2400_v21 }
 0x4d7   : > { %v2646_v56 = vsel %vm2640_vm10, %v2633_v15, 920167782  ;;  %vm2638_vm0 = vcmp.lt.s32.totalorder %v4998_v63, 2  ;;  %v2649_v40 = vsel %vm2637_vm9, %v5016_v18, %v2630_v23  ;;  %v2764_v8 = vshrl.u32 %v2763_v32, 23 }
 0x4d8   : > { %v2551_v54 = vshll.u32 %v5012_v62, 30  ;;  %v2647_v6 = vsel %vm2639_vm11, %v2630_v23, %v2646_v56  ;;  %v2650_v20 = vsel %vm2640_vm10, %v2636_v1, 1326507024  ;;  %v2654_v34 = vand.u32 65535, %v5027_v49 }
 0x4d9   : > { %v2648_v50 = vsel %vm2638_vm0, %v2645_v31, %v2647_v6  ;;  %v2651_v0 = vsel %vm2639_vm11, %v2633_v15, %v2650_v20  ;;  %v3107_v27 = vadd.s32 4294967294, %v2401_v55  ;;  %v2655_v16 = vshrl.u32 %v5027_v49, 16 }
 0x4da   : > { %v5032_v45 = vsub.s32 %v2548_v48, %v2551_v54  ;;  %v2679_v25 = vshrl.u32 %v2648_v50, 16  ;;  %v2678_v4 = vand.u32 65535, %v2648_v50  ;;  %v2652_v5 = vsel %vm2638_vm0, %v2649_v40, %v2651_v0 }
 0x4db   : > { %v2656_v57 = vand.u32 65535, %v2652_v5  ;;  %v2657_v3 = vshrl.u32 %v2652_v5, 16  ;;  %v3115_v17 = vadd.s32 4294967169, %v2764_v8  ;;  %v2760_v54 = vand.u32 2147483647, %v5020_v42 }
 0x4dc   : > { %vm2553_vm14 = vcmp.lt.s32.totalorder %v5032_v45, 0  ;;  %v2554_v10 = vsub.s32 0, %v5032_v45  ;;  %v2681_v30 = vmul.u32 %v2679_v25, %v2654_v34  ;;  %v2682_v43 = vmul.u32 %v2678_v4, %v2655_v16 }
 0x4dd   : > { %v2659_v41 = vmul.u32 %v2657_v3, %v2654_v34  ;;  %v2660_v21 = vmul.u32 %v2656_v57, %v2655_v16  ;;  %vm3108_vm2 = vcmp.lt.s32.totalorder %v3107_v27, 0  ;;  %v2642_v15 = vsel %vm2640_vm10, %v2630_v23, 2102212464 }
 0x4de   : > { %v2555_v48 = vsel %vm2553_vm14, %v2554_v10, %v5032_v45  ;;  %v2684_v46 = vshll.u32 %v2681_v30, 16  ;;  %v2680_v1 = vmul.u32 %v2678_v4, %v2654_v34  ;;  %v2770_v32 = vadd.s32 1, %v3115_v17 }
 0x4df   : > { %v2556_v44 = vclz %v2555_v48  ;;  %v2658_v56 = vmul.u32 %v2656_v57, %v2654_v34  ;;  %v2662_v6 = vshll.u32 %v2659_v41, 16  ;;  %v2683_v55 = vmul.u32 %v2679_v25, %v2655_v16 }
 0x4e0   : > { %v2661_v10 = vmul.u32 %v2657_v3, %v2655_v16  ;;  %v2664_v50 = vshll.u32 %v2660_v21, 16  ;;  %v2686_v40 = vshll.u32 %v2682_v43, 16  ;;  %vm2688_vm15 = vc.u32 %v2680_v1, %v2684_v46 }
 0x4e1   : > { %v3110_v31 = vadd.s32 4294967294, %v2556_v44  ;;  %vm2666_vm3 = vc.u32 %v2658_v56, %v2662_v6  ;;  %v2668_v8 = vadd.s32 %v2662_v6, %v2658_v56  ;;  %v2689_v20 = vsel %vm2688_vm15, 1, %v3236_v9 }
 0x4e2   : > { %v2690_v48 = vadd.s32 %v2684_v46, %v2680_v1  ;;  %v5065_v0 = vsel %vm3108_vm2, 0, %v3107_v27  ;;  %v2621_v23 = vshrl.u32 %v3241_v22, %v4995_v36  ;;  %v2667_v4 = vsel %vm2666_vm3, 1, %v3236_v9 }
 0x4e3   : > { %v2767_v34 = vand.u32 8388607, %v2760_v54  ;;  %v2669_v25 = vadd.s32 %v2667_v4, %v2661_v10  ;;  %vm2670_vm4 = vc.u32 %v2668_v8, %v2664_v50  ;;  %v2691_v5 = vadd.s32 %v2689_v20, %v2683_v55 }
 0x4e4   : > { %vm2692_vm6 = vc.u32 %v2690_v48, %v2686_v40  ;;  %vm3111_vm5 = vcmp.lt.s32.totalorder %v3110_v31, 0  ;;  %v2641_v16 = vsel %vm2637_vm9, %v2621_v23, %v5014_v2  ;;  %v2643_v27 = vsel %vm2639_vm11, %v5016_v18, %v2642_v15 }
 0x4e5   : > { %v2671_v36 = vsel %vm2670_vm4, 1, %v3236_v9  ;;  %v2663_v57 = vshrl.u32 %v2659_v41, 16  ;;  %v2693_v17 = vsel %vm2692_vm6, 1, %v3236_v9  ;;  %vm2771_vm7 = vcmp.gt.s32.totalorder %v2770_v32, 0 }
 0x4e6   : > { %v2673_v3 = vadd.s32 %v2671_v36, %v2669_v25  ;;  %v2409_v44 = vsub.s32 4294967266, %v5065_v0  ;;  %v2685_v46 = vshrl.u32 %v2681_v30, 16  ;;  %v2695_v1 = vadd.s32 %v2693_v17, %v2691_v5 }
 0x4e7   : > { %v2772_v56 = vsel %vm2771_vm7, %v2770_v32, 0  ;;  %v2644_v6 = vsel %vm2638_vm0, %v2641_v16, %v2643_v27  ;;  %v2665_v2 = vshrl.u32 %v2660_v21, 16  ;;  %v5084_v18 = vsel %vm3111_vm5, 0, %v3110_v31 }
 0x4e8   : > { %v2674_v55 = vadd.s32 %v2673_v3, %v2663_v57  ;;  %v2774_v10 = vand.u32 31, %v2772_v56  ;;  %v2687_v15 = vshrl.u32 %v2682_v43, 16  ;;  %v2696_v41 = vadd.s32 %v2695_v1, %v2685_v46 }
 0x4e9   : > { %v5088_v8 = vadd.s32 %v2690_v48, %v2686_v40  ;;  %v2410_v30 = vadd.s32 127, %v2409_v44  ;;  %v2698_v32 = vmul.u32 %v5027_v49, %v2644_v6  ;;  %v2768_v63 = vor.u32 8388608, %v2767_v34 }
 0x4ea   : > { %v5086_v50 = vadd.s32 %v2674_v55, %v2665_v2  ;;  %v5090_v20 = vsub.s32 32, %v2774_v10  ;;  %v2697_v23 = vadd.s32 %v2696_v41, %v2687_v15  ;;  %v2564_v21 = vsub.s32 4294967266, %v5084_v18 }
 0x4eb   : > { %v2777_v31 = vshll.u32 %v3241_v22, %v2774_v10  ;;  %v2780_v40 = vshll.u32 %v5380_v7, %v2774_v10  ;;  %v5104_v34 = vshrl.u32 %v2772_v56, 5  ;;  %v2783_v25 = vshll.u32 %v5370_v11, %v2774_v10 }
 0x4ec   : > { %vm2700_vm13 = vc.u32 %v5086_v50, %v5088_v8  ;;  %v2778_v43 = vshrl.u32 %v5380_v7, %v5090_v20  ;;  %v2701_v4 = vadd.s32 1, %v2697_v23  ;;  %v2781_v48 = vshrl.u32 %v5370_v11, %v5090_v20 }
 0x4ed   : > { %v2784_v49 = vshrl.u32 %v3239_v14, %v5090_v20  ;;  %v2786_v5 = vshll.u32 %v3239_v14, %v2774_v10  ;;  %v2787_v16 = vshrl.u32 %v5381_v53, %v5090_v20  ;;  %v2789_v7 = vshll.u32 %v5381_v53, %v2774_v10 }
 0x4ee   : > { %v2702_v27 = vsel %vm2700_vm13, %v2701_v4, %v2697_v23  ;;  %v5110_v36 = vor.u32 %v2778_v43, %v2777_v31  ;;  %v5112_v57 = vor.u32 %v2781_v48, %v2780_v40  ;;  %v2790_v46 = vshrl.u32 %v5382_v33, %v5090_v20 }
 0x4ef   : > { %v2703_v3 = vadd.s32 %v2702_v27, %v2698_v32  ;;  %v2785_v17 = vor.u32 %v2784_v49, %v2783_v25  ;;  %v2788_v44 = vor.u32 %v2787_v16, %v2786_v5  ;;  %v2389_v11 = vadd.s32 %v4917_v61, %v4907_v38 }
 0x4f0   : > { %v2405_v14 = vsub.s32 32, %v5065_v0  ;;  %v2411_v1 = vshll.u32 %v2410_v30, 23  ;;  %v2565_v56 = vadd.s32 127, %v2564_v21  ;;  %v2791_v2 = vor.u32 %v2790_v46, %v2789_v7 }
 0x4f1   : > { %v2704_v6 = vadd.s32 536870912, %v2703_v3  ;;  %vm2792_vm8 = vcmp.lt.s32.totalorder %v5104_v34, 1  ;;  %vm2795_vm9 = vcmp.lt.s32.totalorder %v5104_v34, 4  ;;  %vm2794_vm10 = vcmp.lt.s32.totalorder %v5104_v34, 3 }
 0x4f2   : > { %v2800_v53 = vsel %vm2792_vm8, %v5110_v36, %v5112_v57  ;;  %v2801_v33 = vsel %vm2795_vm9, %v2788_v44, 920167782  ;;  %v5129_v38 = vshll.u32 %v2768_v63, 8  ;;  %vm2793_vm11 = vcmp.lt.s32.totalorder %v5104_v34, 2 }
 0x4f3   : > { %v5131_v61 = vshrl.u32 %v2704_v6, 30  ;;  %v2802_v55 = vsel %vm2794_vm10, %v2785_v17, %v2801_v33  ;;  %v2804_v10 = vsel %vm2792_vm8, %v5112_v57, %v2785_v17  ;;  %v2406_v15 = vshll.u32 %v4987_v12, %v5065_v0 }
 0x4f4   : > { %v2407_v41 = vshrl.u32 %v2389_v11, %v2405_v14  ;;  %v2803_v30 = vsel %vm2793_vm11, %v2800_v53, %v2802_v55  ;;  %v2805_v23 = vsel %vm2795_vm9, %v2791_v2, 1326507024  ;;  %v5145_v32 = vor.u32 4788187, %v2411_v1 }
 0x4f5   : > { %v2560_v63 = vsub.s32 32, %v5084_v18  ;;  %v2706_v21 = vshll.u32 %v5131_v61, 30  ;;  %v2806_v31 = vsel %vm2794_vm10, %v2788_v44, %v2805_v23  ;;  %v2566_v43 = vshll.u32 %v2565_v56, 23 }
 0x4f6   : > { %v2807_v12 = vsel %vm2793_vm11, %v2804_v10, %v2806_v31  ;;  %v2809_v0 = vand.u32 65535, %v5129_v38  ;;  %v2834_v4 = vshrl.u32 %v2803_v30, 16  ;;  %v2833_v25 = vand.u32 65535, %v2803_v30 }
 0x4f7   : > { %v2707_v40 = vsub.s32 %v2703_v3, %v2706_v21  ;;  %v2811_v48 = vand.u32 65535, %v2807_v12  ;;  %v2812_v49 = vshrl.u32 %v2807_v12, 16  ;;  %v5154_v5 = vor.u32 %v2407_v41, %v2406_v15 }
 0x4f8   : > { %v2544_v16 = vadd.s32 %v4983_v28, %v4980_v29  ;;  %v2810_v27 = vshrl.u32 %v5129_v38, 16  ;;  %v2836_v7 = vmul.u32 %v2834_v4, %v2809_v0  ;;  %v2413_v44 = vand.u32 2147483647, %v5145_v32 }
 0x4f9   : > { %v2561_v46 = vshll.u32 %v5032_v45, %v5084_v18  ;;  %vm2708_vm14 = vcmp.lt.s32.totalorder %v2707_v40, 0  ;;  %v2709_v11 = vsub.s32 0, %v2707_v40  ;;  %v5162_v3 = vor.u32 4788187, %v2566_v43 }
 0x4fa   : > { %v2562_v14 = vshrl.u32 %v2544_v16, %v2560_v63  ;;  %v2814_v1 = vmul.u32 %v2812_v49, %v2809_v0  ;;  %v2815_v56 = vmul.u32 %v2811_v48, %v2810_v27  ;;  %v2699_v6 = vadd.s32 %v5088_v8, %v5086_v50 }
 0x4fb   : > { %v2710_v2 = vsel %vm2708_vm14, %v2709_v11, %v2707_v40  ;;  %v2837_v29 = vmul.u32 %v2833_v25, %v2810_v27  ;;  %v2839_v28 = vshll.u32 %v2836_v7, 16  ;;  %v2776_v33 = vshrl.u32 %v3241_v22, %v5090_v20 }
 0x4fc   : > { %v2711_v53 = vclz %v2710_v2  ;;  %v2813_v55 = vmul.u32 %v2811_v48, %v2809_v0  ;;  %v2817_v10 = vshll.u32 %v2814_v1, 16  ;;  %v2797_v45 = vsel %vm2795_vm9, %v2785_v17, 2102212464 }
 0x4fd   : > { %v2816_v18 = vmul.u32 %v2812_v49, %v2810_v27  ;;  %v2835_v15 = vmul.u32 %v2833_v25, %v2809_v0  ;;  %v2838_v41 = vmul.u32 %v2834_v4, %v2810_v27  ;;  %v2819_v23 = vshll.u32 %v2815_v56, 16 }
 0x4fe   : > { %v3113_v30 = vadd.s32 4294967294, %v2711_v53  ;;  %vm2821_vm0 = vc.u32 %v2813_v55, %v2817_v10  ;;  %v2823_v32 = vadd.s32 %v2817_v10, %v2813_v55  ;;  %v2841_v8 = vshll.u32 %v2837_v29, 16 }
 0x4ff   : > { %v2822_v50 = vsel %vm2821_vm0, 1, %v3236_v9  ;;  %vm2843_vm2 = vc.u32 %v2835_v15, %v2839_v28  ;;  %v2845_v63 = vadd.s32 %v2839_v28, %v2835_v15  ;;  %v2818_v0 = vshrl.u32 %v2814_v1, 16 }
 0x500   : > { %vm3114_vm15 = vcmp.lt.s32.totalorder %v3113_v30, 0  ;;  %v2824_v21 = vadd.s32 %v2822_v50, %v2816_v18  ;;  %vm2825_vm3 = vc.u32 %v2823_v32, %v2819_v23  ;;  %v2844_v22 = vsel %vm2843_vm2, 1, %v3236_v9 }
 0x501   : > { %v2714_v20 = vsel %vm3114_vm15, 0, %v3113_v30  ;;  %v2826_v17 = vsel %vm2825_vm3, 1, %v3236_v9  ;;  %v2846_v31 = vadd.s32 %v2844_v22, %v2838_v41  ;;  %vm2847_vm4 = vc.u32 %v2845_v63, %v2841_v8 }
 0x502   : > { %v2715_v43 = vsub.s32 32, %v2714_v20  ;;  %v2719_v12 = vsub.s32 4294967266, %v2714_v20  ;;  %v2828_v4 = vadd.s32 %v2826_v17, %v2824_v21  ;;  %v2716_v48 = vshll.u32 %v2707_v40, %v2714_v20 }
 0x503   : > { %v2820_v49 = vshrl.u32 %v2815_v56, 16  ;;  %v2840_v25 = vshrl.u32 %v2836_v7, 16  ;;  %v2848_v16 = vsel %vm2847_vm4, 1, %v3236_v9  ;;  %v2563_v53 = vor.u32 %v2562_v14, %v2561_v46 }
 0x504   : > { %v2717_v27 = vshrl.u32 %v2699_v6, %v2715_v43  ;;  %v2720_v11 = vadd.s32 127, %v2719_v12  ;;  %v2829_v2 = vadd.s32 %v2828_v4, %v2818_v0  ;;  %v2850_v28 = vadd.s32 %v2848_v16, %v2846_v31 }
 0x505   : > { %v2796_v55 = vsel %vm2792_vm8, %v2776_v33, %v5110_v36  ;;  %v2798_v10 = vsel %vm2794_vm10, %v5112_v57, %v2797_v45  ;;  %v2842_v1 = vshrl.u32 %v2837_v29, 16  ;;  %v2415_v9 = vcvt.s32.f32 %v5154_v5 }
 0x506   : > { %v2718_v18 = vor.u32 %v2717_v27, %v2716_v48  ;;  %v2721_v40 = vshll.u32 %v2720_v11, 23  ;;  %v2830_v56 = vadd.s32 %v2829_v2, %v2820_v49  ;;  %v2851_v7 = vadd.s32 %v2850_v28, %v2840_v25 }
 0x507   : > { %v2568_v6 = vand.u32 2147483647, %v5162_v3  ;;  %v2849_v15 = vadd.s32 %v2845_v63, %v2841_v8  ;;  %v2799_v46 = vsel %vm2793_vm11, %v2796_v55, %v2798_v10  ;;  %v2416_v36 = vmul.f32 %v2415_v9, %v2413_v44 }
 0x508   : > { %v2722_v41 = vor.u32 4788187, %v2721_v40  ;;  %v2852_v14 = vadd.s32 %v2851_v7, %v2842_v1  ;;  %v2570_v33 = vcvt.s32.f32 %v2563_v53  ;;  %v2725_v57 = vcvt.s32.f32 %v2718_v18 }
 0x509   : > { %vm2855_vm6 = vc.u32 %v2830_v56, %v2849_v15  ;;  %v2853_v23 = vmul.u32 %v5129_v38, %v2799_v46  ;;  %v2417_v5 = vxor.u32 2147483648, %v2416_v36  ;;  %vm2297_vm5 = vcmp.lt.s32.totalorder %v4822_v52, 0 }
 0x50a   : > { %v2723_v30 = vand.u32 2147483647, %v2722_v41  ;;  %v2856_v29 = vadd.s32 1, %v2852_v14  ;;  %v2571_v45 = vmul.f32 %v2570_v33, %v2568_v6  ;;  %vm2607_vm7 = vcmp.lt.s32.totalorder %v4959_v35, 0 }
 0x50b   : > { %v2418_v34 = vsel %vm2297_vm5, %v2417_v5, %v2416_v36  ;;  %vm2452_vm13 = vcmp.lt.s32.totalorder %v4828_v39, 0  ;;  %vm5196_vm8 = vcmp.le.f32.partialorder %v2295_v26, 0.7853982  ;;  %vm5210_vm9 = vcmp.le.f32.partialorder %v2605_v37, 0.7853982 }
 0x50c   : > { %v2726_v32 = vmul.f32 %v2725_v57, %v2723_v30  ;;  %v2857_v50 = vsel %vm2855_vm6, %v2856_v29, %v2852_v14  ;;  %v2572_v8 = vxor.u32 2147483648, %v2571_v45  ;;  %v5206_v31 = vsel %vm5196_vm8, %v4822_v52, %v2418_v34 }
 0x50d   : > { %v2858_v21 = vadd.s32 %v2857_v50, %v2853_v23  ;;  %vm5216_vm10 = vcmp.le.f32.partialorder %v2450_v59, 0.7853982  ;;  %v5232_v37 = vmul.f32 %v5206_v31, %v5206_v31  ;;  %v2854_v1 = vadd.s32 %v2849_v15, %v2830_v56 }
 0x50e   : > { %v2727_v3 = vxor.u32 2147483648, %v2726_v32  ;;  %v2573_v20 = vsel %vm2452_vm13, %v2572_v8, %v2571_v45  ;;  %v2729_v8 = vsub.s32 4, %v5131_v61  ;;  %vm2762_vm0 = vcmp.lt.s32.totalorder %v5020_v42, 0 }
 0x50f   : > { %v2859_v63 = vadd.s32 536870912, %v2858_v21  ;;  %v5228_v4 = vsel %vm5216_vm10, %v4828_v39, %v2573_v20  ;;  %v2431_v27 = vmul.f32 -0.00019511016, %v5232_v37  ;;  %v2424_v56 = vmul.f32 -0.001358992, %v5232_v37 }
 0x510   : > { %v2728_v38 = vsel %vm2607_vm7, %v2727_v3, %v2726_v32  ;;  %v5240_v49 = vmul.f32 %v5228_v4, %v5228_v4  ;;  %v2419_v20 = vsub.s32 4, %v4965_v13  ;;  %vm5266_vm2 = vcmp.le.f32.partialorder %v2760_v54, 0.7853982 }
 0x511   : > { %v5189_v44 = vshrl.u32 %v2859_v63, 30  ;;  %v5223_v12 = vsel %vm5210_vm9, %v4959_v35, %v2728_v38  ;;  %v2432_v53 = vadd.f32 0.008332121, %v2431_v27  ;;  %v2425_v63 = vadd.f32 0.041655596, %v2424_v56 }
 0x512   : > { %v5236_v48 = vmul.f32 %v5223_v12, %v5223_v12  ;;  %v2586_v28 = vmul.f32 -0.00019511016, %v5240_v49  ;;  %v2579_v57 = vmul.f32 -0.001358992, %v5240_v49  ;;  %vm2748_vm15 = vweird.f32 %v4959_v35 }
 0x513   : > { %v2861_v17 = vshll.u32 %v5189_v44, 30  ;;  %v2433_v14 = vmul.f32 %v2432_v53, %v5232_v37 }
 0x514   : > { %v2741_v11 = vmul.f32 -0.00019511016, %v5236_v48  ;;  %v2587_v7 = vadd.f32 0.008332121, %v2586_v28  ;;  %v2734_v46 = vmul.f32 -0.001358992, %v5236_v48 }
 0x515   : > { %v2862_v0 = vsub.s32 %v2858_v21, %v2861_v17  ;;  %v2434_v23 = vadd.f32 -0.16666654, %v2433_v14  ;;  %v2580_v21 = vadd.f32 0.041655596, %v2579_v57  ;;  %v2574_v17 = vsub.s32 4, %v5012_v62 }
 0x516   : > { %v2742_v10 = vadd.f32 0.008332121, %v2741_v11  ;;  %v2588_v29 = vmul.f32 %v2587_v7, %v5240_v49  ;;  %v2735_v45 = vadd.f32 0.041655596, %v2734_v46  ;;  %v2730_v11 = vsel %vm2607_vm7, %v2729_v8, %v5131_v61 }
 0x517   : > { %vm2863_vm11 = vcmp.lt.s32.totalorder %v2862_v0, 0  ;;  %v2864_v59 = vsub.s32 0, %v2862_v0  ;;  %v2575_v61 = vsel %vm2452_vm13, %v2574_v17, %v5012_v62 }
 0x518   : > { %v2743_v36 = vmul.f32 %v2742_v10, %v5236_v48  ;;  %v2589_v3 = vadd.f32 -0.16666654, %v2588_v29  ;;  %v2736_v38 = vmul.f32 %v2735_v45, %v5236_v48  ;;  %v2420_v10 = vsel %vm2297_vm5, %v2419_v20, %v4965_v13 }
 0x519   : > { %v2865_v25 = vsel %vm2863_vm11, %v2864_v59, %v2862_v0  ;;  %v2577_v13 = vsel %vm5216_vm10, 0, %v2575_v61 }
 0x51a   : > { %v2866_v16 = vclz %v2865_v25  ;;  %v2744_v32 = vadd.f32 -0.16666654, %v2743_v36  ;;  %v2581_v25 = vmul.f32 %v2580_v21, %v5240_v49  ;;  %v2590_v27 = vmul.f32 %v2589_v3, %v5240_v49 }
 0x51c   : > { %v3116_v2 = vadd.s32 4294967294, %v2866_v16  ;;  %v2435_v16 = vmul.f32 %v2434_v23, %v5232_v37  ;;  %v2594_v23 = vadd.s32 3, %v2577_v13 }
 0x51e   : > { %vm3117_vm14 = vcmp.lt.s32.totalorder %v3116_v2, 0 }
 0x51f   : > { %v2869_v55 = vsel %vm3117_vm14, 0, %v3116_v2  ;;  %v2426_v2 = vmul.f32 %v2425_v63, %v5232_v37 }
 0x520   : > { %v2870_v18 = vsub.s32 32, %v2869_v55  ;;  %v2874_v40 = vsub.s32 4294967266, %v2869_v55  ;;  %v2871_v9 = vshll.u32 %v2862_v0, %v2869_v55  ;;  %v2745_v0 = vmul.f32 %v2744_v32, %v5236_v48 }
 0x521   : > { %v2737_v55 = vadd.f32 -0.4999988, %v2736_v38  ;;  %v2427_v46 = vadd.f32 -0.4999988, %v2426_v2 }
 0x522   : > { %v2872_v6 = vshrl.u32 %v2854_v1, %v2870_v18  ;;  %v2875_v41 = vadd.s32 127, %v2874_v40  ;;  %v2884_v1 = vsub.s32 4, %v5189_v44  ;;  %v2732_v18 = vsel %vm5210_vm9, 0, %v2730_v11 }
 0x523   : > { %v2746_v40 = vadd.f32 1.0, %v2745_v0  ;;  %v2738_v36 = vmul.f32 %v2737_v55, %v5236_v48  ;;  %v2428_v48 = vmul.f32 %v2427_v46, %v5232_v37 }
 0x524   : > { %v2873_v33 = vor.u32 %v2872_v6, %v2871_v9  ;;  %v2876_v30 = vshll.u32 %v2875_v41, 23  ;;  %v2582_v9 = vadd.f32 -0.4999988, %v2581_v25  ;;  %v2436_v6 = vadd.f32 1.0, %v2435_v16 }
 0x525   : > { %v2591_v41 = vadd.f32 1.0, %v2590_v27  ;;  %v2885_v43 = vsel %vm2762_vm0, %v2884_v1, %v5189_v44  ;;  %v2747_v57 = vmul.f32 %v2746_v40, %v5223_v12 }
 0x526   : > { %v2877_v15 = vor.u32 4788187, %v2876_v30  ;;  %v2880_v5 = vcvt.s32.f32 %v2873_v33  ;;  %v2422_v33 = vsel %vm5196_vm8, 0, %v2420_v10  ;;  %v2749_v30 = vadd.s32 3, %v2732_v18 }
 0x527   : > { %v2437_v26 = vmul.f32 %v2436_v6, %v5206_v31  ;;  %v2592_v45 = vmul.f32 %v2591_v41, %v5228_v4  ;;  %v2887_v22 = vsel %vm5266_vm2, 0, %v2885_v43  ;;  %v2439_v44 = vadd.s32 3, %v2422_v33 }
 0x528   : > { %v2878_v50 = vand.u32 2147483647, %v2877_v15  ;;  %v2583_v15 = vmul.f32 %v2582_v9, %v5240_v49  ;;  %v2750_v21 = vand.u32 3, %v2749_v30  ;;  %v2753_v12 = vxor.u32 2147483648, %v2747_v57 }
 0x529   : > { %v2443_v49 = vxor.u32 2147483648, %v2437_v26  ;;  %v2595_v31 = vand.u32 3, %v2594_v23  ;;  %v2429_v4 = vadd.f32 1.0, %v2428_v48  ;;  %v2598_v38 = vxor.u32 2147483648, %v2592_v45 }
 0x52a   : > { %v2881_v34 = vmul.f32 %v2880_v5, %v2878_v50  ;;  %v2739_v5 = vadd.f32 1.0, %v2738_v36  ;;  %v2584_v63 = vadd.f32 1.0, %v2583_v15  ;;  %vm2751_vm3 = vcmp.lt.s32.totalorder %v2750_v21, 2 }
 0x52b   : > { %vm2752_vm4 = vcmp.eq.s32.totalorder %v2750_v21, 0  ;;  %vm2755_vm6 = vcmp.eq.s32.totalorder %v2750_v21, 2  ;;  %v2440_v0 = vand.u32 3, %v2439_v44  ;;  %vm2596_vm5 = vcmp.lt.s32.totalorder %v2595_v31, 2 }
 0x52c   : > { %v2882_v59 = vxor.u32 2147483648, %v2881_v34  ;;  %v2756_v17 = vxor.u32 2147483648, %v2739_v5  ;;  %v2754_v16 = vsel %vm2752_vm4, %v2739_v5, %v2753_v12  ;;  %v2601_v27 = vxor.u32 2147483648, %v2584_v63 }
 0x52d   : > { %vm2597_vm7 = vcmp.eq.s32.totalorder %v2595_v31, 0  ;;  %v2446_v2 = vxor.u32 2147483648, %v2429_v4  ;;  %vm2600_vm13 = vcmp.eq.s32.totalorder %v2595_v31, 2  ;;  %vm2441_vm8 = vcmp.lt.s32.totalorder %v2440_v0, 2 }
 0x52e   : > { %v2883_v53 = vsel %vm2762_vm0, %v2882_v59, %v2881_v34  ;;  %v2904_v34 = vadd.s32 3, %v2887_v22  ;;  %v2757_v55 = vsel %vm2755_vm6, %v2756_v17, %v2747_v57  ;;  %v2599_v10 = vsel %vm2597_vm7, %v2584_v63, %v2598_v38 }
 0x52f   : > { %v2886_v54 = vsel %vm5266_vm2, %v5020_v42, %v2883_v53  ;;  %v2758_v61 = vsel %vm2751_vm3, %v2754_v16, %v2757_v55  ;;  %vm2442_vm9 = vcmp.eq.s32.totalorder %v2440_v0, 0  ;;  %v2602_v18 = vsel %vm2600_vm13, %v2601_v27, %v2592_v45 }
 0x530   : > { %v2888_v7 = vmul.f32 %v2886_v54, %v2886_v54  ;;  %v2905_v11 = vand.u32 3, %v2904_v34  ;;  %v2444_v40 = vsel %vm2442_vm9, %v2429_v4, %v2443_v49  ;;  %vm2445_vm10 = vcmp.eq.s32.totalorder %v2440_v0, 2 }
 0x531   : > { %v2447_v9 = vsel %vm2445_vm10, %v2446_v2, %v2437_v26  ;;  %v2759_v41 = vsel %vm2748_vm15, nan, %v2758_v61  ;;  %vm2903_vm2 = vweird.f32 %v5020_v42  ;;  %vm2593_vm3 = vweird.f32 %v4828_v39 }
 0x532   : > { %v2896_v14 = vmul.f32 -0.00019511016, %v2888_v7  ;;  %v2889_v62 = vmul.f32 -0.001358992, %v2888_v7  ;;  %vm2907_vm11 = vcmp.eq.s32.totalorder %v2905_v11, 0  ;;  %vm2910_vm14 = vcmp.eq.s32.totalorder %v2905_v11, 2 }
 0x533   : > { %vm2906_vm0 = vcmp.lt.s32.totalorder %v2905_v11, 2  ;;  %v2448_v13 = vsel %vm2441_vm8, %v2444_v40, %v2447_v9  ;;  %v2917_v33 = vmul.f32 %v2759_v41, %v4269_v58  ;;  %vm2438_vm4 = vweird.f32 %v4822_v52  ;;  %v2923_v58 = vld [vmem:[%s5355_s4] sm:$0x1] }
 0x534   : > { %v2897_v29 = vadd.f32 0.008332121, %v2896_v14  ;;  %v2890_v56 = vadd.f32 0.041655596, %v2889_v62  ;;  %v2449_v30 = vsel %vm2438_vm4, nan, %v2448_v13 }
 0x535   : > { %v2921_v42 = vadd.f32 %v2917_v33, %v4225_v24  ;;  %v2915_v39 = vmul.f32 %v2449_v30, %v4289_v51 }
 0x536   : > { %v2898_v32 = vmul.f32 %v2897_v29, %v2888_v7  ;;  %v2891_v50 = vmul.f32 %v2890_v56, %v2888_v7 }
 0x537   : > { %v2919_v29 = vadd.f32 %v2915_v39, %v4280_v47 }
 0x538   : > { %v2899_v3 = vadd.f32 -0.16666654, %v2898_v32  ;;  %v2892_v8 = vadd.f32 -0.4999988, %v2891_v50 }
 0x53a   : > { %v2900_v37 = vmul.f32 %v2899_v3, %v2888_v7  ;;  %v2893_v20 = vmul.f32 %v2892_v8, %v2888_v7  ;;  %v2603_v7 = vsel %vm2596_vm5, %v2599_v10, %v2602_v18 }
 0x53b   : > { %v2604_v62 = vsel %vm2593_vm3, nan, %v2603_v7 }
 0x53c   : > { %v2901_v59 = vadd.f32 1.0, %v2900_v37  ;;  %v2894_v25 = vadd.f32 1.0, %v2893_v20  ;;  %v2916_v35 = vmul.f32 %v2604_v62, %v4283_v60 }
 0x53e   : > { %v2902_v28 = vmul.f32 %v2901_v59, %v2886_v54  ;;  %v2911_v53 = vxor.u32 2147483648, %v2894_v25  ;;  %v2920_v57 = vadd.f32 %v2916_v35, %v4211_v19 }
 0x540   : > { %v2908_v1 = vxor.u32 2147483648, %v2902_v28  ;;  %v2912_v54 = vsel %vm2910_vm14, %v2911_v53, %v2902_v28 }
 0x542   : > { %v2909_v6 = vsel %vm2907_vm11, %v2894_v25, %v2908_v1 }
 0x543   : > { %v2913_v46 = vsel %vm2906_vm0, %v2909_v6, %v2912_v54 }
 0x544   : > { %v2914_v14 = vsel %vm2903_vm2, nan, %v2913_v46 }
 0x545   : > { %v2918_v36 = vmul.f32 0.0, %v2914_v14 }
 0x547   : > { %v2922_v43 = vadd.f32 1.0, %v2918_v36 }
 0x549   : > { %3118 = vmatpush.msk.msrb.mxu1 %vm908_vm1, %v2922_v43 }
 0x54b   : > { %2943 = vmatpush.msrb.mxu1 %v2921_v42 }
 0x54d   : > { %2944 = vmatpush.msrb.mxu1 %v2920_v57 }
 0x54f   : > { %2945 = vmatpush.msrb.mxu1 %v2919_v29 }
 0x550   : > { %3119 = vmatmul.msk.f32.vlgmr.msrb.gmra.mxu1 %vm895_vm12, %v2923_v58 }
 0x5cd   : > { %v2947_v19 = vpop.f32.mrf.mxu1 }
 0x5ce   : > { %2950 = vst [vmem:[%s217_s12] sm:$0x1] %v2947_v19 }
 0x5cf   : > { %3199 = shalt.err (!%p3196_p3)
}
 0x5d0   : > { %3122 = dma.vmem_to_hbm [thread:$0]  (%p3312_p5), %s2963_s13, 16, %s2965_s14, %s2952_s15  }
 0x5d1 PF: > { %p3128_p4 = scmp.ge.s32.totalorder %s3234_s21, 2  ;;  %s2976_s6 = sand.u32 1, %s3222_s18  }
 0x5d2   : > { %s2977_s7 = scalar_lea.sflag [#allocation3], %s2976_s6 }
 0x5d3   : > { %p3125_p7 = pnand %p3128_p4, %p3316_p6 }
 0x5d5   : > { %p3126_p8 = pneg %p3125_p7 }
 0x5d7   : > { %3217 = dma.done.wait (%p3126_p8), %s2977_s7, 16  }
 0x5d8   : > { %3219 = vsyncadd (%p3126_p8), %s2977_s7, 4294967280  ;;  %p15_p9 = scmp.ge.s32.totalorder %s3299_s24, 4   ;;  %s5407_s18 = smov %s3226_s19 }
 0x5d9   : > { %s5408_s19 = smov %s3230_s20  ;;  %s5409_s20 = smov %s3310_s27 }
 0x5da   : > { %s5410_s21 = smov %s3299_s24  ;;  %17 = sbr.rel (!%p15_p9) target bundleno = 3 (0x3), region = 77 }
 0x5df   :  { %2982 = vsyncpa [#allocation3], 1 }
 0x5e0   :  { %2984 = vsyncpa [#allocation3 + $0x1], 1 }

</bundles_post_ra>
